<compile_context>
chip_gen: v7x
topology: tpu7x:2x2x1
jax: 0.10.0
libtpu: 0.0.40
codegen_flags: <defaults>
</compile_context>

<pallas_src>
import jax
import jax.numpy as jnp
from jax.experimental import pallas as pl
from jax.experimental.pallas import tpu as pltpu


# ----------------------------------------------------------------------------
# Pallas implementation
# ----------------------------------------------------------------------------
def psablock(x_nchw, params, num_heads=4, attn_ratio=0.5, eps=1e-5):
    """x_nchw: (B, C, H, W) float32.  params: dict of raw (PyTorch-style) weights."""
    B, C, H, W = x_nchw.shape
    N = H * W
    nh = num_heads
    hd = C // nh
    kd = int(hd * attn_ratio)
    hq = C + 2 * nh * kd              # qkv conv output channels
    scale = kd ** -0.5
    assert C % nh == 0

    # ---- BatchNorm folding (eval semantics) -------------------------------
    def fold(w, bn):
        g, b, m, v = bn
        s = g / jnp.sqrt(v + eps)
        wf = w * s.reshape((-1,) + (1,) * (w.ndim - 1))
        return wf.astype(jnp.float32), (b - m * s).astype(jnp.float32)

    # qkv: fold BN, permute output channels to [V | Q | K] (head-major), fold
    # the attention scale into the Q block.
    w_qkv_f, b_qkv_f = fold(params["w_qkv"], params["bn_qkv"])      # (hq, C), (hq,)
    group = 2 * kd + hd
    perm = ([h_ * group + 2 * kd + d for h_ in range(nh) for d in range(hd)] +   # V
            [h_ * group + r for h_ in range(nh) for r in range(kd)] +            # Q
            [h_ * group + kd + r for h_ in range(nh) for r in range(kd)])        # K
    perm = jnp.asarray(perm, dtype=jnp.int32)
    w_qkv_f = w_qkv_f[perm]
    b_qkv_f = b_qkv_f[perm]
    col_scale = jnp.ones((hq,), jnp.float32).at[C:C + nh * kd].set(scale)
    w_qkv_f = w_qkv_f * col_scale[:, None]
    b_qkv_f = b_qkv_f * col_scale
    wqkv = w_qkv_f.T                                                # (C, hq)
    bqkv = b_qkv_f.reshape(1, hq)

    # depthwise 3x3 positional-encoding conv
    w_pe_f, b_pe_f = fold(params["w_pe"], params["bn_pe"])          # (C, 3, 3)
    wpe = w_pe_f.reshape(C, 9).T                                    # (9, C), row = ky*3+kx
    bpe = b_pe_f.reshape(1, C)

    w_proj_f, b_proj_f = fold(params["w_proj"], params["bn_proj"])
    wproj = w_proj_f.T                                              # (C, C)
    bproj = b_proj_f.reshape(1, C)

    w_f1_f, b_f1_f = fold(params["w_f1"], params["bn_f1"])          # (2C, C)
    w1 = w_f1_f.T                                                   # (C, 2C)
    b1 = b_f1_f.reshape(1, 2 * C)
    w_f2_f, b_f2_f = fold(params["w_f2"], params["bn_f2"])          # (C, 2C)
    w2 = w_f2_f.T                                                   # (2C, C)
    b2 = b_f2_f.reshape(1, C)

    # NCHW -> channels-last (B, N, C)
    x_cl = jnp.transpose(x_nchw, (0, 2, 3, 1)).reshape(B, N, C).astype(jnp.float32)

    # ---- the fused kernel (one batch element per grid step) ---------------
    def kernel(x_ref, wqkv_ref, bqkv_ref, wpe_ref, bpe_ref,
               wproj_ref, bproj_ref, w1_ref, b1_ref, w2_ref, b2_ref, o_ref):
        x = x_ref[0]                                                # (N, C) f32

        # qkv = 1x1 conv + folded BN (+ folded attention scale on Q columns)
        qkv = jnp.dot(x, wqkv_ref[...],
                      preferred_element_type=jnp.float32) + bqkv_ref[...]
        v_all = qkv[:, :C]                                          # (N, C)
        q_all = qkv[:, C:C + nh * kd]                               # (N, nh*kd)
        k_all = qkv[:, C + nh * kd:]                                # (N, nh*kd)

        # per-head softmax attention (heads unrolled; nh is small & static).
        # Normalization is deferred past the P@V matmul: (N, hd) multiply by an
        # EUP reciprocal instead of an (N, N) divide.
        heads = []
        for h_ in range(nh):
            q = q_all[:, h_ * kd:(h_ + 1) * kd]                     # (N, kd)
            k = k_all[:, h_ * kd:(h_ + 1) * kd]                     # (N, kd)
            v = v_all[:, h_ * hd:(h_ + 1) * hd]                     # (N, hd)
            s = jnp.dot(q, k.T, preferred_element_type=jnp.float32)  # (N, N)
            m = jnp.max(s, axis=-1, keepdims=True)                  # XLU reduce
            p = jnp.exp(s - m)                                      # EUP
            l = jnp.sum(p, axis=-1, keepdims=True)                  # XLU reduce
            o_h = jnp.dot(p, v, preferred_element_type=jnp.float32)  # (N, hd)
            heads.append(o_h * pl.reciprocal(l, approx=True))
        attn_out = jnp.concatenate(heads, axis=-1)                  # (N, C)

        # positional encoding: depthwise 3x3 conv (pad=1) on v, folded BN
        v_img = v_all.reshape(H, W, C)
        zr = jnp.zeros((1, W, C), jnp.float32)
        vp = jnp.concatenate([zr, v_img, zr], axis=0)               # (H+2, W, C)
        zc = jnp.zeros((H + 2, 1, C), jnp.float32)
        vp = jnp.concatenate([zc, vp, zc], axis=1)                  # (H+2, W+2, C)
        wpe_all = wpe_ref[...]                                      # (9, C)
        pe = jnp.zeros((H, W, C), jnp.float32)
        for ky in range(3):
            for kx in range(3):
                i = ky * 3 + kx
                wk = wpe_all[i:i + 1, :].reshape(1, 1, C)
                pe = pe + vp[ky:ky + H, kx:kx + W, :] * wk
        pe = pe.reshape(N, C) + bpe_ref[...]

        # proj (1x1 conv + folded BN), then attention shortcut
        a = attn_out + pe
        a = jnp.dot(a, wproj_ref[...],
                    preferred_element_type=jnp.float32) + bproj_ref[...]
        x1 = x + a

        # FFN: Conv(c->2c)+BN+SiLU, Conv(2c->c)+BN, shortcut
        t = jnp.dot(x1, w1_ref[...],
                    preferred_element_type=jnp.float32) + b1_ref[...]
        t = t * jax.nn.sigmoid(t)
        f = jnp.dot(t, w2_ref[...],
                    preferred_element_type=jnp.float32) + b2_ref[...]
        o_ref[0] = (x1 + f).astype(o_ref.dtype)

    out_cl = pl.pallas_call(
        kernel,
        out_shape=jax.ShapeDtypeStruct((B, N, C), jnp.float32),
        grid_spec=pltpu.PrefetchScalarGridSpec(
            num_scalar_prefetch=0,
            grid=(B,),
            in_specs=[
                pl.BlockSpec((1, N, C), lambda b: (b, 0, 0)),      # x
                pl.BlockSpec((C, hq), lambda b: (0, 0)),           # wqkv
                pl.BlockSpec((1, hq), lambda b: (0, 0)),           # bqkv
                pl.BlockSpec((9, C), lambda b: (0, 0)),            # wpe
                pl.BlockSpec((1, C), lambda b: (0, 0)),            # bpe
                pl.BlockSpec((C, C), lambda b: (0, 0)),            # wproj
                pl.BlockSpec((1, C), lambda b: (0, 0)),            # bproj
                pl.BlockSpec((C, 2 * C), lambda b: (0, 0)),        # w1
                pl.BlockSpec((1, 2 * C), lambda b: (0, 0)),        # b1
                pl.BlockSpec((2 * C, C), lambda b: (0, 0)),        # w2
                pl.BlockSpec((1, C), lambda b: (0, 0)),            # b2
            ],
            out_specs=pl.BlockSpec((1, N, C), lambda b: (b, 0, 0)),
        ),
        compiler_params=pltpu.CompilerParams(
            dimension_semantics=("parallel",),
            vmem_limit_bytes=32 * 1024 * 1024,
        ),
    )(x_cl, wqkv, bqkv, wpe, bpe, wproj, bproj, w1, b1, w2, b2)

    # back to NCHW
    return jnp.transpose(out_cl.reshape(B, H, W, C), (0, 3, 1, 2))


# ----------------------------------------------------------------------------
# Pure-JAX reference mirroring the PyTorch module (eval-mode BN)
# ----------------------------------------------------------------------------
def _bn_ref(y, bn, eps=1e-5):
    g, b, m, v = bn
    s = g / jnp.sqrt(v + eps)
    return y * s[None, :, None, None] + (b - m * s)[None, :, None, None]


def _conv1x1_ref(x, w):                 # w: (O, I)
    return jnp.einsum("bchw,oc->bohw", x, w)


def _dwconv3x3_ref(x, w):               # w: (C, 3, 3), padding 1
    _, C, H, W = x.shape
    xp = jnp.pad(x, ((0, 0), (0, 0), (1, 1), (1, 1)))
    out = jnp.zeros_like(x)
    for ky in range(3):
        for kx in range(3):
            out = out + xp[:, :, ky:ky + H, kx:kx + W] * w[None, :, ky, kx, None, None]
    return out


def _reference(x, params, num_heads, attn_ratio):
    B, C, H, W = x.shape
    N = H * W
    nh = num_heads
    hd = C // nh
    kd = int(hd * attn_ratio)
    scale = kd ** -0.5

    # Attention
    qkv = _bn_ref(_conv1x1_ref(x, params["w_qkv"]), params["bn_qkv"])
    qkv = qkv.reshape(B, nh, 2 * kd + hd, N)
    q, k, v = qkv[:, :, :kd], qkv[:, :, kd:2 * kd], qkv[:, :, 2 * kd:]
    attn = jnp.einsum("bhdn,bhdm->bhnm", q, k) * scale
    attn = jax.nn.softmax(attn, axis=-1)
    o = jnp.einsum("bhdm,bhnm->bhdn", v, attn).reshape(B, C, H, W)
    pe = _bn_ref(_dwconv3x3_ref(v.reshape(B, C, H, W), params["w_pe"]), params["bn_pe"])
    a = _bn_ref(_conv1x1_ref(o + pe, params["w_proj"]), params["bn_proj"])

    x = x + a                           # shortcut
    # FFN
    f = _bn_ref(_conv1x1_ref(x, params["w_f1"]), params["bn_f1"])
    f = f * jax.nn.sigmoid(f)           # SiLU
    f = _bn_ref(_conv1x1_ref(f, params["w_f2"]), params["bn_f2"])
    return x + f                        # shortcut


# ----------------------------------------------------------------------------
if __name__ == "__main__":
    key = jax.random.PRNGKey(0)
    ks = jax.random.split(key, 12)

    B, C, H, W = 2, 64, 8, 8
    nh, attn_ratio = 4, 0.5
    hd = C // nh
    kd = int(hd * attn_ratio)
    hq = C + 2 * nh * kd

    def bn_params(k, n):
        k1, k2, k3, k4 = jax.random.split(k, 4)
        return (1.0 + 0.1 * jax.random.normal(k1, (n,), jnp.float32),
                0.1 * jax.random.normal(k2, (n,), jnp.float32),
                0.1 * jax.random.normal(k3, (n,), jnp.float32),
                jnp.abs(jax.random.normal(k4, (n,), jnp.float32)) + 0.5)

    x = jax.random.normal(ks[0], (B, C, H, W), dtype=jnp.float32)
    params = {
        "w_qkv": 0.1 * jax.random.normal(ks[1], (hq, C), jnp.float32),
        "bn_qkv": bn_params(ks[2], hq),
        "w_pe": 0.1 * jax.random.normal(ks[3], (C, 3, 3), jnp.float32),
        "bn_pe": bn_params(ks[4], C),
        "w_proj": 0.1 * jax.random.normal(ks[5], (C, C), jnp.float32),
        "bn_proj": bn_params(ks[6], C),
        "w_f1": 0.1 * jax.random.normal(ks[7], (2 * C, C), jnp.float32),
        "bn_f1": bn_params(ks[8], 2 * C),
        "w_f2": 0.1 * jax.random.normal(ks[9], (C, 2 * C), jnp.float32),
        "bn_f2": bn_params(ks[10], C),
    }

    out = psablock(x, params, num_heads=nh, attn_ratio=attn_ratio)
    out = jax.block_until_ready(out)

    ref = _reference(x, params, num_heads=nh, attn_ratio=attn_ratio)
    assert out.shape == (B, C, H, W)
    assert jnp.allclose(out, ref, atol=5e-2, rtol=5e-2), \
        f"max abs diff = {float(jnp.max(jnp.abs(out - ref)))}"

    print("KERNEL_OK")
</pallas_src>

<mosaic_0001>
module attributes {stable_mosaic.version = 11 : i64} {
  func.func @kernel(%arg0: i32, %arg1: memref<1x64x64xf32, #tpu.memory_space<vmem>>, %arg2: memref<64x128xf32, #tpu.memory_space<vmem>>, %arg3: memref<1x128xf32, #tpu.memory_space<vmem>>, %arg4: memref<9x64xf32, #tpu.memory_space<vmem>>, %arg5: memref<1x64xf32, #tpu.memory_space<vmem>>, %arg6: memref<64x64xf32, #tpu.memory_space<vmem>>, %arg7: memref<1x64xf32, #tpu.memory_space<vmem>>, %arg8: memref<64x128xf32, #tpu.memory_space<vmem>>, %arg9: memref<1x128xf32, #tpu.memory_space<vmem>>, %arg10: memref<128x64xf32, #tpu.memory_space<vmem>>, %arg11: memref<1x64xf32, #tpu.memory_space<vmem>>, %arg12: memref<1x64x64xf32, #tpu.memory_space<vmem>>) attributes {dimension_semantics = [#tpu.dimension_semantics<parallel>], iteration_bounds = array<i64: 2>, scalar_prefetch = 0 : i64, scratch_operands = 0 : i64, tpu.core_type = #tpu.core_type<tc>, window_params = [{transform_indices = @transform_0, window_bounds = array<i64: 1, 64, 64>}, {pipeline_mode = #tpu.pipeline_mode<synchronous>, transform_indices = @transform_1, window_bounds = array<i64: 64, 128>}, {pipeline_mode = #tpu.pipeline_mode<synchronous>, transform_indices = @transform_2, window_bounds = array<i64: 1, 128>}, {pipeline_mode = #tpu.pipeline_mode<synchronous>, transform_indices = @transform_3, window_bounds = array<i64: 9, 64>}, {pipeline_mode = #tpu.pipeline_mode<synchronous>, transform_indices = @transform_4, window_bounds = array<i64: 1, 64>}, {pipeline_mode = #tpu.pipeline_mode<synchronous>, transform_indices = @transform_5, window_bounds = array<i64: 64, 64>}, {pipeline_mode = #tpu.pipeline_mode<synchronous>, transform_indices = @transform_6, window_bounds = array<i64: 1, 64>}, {pipeline_mode = #tpu.pipeline_mode<synchronous>, transform_indices = @transform_7, window_bounds = array<i64: 64, 128>}, {pipeline_mode = #tpu.pipeline_mode<synchronous>, transform_indices = @transform_8, window_bounds = array<i64: 1, 128>}, {pipeline_mode = #tpu.pipeline_mode<synchronous>, transform_indices = @transform_9, window_bounds = array<i64: 128, 64>}, {pipeline_mode = #tpu.pipeline_mode<synchronous>, transform_indices = @transform_10, window_bounds = array<i64: 1, 64>}, {transform_indices = @transform_11, window_bounds = array<i64: 1, 64, 64>}]} {
    %c0 = arith.constant 0 : index
    %c0_0 = arith.constant 0 : index
    %c0_1 = arith.constant 0 : index
    %0 = vector.load %arg1[%c0, %c0_0, %c0_1] : memref<1x64x64xf32, #tpu.memory_space<vmem>>, vector<1x64x64xf32>
    %1 = vector.shape_cast %0 : vector<1x64x64xf32> to vector<64x64xf32>
    %c0_2 = arith.constant 0 : index
    %c0_3 = arith.constant 0 : index
    %2 = vector.load %arg2[%c0_2, %c0_3] : memref<64x128xf32, #tpu.memory_space<vmem>>, vector<64x128xf32>
    %cst = arith.constant dense<0.000000e+00> : vector<64x128xf32>
    %3 = tpu.matmul %1, %2, %cst {dimension_numbers = #tpu.dot_dimension_numbers<[1], [0], [0], [1], [0, 0, 1, 1], [], []>} : vector<64x64xf32>, vector<64x128xf32>, vector<64x128xf32> -> vector<64x128xf32>
    %c0_4 = arith.constant 0 : index
    %c0_5 = arith.constant 0 : index
    %4 = vector.load %arg3[%c0_4, %c0_5] : memref<1x128xf32, #tpu.memory_space<vmem>>, vector<1x128xf32>
    %5 = vector.broadcast %4 : vector<1x128xf32> to vector<64x128xf32>
    %6 = arith.addf %3, %5 : vector<64x128xf32>
    %7 = vector.extract_strided_slice %6 {offsets = [0, 0], sizes = [64, 64], strides = [1, 1]} : vector<64x128xf32> to vector<64x64xf32>
    %8 = vector.extract_strided_slice %6 {offsets = [0, 64], sizes = [64, 32], strides = [1, 1]} : vector<64x128xf32> to vector<64x32xf32>
    %9 = vector.extract_strided_slice %6 {offsets = [0, 96], sizes = [64, 32], strides = [1, 1]} : vector<64x128xf32> to vector<64x32xf32>
    %10 = vector.extract_strided_slice %8 {offsets = [0, 0], sizes = [64, 8], strides = [1, 1]} : vector<64x32xf32> to vector<64x8xf32>
    %11 = vector.extract_strided_slice %9 {offsets = [0, 0], sizes = [64, 8], strides = [1, 1]} : vector<64x32xf32> to vector<64x8xf32>
    %12 = vector.extract_strided_slice %7 {offsets = [0, 0], sizes = [64, 16], strides = [1, 1]} : vector<64x64xf32> to vector<64x16xf32>
    %13 = tpu.transpose %11, [1, 0] : vector<64x8xf32> -> vector<8x64xf32>
    %cst_6 = arith.constant dense<0.000000e+00> : vector<64x64xf32>
    %14 = tpu.matmul %10, %13, %cst_6 {dimension_numbers = #tpu.dot_dimension_numbers<[1], [0], [0], [1], [0, 0, 1, 1], [], []>} : vector<64x8xf32>, vector<8x64xf32>, vector<64x64xf32> -> vector<64x64xf32>
    %cst_7 = arith.constant dense<0xFF800000> : vector<64xf32>
    %15 = vector.multi_reduction <maximumf>, %14, %cst_7 [1] : vector<64x64xf32> to vector<64xf32>
    %16 = vector.shape_cast %15 : vector<64xf32> to vector<64x1xf32>
    %17 = vector.broadcast %16 : vector<64x1xf32> to vector<64x64xf32>
    %18 = arith.subf %14, %17 : vector<64x64xf32>
    %19 = math.exp %18 : vector<64x64xf32>
    %cst_8 = arith.constant dense<0.000000e+00> : vector<64xf32>
    %20 = vector.multi_reduction <add>, %19, %cst_8 [1] : vector<64x64xf32> to vector<64xf32>
    %21 = vector.shape_cast %20 : vector<64xf32> to vector<64x1xf32>
    %cst_9 = arith.constant dense<0.000000e+00> : vector<64x16xf32>
    %22 = tpu.matmul %19, %12, %cst_9 {dimension_numbers = #tpu.dot_dimension_numbers<[1], [0], [0], [1], [0, 0, 1, 1], [], []>} : vector<64x64xf32>, vector<64x16xf32>, vector<64x16xf32> -> vector<64x16xf32>
    %23 = tpu.reciprocal %21 {approx = true} : vector<64x1xf32> -> vector<64x1xf32>
    %24 = vector.broadcast %23 : vector<64x1xf32> to vector<64x16xf32>
    %25 = arith.mulf %22, %24 : vector<64x16xf32>
    %26 = vector.extract_strided_slice %8 {offsets = [0, 8], sizes = [64, 8], strides = [1, 1]} : vector<64x32xf32> to vector<64x8xf32>
    %27 = vector.extract_strided_slice %9 {offsets = [0, 8], sizes = [64, 8], strides = [1, 1]} : vector<64x32xf32> to vector<64x8xf32>
    %28 = vector.extract_strided_slice %7 {offsets = [0, 16], sizes = [64, 16], strides = [1, 1]} : vector<64x64xf32> to vector<64x16xf32>
    %29 = tpu.transpose %27, [1, 0] : vector<64x8xf32> -> vector<8x64xf32>
    %cst_10 = arith.constant dense<0.000000e+00> : vector<64x64xf32>
    %30 = tpu.matmul %26, %29, %cst_10 {dimension_numbers = #tpu.dot_dimension_numbers<[1], [0], [0], [1], [0, 0, 1, 1], [], []>} : vector<64x8xf32>, vector<8x64xf32>, vector<64x64xf32> -> vector<64x64xf32>
    %cst_11 = arith.constant dense<0xFF800000> : vector<64xf32>
    %31 = vector.multi_reduction <maximumf>, %30, %cst_11 [1] : vector<64x64xf32> to vector<64xf32>
    %32 = vector.shape_cast %31 : vector<64xf32> to vector<64x1xf32>
    %33 = vector.broadcast %32 : vector<64x1xf32> to vector<64x64xf32>
    %34 = arith.subf %30, %33 : vector<64x64xf32>
    %35 = math.exp %34 : vector<64x64xf32>
    %cst_12 = arith.constant dense<0.000000e+00> : vector<64xf32>
    %36 = vector.multi_reduction <add>, %35, %cst_12 [1] : vector<64x64xf32> to vector<64xf32>
    %37 = vector.shape_cast %36 : vector<64xf32> to vector<64x1xf32>
    %cst_13 = arith.constant dense<0.000000e+00> : vector<64x16xf32>
    %38 = tpu.matmul %35, %28, %cst_13 {dimension_numbers = #tpu.dot_dimension_numbers<[1], [0], [0], [1], [0, 0, 1, 1], [], []>} : vector<64x64xf32>, vector<64x16xf32>, vector<64x16xf32> -> vector<64x16xf32>
    %39 = tpu.reciprocal %37 {approx = true} : vector<64x1xf32> -> vector<64x1xf32>
    %40 = vector.broadcast %39 : vector<64x1xf32> to vector<64x16xf32>
    %41 = arith.mulf %38, %40 : vector<64x16xf32>
    %42 = vector.extract_strided_slice %8 {offsets = [0, 16], sizes = [64, 8], strides = [1, 1]} : vector<64x32xf32> to vector<64x8xf32>
    %43 = vector.extract_strided_slice %9 {offsets = [0, 16], sizes = [64, 8], strides = [1, 1]} : vector<64x32xf32> to vector<64x8xf32>
    %44 = vector.extract_strided_slice %7 {offsets = [0, 32], sizes = [64, 16], strides = [1, 1]} : vector<64x64xf32> to vector<64x16xf32>
    %45 = tpu.transpose %43, [1, 0] : vector<64x8xf32> -> vector<8x64xf32>
    %cst_14 = arith.constant dense<0.000000e+00> : vector<64x64xf32>
    %46 = tpu.matmul %42, %45, %cst_14 {dimension_numbers = #tpu.dot_dimension_numbers<[1], [0], [0], [1], [0, 0, 1, 1], [], []>} : vector<64x8xf32>, vector<8x64xf32>, vector<64x64xf32> -> vector<64x64xf32>
    %cst_15 = arith.constant dense<0xFF800000> : vector<64xf32>
    %47 = vector.multi_reduction <maximumf>, %46, %cst_15 [1] : vector<64x64xf32> to vector<64xf32>
    %48 = vector.shape_cast %47 : vector<64xf32> to vector<64x1xf32>
    %49 = vector.broadcast %48 : vector<64x1xf32> to vector<64x64xf32>
    %50 = arith.subf %46, %49 : vector<64x64xf32>
    %51 = math.exp %50 : vector<64x64xf32>
    %cst_16 = arith.constant dense<0.000000e+00> : vector<64xf32>
    %52 = vector.multi_reduction <add>, %51, %cst_16 [1] : vector<64x64xf32> to vector<64xf32>
    %53 = vector.shape_cast %52 : vector<64xf32> to vector<64x1xf32>
    %cst_17 = arith.constant dense<0.000000e+00> : vector<64x16xf32>
    %54 = tpu.matmul %51, %44, %cst_17 {dimension_numbers = #tpu.dot_dimension_numbers<[1], [0], [0], [1], [0, 0, 1, 1], [], []>} : vector<64x64xf32>, vector<64x16xf32>, vector<64x16xf32> -> vector<64x16xf32>
    %55 = tpu.reciprocal %53 {approx = true} : vector<64x1xf32> -> vector<64x1xf32>
    %56 = vector.broadcast %55 : vector<64x1xf32> to vector<64x16xf32>
    %57 = arith.mulf %54, %56 : vector<64x16xf32>
    %58 = vector.extract_strided_slice %8 {offsets = [0, 24], sizes = [64, 8], strides = [1, 1]} : vector<64x32xf32> to vector<64x8xf32>
    %59 = vector.extract_strided_slice %9 {offsets = [0, 24], sizes = [64, 8], strides = [1, 1]} : vector<64x32xf32> to vector<64x8xf32>
    %60 = vector.extract_strided_slice %7 {offsets = [0, 48], sizes = [64, 16], strides = [1, 1]} : vector<64x64xf32> to vector<64x16xf32>
    %61 = tpu.transpose %59, [1, 0] : vector<64x8xf32> -> vector<8x64xf32>
    %cst_18 = arith.constant dense<0.000000e+00> : vector<64x64xf32>
    %62 = tpu.matmul %58, %61, %cst_18 {dimension_numbers = #tpu.dot_dimension_numbers<[1], [0], [0], [1], [0, 0, 1, 1], [], []>} : vector<64x8xf32>, vector<8x64xf32>, vector<64x64xf32> -> vector<64x64xf32>
    %cst_19 = arith.constant dense<0xFF800000> : vector<64xf32>
    %63 = vector.multi_reduction <maximumf>, %62, %cst_19 [1] : vector<64x64xf32> to vector<64xf32>
    %64 = vector.shape_cast %63 : vector<64xf32> to vector<64x1xf32>
    %65 = vector.broadcast %64 : vector<64x1xf32> to vector<64x64xf32>
    %66 = arith.subf %62, %65 : vector<64x64xf32>
    %67 = math.exp %66 : vector<64x64xf32>
    %cst_20 = arith.constant dense<0.000000e+00> : vector<64xf32>
    %68 = vector.multi_reduction <add>, %67, %cst_20 [1] : vector<64x64xf32> to vector<64xf32>
    %69 = vector.shape_cast %68 : vector<64xf32> to vector<64x1xf32>
    %cst_21 = arith.constant dense<0.000000e+00> : vector<64x16xf32>
    %70 = tpu.matmul %67, %60, %cst_21 {dimension_numbers = #tpu.dot_dimension_numbers<[1], [0], [0], [1], [0, 0, 1, 1], [], []>} : vector<64x64xf32>, vector<64x16xf32>, vector<64x16xf32> -> vector<64x16xf32>
    %71 = tpu.reciprocal %69 {approx = true} : vector<64x1xf32> -> vector<64x1xf32>
    %72 = vector.broadcast %71 : vector<64x1xf32> to vector<64x16xf32>
    %73 = arith.mulf %70, %72 : vector<64x16xf32>
    %74 = tpu.concatenate %25, %41, %57, %73 in 1 : vector<64x16xf32>, vector<64x16xf32>, vector<64x16xf32>, vector<64x16xf32> -> vector<64x64xf32>
    %75 = vector.shape_cast %7 : vector<64x64xf32> to vector<8x8x64xf32>
    %cst_22 = arith.constant 0.000000e+00 : f32
    %76 = vector.broadcast %cst_22 : f32 to vector<1x8x64xf32>
    %77 = tpu.concatenate %76, %75, %76 in 0 : vector<1x8x64xf32>, vector<8x8x64xf32>, vector<1x8x64xf32> -> vector<10x8x64xf32>
    %cst_23 = arith.constant 0.000000e+00 : f32
    %78 = vector.broadcast %cst_23 : f32 to vector<10x1x64xf32>
    %79 = tpu.concatenate %78, %77, %78 in 1 : vector<10x1x64xf32>, vector<10x8x64xf32>, vector<10x1x64xf32> -> vector<10x10x64xf32>
    %c0_24 = arith.constant 0 : index
    %c0_25 = arith.constant 0 : index
    %80 = vector.load %arg4[%c0_24, %c0_25] : memref<9x64xf32, #tpu.memory_space<vmem>>, vector<9x64xf32>
    %cst_26 = arith.constant 0.000000e+00 : f32
    %81 = vector.broadcast %cst_26 : f32 to vector<8x8x64xf32>
    %82 = vector.extract_strided_slice %80 {offsets = [0, 0], sizes = [1, 64], strides = [1, 1]} : vector<9x64xf32> to vector<1x64xf32>
    %83 = vector.shape_cast %82 : vector<1x64xf32> to vector<1x1x64xf32>
    %84 = vector.extract_strided_slice %79 {offsets = [0, 0, 0], sizes = [8, 8, 64], strides = [1, 1, 1]} : vector<10x10x64xf32> to vector<8x8x64xf32>
    %85 = vector.broadcast %83 : vector<1x1x64xf32> to vector<8x8x64xf32>
    %86 = arith.mulf %84, %85 : vector<8x8x64xf32>
    %87 = arith.addf %81, %86 : vector<8x8x64xf32>
    %88 = vector.extract_strided_slice %80 {offsets = [1, 0], sizes = [1, 64], strides = [1, 1]} : vector<9x64xf32> to vector<1x64xf32>
    %89 = vector.shape_cast %88 : vector<1x64xf32> to vector<1x1x64xf32>
    %90 = vector.extract_strided_slice %79 {offsets = [0, 1, 0], sizes = [8, 8, 64], strides = [1, 1, 1]} : vector<10x10x64xf32> to vector<8x8x64xf32>
    %91 = vector.broadcast %89 : vector<1x1x64xf32> to vector<8x8x64xf32>
    %92 = arith.mulf %90, %91 : vector<8x8x64xf32>
    %93 = arith.addf %87, %92 : vector<8x8x64xf32>
    %94 = vector.extract_strided_slice %80 {offsets = [2, 0], sizes = [1, 64], strides = [1, 1]} : vector<9x64xf32> to vector<1x64xf32>
    %95 = vector.shape_cast %94 : vector<1x64xf32> to vector<1x1x64xf32>
    %96 = vector.extract_strided_slice %79 {offsets = [0, 2, 0], sizes = [8, 8, 64], strides = [1, 1, 1]} : vector<10x10x64xf32> to vector<8x8x64xf32>
    %97 = vector.broadcast %95 : vector<1x1x64xf32> to vector<8x8x64xf32>
    %98 = arith.mulf %96, %97 : vector<8x8x64xf32>
    %99 = arith.addf %93, %98 : vector<8x8x64xf32>
    %100 = vector.extract_strided_slice %80 {offsets = [3, 0], sizes = [1, 64], strides = [1, 1]} : vector<9x64xf32> to vector<1x64xf32>
    %101 = vector.shape_cast %100 : vector<1x64xf32> to vector<1x1x64xf32>
    %102 = vector.extract_strided_slice %79 {offsets = [1, 0, 0], sizes = [8, 8, 64], strides = [1, 1, 1]} : vector<10x10x64xf32> to vector<8x8x64xf32>
    %103 = vector.broadcast %101 : vector<1x1x64xf32> to vector<8x8x64xf32>
    %104 = arith.mulf %102, %103 : vector<8x8x64xf32>
    %105 = arith.addf %99, %104 : vector<8x8x64xf32>
    %106 = vector.extract_strided_slice %80 {offsets = [4, 0], sizes = [1, 64], strides = [1, 1]} : vector<9x64xf32> to vector<1x64xf32>
    %107 = vector.shape_cast %106 : vector<1x64xf32> to vector<1x1x64xf32>
    %108 = vector.extract_strided_slice %79 {offsets = [1, 1, 0], sizes = [8, 8, 64], strides = [1, 1, 1]} : vector<10x10x64xf32> to vector<8x8x64xf32>
    %109 = vector.broadcast %107 : vector<1x1x64xf32> to vector<8x8x64xf32>
    %110 = arith.mulf %108, %109 : vector<8x8x64xf32>
    %111 = arith.addf %105, %110 : vector<8x8x64xf32>
    %112 = vector.extract_strided_slice %80 {offsets = [5, 0], sizes = [1, 64], strides = [1, 1]} : vector<9x64xf32> to vector<1x64xf32>
    %113 = vector.shape_cast %112 : vector<1x64xf32> to vector<1x1x64xf32>
    %114 = vector.extract_strided_slice %79 {offsets = [1, 2, 0], sizes = [8, 8, 64], strides = [1, 1, 1]} : vector<10x10x64xf32> to vector<8x8x64xf32>
    %115 = vector.broadcast %113 : vector<1x1x64xf32> to vector<8x8x64xf32>
    %116 = arith.mulf %114, %115 : vector<8x8x64xf32>
    %117 = arith.addf %111, %116 : vector<8x8x64xf32>
    %118 = vector.extract_strided_slice %80 {offsets = [6, 0], sizes = [1, 64], strides = [1, 1]} : vector<9x64xf32> to vector<1x64xf32>
    %119 = vector.shape_cast %118 : vector<1x64xf32> to vector<1x1x64xf32>
    %120 = vector.extract_strided_slice %79 {offsets = [2, 0, 0], sizes = [8, 8, 64], strides = [1, 1, 1]} : vector<10x10x64xf32> to vector<8x8x64xf32>
    %121 = vector.broadcast %119 : vector<1x1x64xf32> to vector<8x8x64xf32>
    %122 = arith.mulf %120, %121 : vector<8x8x64xf32>
    %123 = arith.addf %117, %122 : vector<8x8x64xf32>
    %124 = vector.extract_strided_slice %80 {offsets = [7, 0], sizes = [1, 64], strides = [1, 1]} : vector<9x64xf32> to vector<1x64xf32>
    %125 = vector.shape_cast %124 : vector<1x64xf32> to vector<1x1x64xf32>
    %126 = vector.extract_strided_slice %79 {offsets = [2, 1, 0], sizes = [8, 8, 64], strides = [1, 1, 1]} : vector<10x10x64xf32> to vector<8x8x64xf32>
    %127 = vector.broadcast %125 : vector<1x1x64xf32> to vector<8x8x64xf32>
    %128 = arith.mulf %126, %127 : vector<8x8x64xf32>
    %129 = arith.addf %123, %128 : vector<8x8x64xf32>
    %130 = vector.extract_strided_slice %80 {offsets = [8, 0], sizes = [1, 64], strides = [1, 1]} : vector<9x64xf32> to vector<1x64xf32>
    %131 = vector.shape_cast %130 : vector<1x64xf32> to vector<1x1x64xf32>
    %132 = vector.extract_strided_slice %79 {offsets = [2, 2, 0], sizes = [8, 8, 64], strides = [1, 1, 1]} : vector<10x10x64xf32> to vector<8x8x64xf32>
    %133 = vector.broadcast %131 : vector<1x1x64xf32> to vector<8x8x64xf32>
    %134 = arith.mulf %132, %133 : vector<8x8x64xf32>
    %135 = arith.addf %129, %134 : vector<8x8x64xf32>
    %136 = vector.shape_cast %135 : vector<8x8x64xf32> to vector<64x64xf32>
    %c0_27 = arith.constant 0 : index
    %c0_28 = arith.constant 0 : index
    %137 = vector.load %arg5[%c0_27, %c0_28] : memref<1x64xf32, #tpu.memory_space<vmem>>, vector<1x64xf32>
    %138 = vector.broadcast %137 : vector<1x64xf32> to vector<64x64xf32>
    %139 = arith.addf %136, %138 : vector<64x64xf32>
    %140 = arith.addf %74, %139 : vector<64x64xf32>
    %c0_29 = arith.constant 0 : index
    %c0_30 = arith.constant 0 : index
    %141 = vector.load %arg6[%c0_29, %c0_30] : memref<64x64xf32, #tpu.memory_space<vmem>>, vector<64x64xf32>
    %cst_31 = arith.constant dense<0.000000e+00> : vector<64x64xf32>
    %142 = tpu.matmul %140, %141, %cst_31 {dimension_numbers = #tpu.dot_dimension_numbers<[1], [0], [0], [1], [0, 0, 1, 1], [], []>} : vector<64x64xf32>, vector<64x64xf32>, vector<64x64xf32> -> vector<64x64xf32>
    %c0_32 = arith.constant 0 : index
    %c0_33 = arith.constant 0 : index
    %143 = vector.load %arg7[%c0_32, %c0_33] : memref<1x64xf32, #tpu.memory_space<vmem>>, vector<1x64xf32>
    %144 = vector.broadcast %143 : vector<1x64xf32> to vector<64x64xf32>
    %145 = arith.addf %142, %144 : vector<64x64xf32>
    %146 = arith.addf %1, %145 : vector<64x64xf32>
    %c0_34 = arith.constant 0 : index
    %c0_35 = arith.constant 0 : index
    %147 = vector.load %arg8[%c0_34, %c0_35] : memref<64x128xf32, #tpu.memory_space<vmem>>, vector<64x128xf32>
    %cst_36 = arith.constant dense<0.000000e+00> : vector<64x128xf32>
    %148 = tpu.matmul %146, %147, %cst_36 {dimension_numbers = #tpu.dot_dimension_numbers<[1], [0], [0], [1], [0, 0, 1, 1], [], []>} : vector<64x64xf32>, vector<64x128xf32>, vector<64x128xf32> -> vector<64x128xf32>
    %c0_37 = arith.constant 0 : index
    %c0_38 = arith.constant 0 : index
    %149 = vector.load %arg9[%c0_37, %c0_38] : memref<1x128xf32, #tpu.memory_space<vmem>>, vector<1x128xf32>
    %150 = vector.broadcast %149 : vector<1x128xf32> to vector<64x128xf32>
    %151 = arith.addf %148, %150 : vector<64x128xf32>
    %152 = arith.negf %151 : vector<64x128xf32>
    %153 = math.exp %152 : vector<64x128xf32>
    %cst_39 = arith.constant 1.000000e+00 : f32
    %154 = vector.broadcast %cst_39 : f32 to vector<64x128xf32>
    %155 = arith.addf %154, %153 : vector<64x128xf32>
    %156 = arith.divf %154, %155 : vector<64x128xf32>
    %157 = arith.mulf %151, %156 : vector<64x128xf32>
    %c0_40 = arith.constant 0 : index
    %c0_41 = arith.constant 0 : index
    %158 = vector.load %arg10[%c0_40, %c0_41] : memref<128x64xf32, #tpu.memory_space<vmem>>, vector<128x64xf32>
    %cst_42 = arith.constant dense<0.000000e+00> : vector<64x64xf32>
    %159 = tpu.matmul %157, %158, %cst_42 {dimension_numbers = #tpu.dot_dimension_numbers<[1], [0], [0], [1], [0, 0, 1, 1], [], []>} : vector<64x128xf32>, vector<128x64xf32>, vector<64x64xf32> -> vector<64x64xf32>
    %c0_43 = arith.constant 0 : index
    %c0_44 = arith.constant 0 : index
    %160 = vector.load %arg11[%c0_43, %c0_44] : memref<1x64xf32, #tpu.memory_space<vmem>>, vector<1x64xf32>
    %161 = vector.broadcast %160 : vector<1x64xf32> to vector<64x64xf32>
    %162 = arith.addf %159, %161 : vector<64x64xf32>
    %163 = arith.addf %146, %162 : vector<64x64xf32>
    %c0_45 = arith.constant 0 : index
    %c0_46 = arith.constant 0 : index
    %c0_47 = arith.constant 0 : index
    %164 = vector.load %arg12[%c0_45, %c0_46, %c0_47] : memref<1x64x64xf32, #tpu.memory_space<vmem>>, vector<1x64x64xf32>
    %165 = vector.shape_cast %164 : vector<1x64x64xf32> to vector<64x64xf32>
    %166 = vector.shape_cast %163 : vector<64x64xf32> to vector<1x64x64xf32>
    tpu.vector_store %arg12[%c0_45, %c0_46, %c0_47], %166 {strides = array<i32>} : memref<1x64x64xf32, #tpu.memory_space<vmem>>, vector<1x64x64xf32>,
    return
  }
  func.func @transform_0(%arg0: i32) -> (i32, i32, i32) {
    %c0_i32 = arith.constant 0 : i32
    %c0_i32_0 = arith.constant 0 : i32
    %c0_i32_1 = arith.constant 0 : i32
    return %arg0, %c0_i32, %c0_i32_0 : i32, i32, i32
  }
  func.func @transform_1(%arg0: i32) -> (i32, i32) {
    %c0_i32 = arith.constant 0 : i32
    %c0_i32_0 = arith.constant 0 : i32
    %c0_i32_1 = arith.constant 0 : i32
    return %c0_i32, %c0_i32_0 : i32, i32
  }
  func.func @transform_2(%arg0: i32) -> (i32, i32) {
    %c0_i32 = arith.constant 0 : i32
    %c0_i32_0 = arith.constant 0 : i32
    %c0_i32_1 = arith.constant 0 : i32
    return %c0_i32, %c0_i32_0 : i32, i32
  }
  func.func @transform_3(%arg0: i32) -> (i32, i32) {
    %c0_i32 = arith.constant 0 : i32
    %c0_i32_0 = arith.constant 0 : i32
    %c0_i32_1 = arith.constant 0 : i32
    return %c0_i32, %c0_i32_0 : i32, i32
  }
  func.func @transform_4(%arg0: i32) -> (i32, i32) {
    %c0_i32 = arith.constant 0 : i32
    %c0_i32_0 = arith.constant 0 : i32
    %c0_i32_1 = arith.constant 0 : i32
    return %c0_i32, %c0_i32_0 : i32, i32
  }
  func.func @transform_5(%arg0: i32) -> (i32, i32) {
    %c0_i32 = arith.constant 0 : i32
    %c0_i32_0 = arith.constant 0 : i32
    %c0_i32_1 = arith.constant 0 : i32
    return %c0_i32, %c0_i32_0 : i32, i32
  }
  func.func @transform_6(%arg0: i32) -> (i32, i32) {
    %c0_i32 = arith.constant 0 : i32
    %c0_i32_0 = arith.constant 0 : i32
    %c0_i32_1 = arith.constant 0 : i32
    return %c0_i32, %c0_i32_0 : i32, i32
  }
  func.func @transform_7(%arg0: i32) -> (i32, i32) {
    %c0_i32 = arith.constant 0 : i32
    %c0_i32_0 = arith.constant 0 : i32
    %c0_i32_1 = arith.constant 0 : i32
    return %c0_i32, %c0_i32_0 : i32, i32
  }
  func.func @transform_8(%arg0: i32) -> (i32, i32) {
    %c0_i32 = arith.constant 0 : i32
    %c0_i32_0 = arith.constant 0 : i32
    %c0_i32_1 = arith.constant 0 : i32
    return %c0_i32, %c0_i32_0 : i32, i32
  }
  func.func @transform_9(%arg0: i32) -> (i32, i32) {
    %c0_i32 = arith.constant 0 : i32
    %c0_i32_0 = arith.constant 0 : i32
    %c0_i32_1 = arith.constant 0 : i32
    return %c0_i32, %c0_i32_0 : i32, i32
  }
  func.func @transform_10(%arg0: i32) -> (i32, i32) {
    %c0_i32 = arith.constant 0 : i32
    %c0_i32_0 = arith.constant 0 : i32
    %c0_i32_1 = arith.constant 0 : i32
    return %c0_i32, %c0_i32_0 : i32, i32
  }
  func.func @transform_11(%arg0: i32) -> (i32, i32, i32) {
    %c0_i32 = arith.constant 0 : i32
    %c0_i32_0 = arith.constant 0 : i32
    %c0_i32_1 = arith.constant 0 : i32
    return %arg0, %c0_i32, %c0_i32_0 : i32, i32, i32
  }
}

</mosaic_0001>

<bundles_post_ra>
// kernel: tpu_custom_call.1
= control target key start
LH: loop header
LB: loop body
LE: loop exit
PB: predicated region body
PF: predicated region fallthrough
CT: control target
= control target key end

     0   :  { %s6594_s0 = inlined_call_operand.vmem [shape: f32[2,64,64], index: 0, kind: input, shape index: {}]   ;;  %s6595_s1 = inlined_call_operand.vmem [shape: f32[64,128], index: 1, kind: input, shape index: {}]   ;;  %s6596_s2 = inlined_call_operand.vmem [shape: f32[1,128], index: 2, kind: input, shape index: {}]   ;;  %s6597_s3 = inlined_call_operand.hbm [shape: f32[9,64], index: 3, kind: input, shape index: {}]   ;;  %s6598_s4 = inlined_call_operand.vmem [shape: f32[1,64], index: 4, kind: input, shape index: {}]   ;;  %s6599_s5 = inlined_call_operand.hbm [shape: f32[64,64], index: 5, kind: input, shape index: {}]   ;;  %s6600_s6 = inlined_call_operand.vmem [shape: f32[1,64], index: 6, kind: input, shape index: {}]   ;;  %s6601_s7 = inlined_call_operand.hbm [shape: f32[64,128], index: 7, kind: input, shape index: {}]   ;;  %s6602_s8 = inlined_call_operand.vmem [shape: f32[1,128], index: 8, kind: input, shape index: {}]   ;;  %s6603_s9 = inlined_call_operand.vmem [shape: f32[128,64], index: 9, kind: input, shape index: {}]   ;;  %s6604_s10 = inlined_call_operand.vmem [shape: f32[1,64], index: 10, kind: input, shape index: {}]   ;;  %s6605_s11 = inlined_call_operand.hbm [shape: f32[2,64,64], index: 11, kind: output, shape index: {}]  }
   0x1   :  { %6620 = sst [smem:[#allocation35_spill]] %s6605_s11 }
   0x2   :  { %16 = vsyncpa [#allocation3], 0 }
   0x3   :  { %17 = vsyncpa [#allocation6], 0 }
   0x4   :  { %18 = vsyncpa [#allocation4], 0 }
   0x5   :  { %20 = vsyncpa [#allocation4 + $0x1], 0  ;;  %s5088_s17 = smov 0   ;;  %s5090_s18 = smov 0  }
   0x6   :  { %s5092_s19 = smov 0   ;;  %s5094_s20 = smov 0  }
   0x7 LB: > { %6621 = sst [smem:[#allocation12_spill]] %s4995_s17  ;;  %s5109_s21 = sadd.s32 4294967295, %s5007_s20   ;;  %s5007_s20 = sphi %s5094_s20, %s6685_s20   ;;  %s5003_s19 = sphi %s5092_s19, %s6687_s19   ;;  %s4999_s18 = sphi %s5090_s18, %s6689_s18   ;;  %s4995_s17 = sphi %s5088_s17, %s6688_s17  }
   0x8   : > { %6622 = sst [smem:[#allocation13_spill]] %s5003_s19  ;;  %s3514_s22 = sadd.s32 4294967294, %s5007_s20  }
   0x9   : > { %6623 = sst [smem:[#allocation14_spill]] %s5007_s20  ;;  %s5113_s23 = sadd.s32 1, %s5007_s20  }
   0xa   : > { %6624 = sst [smem:[#allocation15_spill]] %s5113_s23  ;;  %s269_s24 = sadd.s32 1, %s5003_s19 }
   0xb   : > { %s266_s25 = ssub.s32 %s5007_s20, %s5113_s23  ;;  %p279_p0 = scmp.ne.s32.totalorder %s5003_s19, %s4999_s18 }
   0xc   : > { %p267_p1 = scmp.eq.s32.totalorder %s266_s25, 0  ;;  %p280_p2 = scmp.eq.s32.totalorder %s5109_s21, 1 }
   0xd   : > { %p285_p3 = scmp.ne.s32.totalorder %s4999_s18, %s4995_s17  ;;  %p286_p4 = scmp.eq.s32.totalorder %s3514_s22, 1 }
   0xe   : > { %s5124_s26 = scalar_select %p267_p1, %s5003_s19, %s269_s24  }
   0xf   : > { %p5126_p5 = por %p280_p2, %p279_p0  ;;  %p5130_p6 = por %p286_p4, %p285_p3 }
  0x10   : > { %6625 = sst [smem:[#allocation16_spill]] %s5124_s26  ;;  %p3515_p7 = scmp.ge.s32.totalorder %s5007_s20, 1 }
  0x11   : > { %s6626_s27 = scalar_select %p5126_p5, 1, 0 }
  0x12   : > { %s6627_s28 = scalar_select %p5130_p6, 1, 0 }
  0x13   : > { %p293_p8 = scmp.lt.s32.totalorder %s5007_s20, 3  ;;  %p6609_p9 = scmp.eq.s32.totalorder %s5109_s21, 0 }
  0x14   : > { %6628 = sst [smem:[#allocation17_spill]] %s6627_s28  ;;  %s5009_s30 = smov [#allocation5]  }
  0x15   : > { %p5137_p10 = pnand %p3515_p7, %p293_p8  ;;  %s327_s12 = sshll.u32 %s5009_s30, 4  ;;  %s5143_s12 = int_to_ptr.vmem [resolvable:$true] %s327_s12 }
  0x16   : > { %s5010_s14 = smov [#allocation2]   ;;  %s5011_s16 = smov [#allocation7]  }
  0x17   : > { %s6629_s29 = scalar_select %p5137_p10, 1, 0 }
  0x18   : > { %p4474_p11 = pneg %p5137_p10  ;;  %s311_s15 = sshll.u32 %s5010_s14, 4  ;;  %s5151_s15 = int_to_ptr.vmem [resolvable:$true] %s311_s15 }
  0x19   : > { %s5153_s22 = sshll.u32 %s5011_s16, 4  ;;  %s4853_s26 = scalar_lea.hbm %s6599_s5, 1024  ;;  %s344_s22 = int_to_ptr.vmem [resolvable:$true] %s5153_s22 }
  0x1a   : > { %p5147_p12 = pnand %p6609_p9, %p4474_p11  ;;  %p4854_p13 = scmp.ne.s32.totalorder %s6599_s5, %s4853_s26 }
  0x1b   : > { %p4860_p3 = scmp.lt.u32.totalorder %s4853_s26, %s6599_s5 }
  0x1c   : > { %p5163_p0 = pneg %p5147_p12 }
  0x1e   : > { %p4856_p1 = pnand %p5163_p0, %p4854_p13 }
  0x20   : > { %p4857_p2 = pneg %p4856_p1 }
  0x22   : > { %p4862_p4 = pnand %p4860_p3, %p4857_p2 }
  0x24   : > { %4865 = shalt.err (!%p4862_p4)
}
  0x25   : > { %s4866_s19 = scalar_lea.vmem %s5143_s12, 1024  ;;  %p4874_p9 = scmp.lt.s32.totalorder %s5143_s12, %s5143_s12 }
  0x26   : > { %p4867_p7 = scmp.ne.s32.totalorder %s5143_s12, %s4866_s19  ;;  %p4875_p6 = scmp.lt.s32.totalorder %s4866_s19, %s4866_s19 }
  0x28   : > { %p4869_p8 = pnand %p4867_p7, %p5163_p0  ;;  %p4876_p13 = por %p4875_p6, %p4874_p9 }
  0x2a   : > { %p4870_p11 = pneg %p4869_p8 }
  0x2c   : > { %p4877_p1 = pnand %p4876_p13, %p4870_p11 }
  0x2e   : > { %4880 = shalt.err (!%p4877_p1)
}
  0x2f   : > { %s5012_s24 = smov 128   ;;  %s5013_s26 = smov 8  }
  0x30   : > { %4480 = dma.hbm_to_vmem [thread:$0]  (!%p5147_p12), %s6599_s5, 1024, %s5143_s12, [#allocation6], %s5012_s24, %s5012_s24, %s5013_s26  }
  0x31   : > { %s4881_s19 = scalar_lea.hbm %s6597_s3, 256 }
  0x32   : > { %p4882_p6 = scmp.ne.s32.totalorder %s6597_s3, %s4881_s19  ;;  %p4888_p3 = scmp.lt.u32.totalorder %s4881_s19, %s6597_s3 }
  0x34   : > { %p4884_p9 = pnand %p4882_p6, %p5163_p0 }
  0x36   : > { %p4885_p2 = pneg %p4884_p9 }
  0x38   : > { %p4890_p4 = pnand %p4888_p3, %p4885_p2 }
  0x3a   : > { %4893 = shalt.err (!%p4890_p4)
}
  0x3b   : > { %s4894_s12 = scalar_lea.vmem %s5151_s15, 256  ;;  %p4902_p13 = scmp.lt.s32.totalorder %s5151_s15, %s5151_s15 }
  0x3c   : > { %p4895_p7 = scmp.ne.s32.totalorder %s5151_s15, %s4894_s12  ;;  %p4903_p1 = scmp.lt.s32.totalorder %s4894_s12, %s4894_s12 }
  0x3e   : > { %p4897_p8 = pnand %p4895_p7, %p5163_p0  ;;  %p4904_p6 = por %p4903_p1, %p4902_p13 }
  0x40   : > { %p4898_p11 = pneg %p4897_p8 }
  0x42   : > { %p4905_p9 = pnand %p4904_p6, %p4898_p11 }
  0x44   : > { %4908 = shalt.err (!%p4905_p9)
}
  0x45   : > { %4477 = dma.hbm_to_vmem [thread:$0]  (!%p5147_p12), %s6597_s3, 256, %s5151_s15, [#allocation3], %s5012_s24, %s5012_s24, %s5013_s26  }
  0x46   : > { %s4909_s25 = scalar_lea.hbm %s6601_s7, 1024 }
  0x47   : > { %p4910_p2 = scmp.ne.s32.totalorder %s6601_s7, %s4909_s25  ;;  %p4916_p7 = scmp.lt.u32.totalorder %s4909_s25, %s6601_s7 }
  0x49   : > { %p4912_p3 = pnand %p4910_p2, %p5163_p0 }
  0x4b   : > { %p4913_p4 = pneg %p4912_p3 }
  0x4d   : > { %p4918_p8 = pnand %p4916_p7, %p4913_p4 }
  0x4f   : > { %4921 = shalt.err (!%p4918_p8)
}
  0x50   : > { %s4922_s12 = scalar_lea.vmem %s344_s22, 1024  ;;  %p4930_p6 = scmp.lt.s32.totalorder %s344_s22, %s344_s22 }
  0x51   : > { %p4923_p11 = scmp.ne.s32.totalorder %s344_s22, %s4922_s12  ;;  %p4931_p9 = scmp.lt.s32.totalorder %s4922_s12, %s4922_s12 }
  0x53   : > { %p4925_p13 = pnand %p4923_p11, %p5163_p0  ;;  %p4932_p5 = por %p4931_p9, %p4930_p6 }
  0x55   : > { %p4926_p1 = pneg %p4925_p13 }
  0x57   : > { %p4933_p10 = pnand %p4932_p5, %p4926_p1 }
  0x59   : > { %4936 = shalt.err (!%p4933_p10)
}
  0x5a   : > { %4483 = dma.hbm_to_vmem [thread:$0]  (!%p5147_p12), %s6601_s7, 1024, %s344_s22, [#allocation6], %s5012_s24, %s5012_s24, %s5013_s26  }
  0x5b   : > { %p6632_p2 = scmp.ne.s32.totalorder %s6629_s29, 0 }
  0x5d   : > { %376 = sbr.rel (%p6632_p2) target bundleno = 3228 (0xc9c), region = 64 }
  0x64   : > { %p6633_p0 = scmp.eq.s32.totalorder %s5109_s21, 0 }
  0x66   : > { %4982 = dma.done.wait (%p6633_p0), [#allocation3], 256   ;;  %p6634_p3 = pmov %p6633_p0 }
  0x67   : > { %p6635_p5 = pmov %p6633_p0 }
  0x68   : > { %4984 = vsyncadd (%p6634_p3), [#allocation3], 4294967040 }
  0x69   : > { %4986 = dma.done.wait (%p6635_p5), [#allocation6], 2048   ;;  %p6636_p10 = pmov %p6633_p0 }
  0x6a   : > { %p424_p4 = scmp.lt.s32.totalorder %s5109_s21, 1  ;;  %v437_v0 = vld [vmem:[%s6595_s1] sm:$0xff]  ;;  %v438_v1 = vld [vmem:[%s6595_s1 + $0x8] sm:$0xff]  ;;  %v439_v2 = vld [vmem:[%s6595_s1 + $0x10] sm:$0xff]  ;;  %vm452_vm0 = vcmask 523264   ;;  %s5014_s20 = smov 32  }
  0x6b   : > { %4988 = vsyncadd (%p6636_p10), [#allocation6], 4294965248  ;;  %v4220_v3 = vpack.c.bf16 %v438_v1, %v437_v0  ;;  %v440_v4 = vld [vmem:[%s6595_s1 + $0x18] sm:$0xff]  ;;  %v441_v6 = vld [vmem:[%s6595_s1 + $0x20] sm:$0xff]  ;;  %s5015_s28 = smov 64   ;;  %s5016_s25 = smov 24  }
  0x6c   : > { %s425_s23 = scalar_select %p424_p4, %s5109_s21, 1  ;;  %v4224_v5 = vpack.c.bf16 %v440_v4, %v439_v2  ;;  %v442_v7 = vld [vmem:[%s6595_s1 + $0x28] sm:$0xff]  ;;  %v443_v10 = vld [vmem:[%s6595_s1 + $0x30] sm:$0xff]  ;;  %v444_v11 = vld [vmem:[%s6595_s1 + $0x38] sm:$0xff]  ;;  %vm622_vm1 = vcmask 64512   ;;  %vm2349_vm3 = vcmask 1040384  }
  0x6d   : > { %4221 = vmatprep.subr.bf16.mxu0 %v4220_v3  ;;  %v4228_v9 = vpack.c.bf16 %v442_v7, %v441_v6  ;;  %v4232_v12 = vpack.c.bf16 %v444_v11, %v443_v10  ;;  %v3527_v20 = vld [vmem:[%s6596_s2] ss:$0 sm:$0xff]  ;;  %vm5357_vm2 = vmpackc.low %vm622_vm1, %vm622_vm1  ;;  %s5017_s30 = smov 56   ;;  %s5018_s14 = smov 112   ;;  %vm2426_vm4 = vcmask 1046528   ;;  %vm2503_vm5 = vcmask 1045504  }
  0x6e   : > { %s3666_s13 = sshll.u32 %s425_s23, 6  ;;  %4223 = vmatpush3.bf16.msra.mxu0 %v4220_v3  ;;  %s5019_s16 = smov 16   ;;  %vm2303_vm6 = vcmask 130048   ;;  %vm2312_vm7 = vcmask 261120   ;;  %vm2321_vm8 = vcmask 392192  }
  0x6f   : > { %s5250_s24 = scalar_lea.vmem %s6594_s0, %s3666_s13  ;;  %4225 = vmatprep.subr.bf16.mxu0 %v4224_v5  ;;  %s5020_s19 = smov 48  }
  0x70   : > { %v429_v8 = vld [vmem:[%s5250_s24] sm:$0xff]  ;;  %v430_v13 = vld [vmem:[%s5250_s24 + $0x8] sm:$0xff]  ;;  %v431_v14 = vld [vmem:[%s5250_s24 + $0x10] sm:$0xff]  ;;  %s5021_s12 = smov 96   ;;  %s5022_s15 = smov 8  }
  0x71   : > { %3884 = vmatprep.mubr.msk.f32.mxu0 %vm452_vm0, %v429_v8  ;;  %v432_v15 = vld [vmem:[%s5250_s24 + $0x18] sm:$0xff]  ;;  %v433_v16 = vld [vmem:[%s5250_s24 + $0x20] sm:$0xff]  ;;  %v434_v17 = vld [vmem:[%s5250_s24 + $0x28] sm:$0xff]  ;;  %s5023_s11 = smov 40   ;;  %s5024_s23 = smov 80  }
  0x72   : > { %4227 = vmatpush3.bf16.msra.mxu0 %v4224_v5  ;;  %v435_v18 = vld [vmem:[%s5250_s24 + $0x30] sm:$0xff]  ;;  %v436_v19 = vld [vmem:[%s5250_s24 + $0x38] sm:$0xff]  ;;  %p6680_p7 = scmp.ne.s32.totalorder %s6626_s27, 0  ;;  %s5026_s29 = smov [#allocation8]  }
  0x73   : > { %4229 = vmatprep.subr.bf16.mxu0 %v4228_v9  ;;  %s4941_s26 = sshll.u32 %s5026_s29, 4  ;;  %s4942_s26 = int_to_ptr.vmem [resolvable:$false] %s4941_s26 }
  0x74   : > { %s4943_s17 = scalar_lea.vmem %s4942_s26, 2048 }
  0x76   : > { %4231 = vmatpush3.bf16.msra.mxu0 %v4228_v9 }
  0x77   : > { %4233 = vmatprep.subr.bf16.mxu0 %v4232_v12 }
  0x7a   : > { %4235 = vmatpush3.bf16.msra.mxu0 %v4232_v12 }
  0x7d   : > { %3885 = vmatmul.mubr.msk.f32.vlgmr.msra.gmra.mrb[0].mxu0 %vm452_vm0, %v430_v13 }
  0x7e   : > { %3887 = vmatprep.mubr.msk.f32.mxu0 %vm452_vm0, %v431_v14 }
  0x81   : > { %3888 = vmatmul.mubr.msk.f32.gmra.mrb[2].mxu0 %vm452_vm0, %v432_v15 }
  0x82   : > { %3890 = vmatprep.mubr.msk.f32.mxu0 %vm452_vm0, %v433_v16 }
  0x85   : > { %3891 = vmatmul.mubr.msk.f32.gmra.mrb[4].mxu0 %vm452_vm0, %v434_v17 }
  0x86   : > { %3893 = vmatprep.mubr.msk.f32.mxu0 %vm452_vm0, %v435_v18 }
  0x89   : > { %3894 = vmatmul.mubr.msk.f32.gmra.mrb[6].mxu0 %vm452_vm0, %v436_v19 }
 0x150   : > { %v3886_v21 = vpop.f32.mrb[0].mxu0 }
 0x151   : > { %v5295_v22 = vadd.f32 %v3886_v21, %v3527_v20  ;;  %v543_v23 = vpop.f32.mrb[1].mxu0 }
 0x152   : > { %v5297_v24 = vadd.f32 %v3527_v20, %v543_v23 }
 0x154   : > { %v3889_v25 = vpop.f32.mrb[2].mxu0  ;;  %v5301_v26 = vpack.i.bf16 %v5295_v22, %v5297_v24  ;;  %v4260_v27 = vpack.c.bf16 %v5295_v22, %v5297_v24 }
 0x155   : > { %v5305_v28 = vadd.f32 %v3889_v25, %v3527_v20  ;;  %v553_v29 = vpop.f32.mrb[3].mxu0 }
 0x156   : > { %v5307_v30 = vadd.f32 %v3527_v20, %v553_v29  ;;  %4546 = vrot.lane.b32.xlu0 %v5301_v26, %s5014_s20  ;;  %4261 = vmatprep.subr.bf16.mxu0 %v4260_v27 }
 0x157   : > { %4263 = vmatpush3.bf16.msra.mxu0 %v4260_v27 }
 0x158   : > { %v3892_v31 = vpop.f32.mrb[4].mxu0  ;;  %v5313_v32 = vpack.i.bf16 %v5305_v28, %v5307_v30  ;;  %v4264_v33 = vpack.c.bf16 %v5305_v28, %v5307_v30 }
 0x159   : > { %v5317_v34 = vadd.f32 %v3892_v31, %v3527_v20  ;;  %v563_v35 = vpop.f32.mrb[5].mxu0 }
 0x15a   : > { %v5319_v36 = vadd.f32 %v3527_v20, %v563_v35  ;;  %4551 = vrot.lane.b32.xlu0 %v5313_v32, %s5014_s20  ;;  %4265 = vmatprep.subr.bf16.mxu0 %v4264_v33 }
 0x15b   : > { %4267 = vmatpush3.bf16.msra.mxu0 %v4264_v33 }
 0x15c   : > { %v3895_v37 = vpop.f32.mrb[6].mxu0  ;;  %v5325_v38 = vpack.i.bf16 %v5317_v34, %v5319_v36  ;;  %v4268_v39 = vpack.c.bf16 %v5317_v34, %v5319_v36 }
 0x15d   : > { %v5329_v40 = vadd.f32 %v3895_v37, %v3527_v20  ;;  %v573_v41 = vpop.f32.mrb[7].mxu0 }
 0x15e   : > { %v5331_v42 = vadd.f32 %v3527_v20, %v573_v41  ;;  %4556 = vrot.lane.b32.xlu1 %v5325_v38, %s5014_s20  ;;  %590 = vrot.lane.b32.xlu0 %v5297_v24, %s5015_s28 }
 0x15f   : > { %6637 = vst [vmem:[#allocation18_spill] sm:$0xff] %v5329_v40  ;;  %4269 = vmatprep.subr.bf16.mxu0 %v4268_v39 }
 0x160   : > { %6638 = vst [vmem:[#allocation19_spill] sm:$0xff] %v5331_v42  ;;  %v5338_v43 = vpack.i.bf16 %v5329_v40, %v5331_v42  ;;  %4271 = vmatpush3.bf16.msra.mxu0 %v4268_v39  ;;  %v4272_v44 = vpack.c.bf16 %v5329_v40, %v5331_v42 }
 0x162   : > { %4561 = vrot.lane.b32.xlu1 %v5338_v43, %s5014_s20  ;;  %594 = vrot.lane.b32.xlu0 %v5307_v30, %s5015_s28 }
 0x163   : > { %4273 = vmatprep.subr.bf16.mxu0 %v4272_v44 }
 0x164   : > { %4275 = vmatpush3.bf16.msra.mxu0 %v4272_v44 }
 0x166   : > { %592 = vrot.lane.b32.xlu1 %v5295_v22, %s5015_s28  ;;  %598 = vrot.lane.b32.xlu0 %v5319_v36, %s5015_s28 }
 0x16a   : > { %596 = vrot.lane.b32.xlu1 %v5305_v28, %s5015_s28  ;;  %602 = vrot.lane.b32.xlu0 %v5331_v42, %s5015_s28 }
 0x16e   : > { %600 = vrot.lane.b32.xlu1 %v5317_v34, %s5015_s28  ;;  %4566 = vrot.lane.b32.xlu0 %v5301_v26, %s5016_s25 }
 0x172   : > { %604 = vrot.lane.b32.xlu1 %v5329_v40, %s5015_s28  ;;  %s421_s28 = sand.u32 1, %s4999_s18  }
 0x176   : > { %4571 = vrot.lane.b32.xlu1 %v5313_v32, %s5016_s25 }
 0x1c8   : > { %v4547_v45 = vpop.permute.xlu0 %4546 }
 0x1c9   : > { %v4549_v46 = vunpack.i.h.bf16 %v4547_v45  ;;  %v4548_v47 = vunpack.i.l.bf16 %v4547_v45 }
 0x1cb   : > { %v4236_v49 = vpack.c.bf16 %v4549_v46, %v4548_v47 }
 0x1cc   : > { %v4552_v50 = vpop.permute.xlu0 %4551 }
 0x1cd   : > { %v4554_v51 = vunpack.i.h.bf16 %v4552_v50  ;;  %v4553_v52 = vunpack.i.l.bf16 %v4552_v50  ;;  %4238 = vmatprep.subr.msk.bf16.mxu1 %vm5357_vm2, %v4236_v49 }
 0x1ce   : > { %4241 = vmatpush3.bf16.xpose.msk.msra.mxu1 %vm5357_vm2, %v4236_v49 }
 0x1cf   : > { %v4242_v53 = vpack.c.bf16 %v4554_v51, %v4553_v52 }
 0x1d0   : > { %v4557_v54 = vpop.permute.xlu1 %4556  ;;  %v591_v55 = vpop.permute.xlu0 %590 }
 0x1d1   : > { %v4559_v56 = vunpack.i.h.bf16 %v4557_v54  ;;  %v4558_v57 = vunpack.i.l.bf16 %v4557_v54  ;;  %3912 = vmatprep.mubr.msk.f32.mxu1 %vm622_vm1, %v591_v55  ;;  %4244 = vmatprep.subr.msk.bf16.mxu1 %vm5357_vm2, %v4242_v53 }
 0x1d3   : > { %v4248_v58 = vpack.c.bf16 %v4559_v56, %v4558_v57 }
 0x1d4   : > { %v595_v59 = vpop.permute.xlu0 %594  ;;  %v4562_v60 = vpop.permute.xlu1 %4561 }
 0x1d5   : > { %v4564_v61 = vunpack.i.h.bf16 %v4562_v60  ;;  %v4563_v62 = vunpack.i.l.bf16 %v4562_v60 }
 0x1d6   : > { %4247 = vmatpush3.bf16.xpose.msk.msra.mxu1 %vm5357_vm2, %v4242_v53 }
 0x1d7   : > { %4250 = vmatprep.subr.msk.bf16.mxu1 %vm5357_vm2, %v4248_v58  ;;  %v4254_v0 = vpack.c.bf16 %v4564_v61, %v4563_v62 }
 0x1d8   : > { %v599_v63 = vpop.permute.xlu0 %598  ;;  %v593_v6 = vpop.permute.xlu1 %592 }
 0x1dc   : > { %v603_v1 = vpop.permute.xlu0 %602  ;;  %v597_v7 = vpop.permute.xlu1 %596 }
 0x1de   : > { %4253 = vmatpush3.bf16.xpose.msk.msra.mxu1 %vm5357_vm2, %v4248_v58 }
 0x1df   : > { %4256 = vmatprep.subr.msk.bf16.mxu1 %vm5357_vm2, %v4254_v0 }
 0x1e0   : > { %v4567_v2 = vpop.permute.xlu0 %4566  ;;  %v601_v8 = vpop.permute.xlu1 %600 }
 0x1e1   : > { %v4569_v3 = vunpack.i.h.bf16 %v4567_v2  ;;  %v4568_v4 = vunpack.i.l.bf16 %v4567_v2 }
 0x1e3   : > { %v5376_v5 = vpack.c.bf16 %v4569_v3, %v4568_v4 }
 0x1e4   : > { %v605_v9 = vpop.permute.xlu1 %604 }
 0x1e5   : > { %4278 = vmatprep.subr.msk.bf16.mxu0 %vm5357_vm2, %v5376_v5 }
 0x1e6   : > { %4259 = vmatpush3.bf16.xpose.msk.msra.mxu1 %vm5357_vm2, %v4254_v0 }
 0x1e8   : > { %v4572_v31 = vpop.permute.xlu1 %4571 }
 0x1e9   : > { %v4574_v53 = vunpack.i.h.bf16 %v4572_v31  ;;  %v4573_v54 = vunpack.i.l.bf16 %v4572_v31 }
 0x1eb   : > { %v4282_v58 = vpack.c.bf16 %v4574_v53, %v4573_v54 }
 0x1ed   : > { %3913 = vmatmul.mubr.msk.f32.vlgmr.msra.gmra.mrb[0].mxu1 %vm622_vm1, %v593_v6 }
 0x1ee   : > { %3915 = vmatprep.mubr.msk.f32.mxu1 %vm622_vm1, %v595_v59 }
 0x1f1   : > { %3916 = vmatmul.mubr.msk.f32.gmra.mrb[2].mxu1 %vm622_vm1, %v597_v7 }
 0x1f2   : > { %3918 = vmatprep.mubr.msk.f32.mxu1 %vm622_vm1, %v599_v63 }
 0x1f5   : > { %3919 = vmatmul.mubr.msk.f32.gmra.mrb[4].mxu1 %vm622_vm1, %v601_v8 }
 0x1f6   : > { %3921 = vmatprep.mubr.msk.f32.mxu1 %vm622_vm1, %v603_v1 }
 0x1f9   : > { %3922 = vmatmul.mubr.msk.f32.gmra.mrb[6].mxu1 %vm622_vm1, %v605_v9 }
 0x2c0   : > { %v3914_v10 = vpop.f32.mrb[0].mxu1 }
 0x2c1   : > { %v721_v11 = vpop.f32.mrb[1].mxu1  ;;  %v763_v12 = vsel %vm452_vm0, %v3914_v10, -inf }
 0x2c2   : > { %764 = vmax.xlane.f32.xlu1 %v763_v12  ;;  %v760_v13 = vsel %vm452_vm0, %v721_v11, -inf }
 0x2c3   : > { %761 = vmax.xlane.f32.xlu0 %v760_v13 }
 0x2c4   : > { %v3917_v14 = vpop.f32.mrb[2].mxu1 }
 0x2c5   : > { %v731_v15 = vpop.f32.mrb[3].mxu1  ;;  %v769_v16 = vsel %vm452_vm0, %v3917_v14, -inf }
 0x2c6   : > { %v766_v19 = vsel %vm452_vm0, %v731_v15, -inf }
 0x2c7   : > { %770 = vmax.xlane.f32.xlu0 %v769_v16 }
 0x2c8   : > { %v5393_v17 = vpop.f32.mrb[4].mxu1 }
 0x2c9   : > { %v5395_v18 = vpop.f32.mrb[5].mxu1  ;;  %v775_v23 = vsel %vm452_vm0, %v5393_v17, -inf }
 0x2ca   : > { %v772_v25 = vsel %vm452_vm0, %v5395_v18, -inf }
 0x2cb   : > { %767 = vmax.xlane.f32.xlu0 %v766_v19 }
 0x2cc   : > { %v5398_v20 = vpop.f32.mrb[6].mxu1 }
 0x2cd   : > { %v5400_v21 = vpop.f32.mrb[7].mxu1  ;;  %v781_v27 = vsel %vm452_vm0, %v5398_v20, -inf }
 0x2ce   : > { %v778_v29 = vsel %vm452_vm0, %v5400_v21, -inf }
 0x2cf   : > { %776 = vmax.xlane.f32.xlu0 %v775_v23 }
 0x2d3   : > { %4581 = vrot.lane.b32.xlu1 %v5338_v43, %s5016_s25 }
 0x2e5   : > { %4576 = vrot.lane.b32.xlu0 %v5325_v38, %s5016_s25 }
 0x2e9   : > { %977 = vrot.lane.b32.xlu0 %v5297_v24, %s5017_s30 }
 0x2ed   : > { %981 = vrot.lane.b32.xlu0 %v5307_v30, %s5017_s30 }
 0x2f1   : > { %985 = vrot.lane.b32.xlu0 %v5319_v36, %s5017_s30 }
 0x2f5   : > { %989 = vrot.lane.b32.xlu0 %v5331_v42, %s5017_s30 }
 0x2f7   : > { %773 = vmax.xlane.f32.xlu1 %v772_v25 }
 0x2f9   : > { %4586 = vrot.lane.b32.xlu0 %v5301_v26, %s5018_s14 }
 0x2fb   : > { %782 = vmax.xlane.f32.xlu1 %v781_v27 }
 0x2fd   : > { %4596 = vrot.lane.b32.xlu0 %v5325_v38, %s5018_s14 }
 0x2ff   : > { %779 = vmax.xlane.f32.xlu1 %v778_v29 }
 0x301   : > { %4606 = vrot.lane.b32.xlu0 %v5301_v26, %s5019_s16 }
 0x310   : > { %979 = vrot.lane.b32.xlu1 %v5295_v22, %s5017_s30 }
 0x314   : > { %983 = vrot.lane.b32.xlu1 %v5305_v28, %s5017_s30 }
 0x318   : > { %987 = vrot.lane.b32.xlu1 %v5317_v34, %s5017_s30 }
 0x31c   : > { %991 = vrot.lane.b32.xlu1 %v5329_v40, %s5017_s30  ;;  %s3524_s30 = sshll.u32 %s421_s28, 6 }
 0x320   : > { %4591 = vrot.lane.b32.xlu1 %v5313_v32, %s5018_s14 }
 0x324   : > { %4601 = vrot.lane.b32.xlu1 %v5338_v43, %s5018_s14  ;;  %s423_s14 = scalar_lea.vmem [#allocation8], %s3524_s30 }
 0x328   : > { %4611 = vrot.lane.b32.xlu1 %v5313_v32, %s5019_s16 }
 0x34f   : > { %v765_v33 = vpop.xlane.xlu1 %764 }
 0x350   : > { %v785_v35 = vsub.f32 %v3914_v10, %v765_v33  ;;  %v762_v37 = vpop.xlane.xlu0 %761 }
 0x351   : > { %v784_v39 = vsub.f32 %v721_v11, %v762_v37 }
 0x352   : > { %v794_v41 = vmul.f32 1.442695, %v785_v35 }
 0x353   : > { %v792_v44 = vmul.f32 1.442695, %v784_v39  ;;  %v4582_v2 = vpop.permute.xlu1 %4581 }
 0x354   : > { %v771_v45 = vpop.xlane.xlu0 %770  ;;  %v4584_v4 = vunpack.i.h.bf16 %v4582_v2 }
 0x355   : > { %4685 = vpow2.f32 %v792_v44  ;;  %v787_v46 = vsub.f32 %v3917_v14, %v771_v45 }
 0x356   : > { %4687 = vpow2.f32 %v794_v41 }
 0x357   : > { %v798_v50 = vmul.f32 1.442695, %v787_v46 }
 0x358   : > { %v768_v47 = vpop.xlane.xlu0 %767 }
 0x359   : > { %v786_v49 = vsub.f32 %v731_v15, %v768_v47 }
 0x35b   : > { %v796_v51 = vmul.f32 1.442695, %v786_v49 }
 0x35c   : > { %v777_v52 = vpop.xlane.xlu0 %776 }
 0x35d   : > { %4689 = vpow2.f32 %v796_v51  ;;  %v789_v12 = vsub.f32 %v5393_v17, %v777_v52 }
 0x35e   : > { %4691 = vpow2.f32 %v798_v50 }
 0x35f   : > { %v5430_v55 = vpop.eup %4685  ;;  %v802_v15 = vmul.f32 1.442695, %v789_v12 }
 0x360   : > { %v5432_v56 = vpop.eup %4687  ;;  %3940 = vmatprep.mubr.msk.f32.mxu0 %vm452_vm0, %v5430_v55  ;;  %v4577_v57 = vpop.permute.xlu0 %4576 }
 0x361   : > { %3941 = vmatmul.mubr.msk.f32.vlgmr.msra.gmra.mrb[8].mxu0 %vm452_vm0, %v5432_v56  ;;  %v4579_v60 = vunpack.i.h.bf16 %v4577_v57  ;;  %v4578_v61 = vunpack.i.l.bf16 %v4577_v57 }
 0x362   : > { %4281 = vmatpush3.bf16.xpose.msk.msra.mxu0 %vm5357_vm2, %v5376_v5  ;;  %v4583_v5 = vunpack.i.l.bf16 %v4582_v2 }
 0x363   : > { %4284 = vmatprep.subr.msk.bf16.mxu0 %vm5357_vm2, %v4282_v58  ;;  %v4288_v1 = vpack.c.bf16 %v4579_v60, %v4578_v61 }
 0x364   : > { %v978_v59 = vpop.permute.xlu0 %977  ;;  %v4294_v7 = vpack.c.bf16 %v4584_v4, %v4583_v5 }
 0x367   : > { %v5443_v62 = vpop.eup %4689 }
 0x368   : > { %v5445_v63 = vpop.eup %4691  ;;  %v982_v0 = vpop.permute.xlu0 %981  ;;  %3943 = vmatprep.mubr.msk.f32.mxu0 %vm452_vm0, %v5443_v62 }
 0x369   : > { %3944 = vmatmul.mubr.msk.f32.gmra.mrb[10].mxu0 %vm452_vm0, %v5445_v63 }
 0x36a   : > { %4287 = vmatpush3.bf16.xpose.msk.msra.mxu0 %vm5357_vm2, %v4282_v58 }
 0x36b   : > { %4290 = vmatprep.subr.msk.bf16.mxu0 %vm5357_vm2, %v4288_v1 }
 0x36c   : > { %v986_v3 = vpop.permute.xlu0 %985 }
 0x370   : > { %v990_v6 = vpop.permute.xlu0 %989 }
 0x372   : > { %4293 = vmatpush3.bf16.xpose.msk.msra.mxu0 %vm5357_vm2, %v4288_v1 }
 0x373   : > { %4296 = vmatprep.subr.msk.bf16.mxu0 %vm5357_vm2, %v4294_v7 }
 0x374   : > { %v4587_v8 = vpop.permute.xlu0 %4586 }
 0x375   : > { %v4589_v9 = vunpack.i.h.bf16 %v4587_v8  ;;  %v4588_v10 = vunpack.i.l.bf16 %v4587_v8 }
 0x377   : > { %v4300_v11 = vpack.c.bf16 %v4589_v9, %v4588_v10 }
 0x378   : > { %v4597_v41 = vpop.permute.xlu0 %4596 }
 0x379   : > { %4301 = vmatprep.subr.bf16.mxu1 %v4300_v11  ;;  %v4599_v45 = vunpack.i.h.bf16 %v4597_v41  ;;  %v4598_v46 = vunpack.i.l.bf16 %v4597_v41 }
 0x37a   : > { %4299 = vmatpush3.bf16.xpose.msk.msra.mxu0 %vm5357_vm2, %v4294_v7  ;;  %4303 = vmatpush3.bf16.msra.mxu1 %v4300_v11 }
 0x37b   : > { %v4308_v54 = vpack.c.bf16 %v4599_v45, %v4598_v46 }
 0x37c   : > { %v4607_v57 = vpop.permute.xlu0 %4606 }
 0x37d   : > { %v4609_v58 = vunpack.i.h.bf16 %v4607_v57 }
 0x384   : > { %v774_v13 = vpop.xlane.xlu1 %773 }
 0x385   : > { %v788_v14 = vsub.f32 %v5395_v18, %v774_v13 }
 0x387   : > { %v800_v16 = vmul.f32 1.442695, %v788_v14 }
 0x388   : > { %v783_v19 = vpop.xlane.xlu1 %782 }
 0x389   : > { %4693 = vpow2.f32 %v800_v16  ;;  %v791_v23 = vsub.f32 %v5398_v20, %v783_v19 }
 0x38a   : > { %4695 = vpow2.f32 %v802_v15 }
 0x38b   : > { %v806_v29 = vmul.f32 1.442695, %v791_v23 }
 0x38c   : > { %v780_v25 = vpop.xlane.xlu1 %779 }
 0x38d   : > { %v790_v27 = vsub.f32 %v5400_v21, %v780_v25 }
 0x38f   : > { %v804_v31 = vmul.f32 1.442695, %v790_v27 }
 0x390   : > { %v980_v33 = vpop.permute.xlu1 %979 }
 0x391   : > { %4697 = vpow2.f32 %v804_v31 }
 0x392   : > { %4699 = vpow2.f32 %v806_v29 }
 0x393   : > { %v5465_v35 = vpop.eup %4693 }
 0x394   : > { %v5467_v17 = vpop.eup %4695  ;;  %v984_v18 = vpop.permute.xlu1 %983  ;;  %3946 = vmatprep.mubr.msk.f32.mxu0 %vm452_vm0, %v5465_v35 }
 0x395   : > { %3947 = vmatmul.mubr.msk.f32.gmra.mrb[12].mxu0 %vm452_vm0, %v5467_v17 }
 0x398   : > { %v988_v20 = vpop.permute.xlu1 %987 }
 0x39b   : > { %v5473_v37 = vpop.eup %4697 }
 0x39c   : > { %v5475_v21 = vpop.eup %4699  ;;  %v992_v39 = vpop.permute.xlu1 %991  ;;  %3949 = vmatprep.mubr.msk.f32.mxu0 %vm452_vm0, %v5473_v37 }
 0x39d   : > { %3950 = vmatmul.mubr.msk.f32.gmra.mrb[14].mxu0 %vm452_vm0, %v5475_v21 }
 0x39e   : > { %3968 = vmatprep.mubr.msk.f32.mxu0 %vm622_vm1, %v978_v59  ;;  %v4608_v59 = vunpack.i.l.bf16 %v4607_v57 }
 0x3a0   : > { %v4592_v44 = vpop.permute.xlu1 %4591  ;;  %v5488_v61 = vpack.c.bf16 %v4609_v58, %v4608_v59 }
 0x3a1   : > { %v4594_v47 = vunpack.i.h.bf16 %v4592_v44  ;;  %v4593_v49 = vunpack.i.l.bf16 %v4592_v44  ;;  %3969 = vmatmul.mubr.msk.f32.vlgmr.msra.gmra.mrb[16].mxu0 %vm622_vm1, %v980_v33 }
 0x3a2   : > { %3971 = vmatprep.mubr.msk.f32.mxu0 %vm622_vm1, %v982_v0 }
 0x3a3   : > { %v4304_v50 = vpack.c.bf16 %v4594_v47, %v4593_v49 }
 0x3a4   : > { %v4602_v51 = vpop.permute.xlu1 %4601 }
 0x3a5   : > { %v4604_v52 = vunpack.i.h.bf16 %v4602_v51  ;;  %v4603_v53 = vunpack.i.l.bf16 %v4602_v51  ;;  %3972 = vmatmul.mubr.msk.f32.gmra.mrb[18].mxu0 %vm622_vm1, %v984_v18  ;;  %4305 = vmatprep.subr.bf16.mxu1 %v4304_v50 }
 0x3a6   : > { %3974 = vmatprep.mubr.msk.f32.mxu0 %vm622_vm1, %v986_v3  ;;  %4307 = vmatpush3.bf16.msra.mxu1 %v4304_v50 }
 0x3a7   : > { %4309 = vmatprep.subr.bf16.mxu1 %v4308_v54  ;;  %v4312_v60 = vpack.c.bf16 %v4604_v52, %v4603_v53 }
 0x3a8   : > { %v4612_v18 = vpop.permute.xlu1 %4611 }
 0x3a9   : > { %3975 = vmatmul.mubr.msk.f32.gmra.mrb[20].mxu0 %vm622_vm1, %v988_v20  ;;  %v4614_v59 = vunpack.i.h.bf16 %v4612_v18 }
 0x3aa   : > { %3977 = vmatprep.mubr.msk.f32.mxu0 %vm622_vm1, %v990_v6  ;;  %4311 = vmatpush3.bf16.msra.mxu1 %v4308_v54 }
 0x3ab   : > { %4313 = vmatprep.subr.bf16.mxu1 %v4312_v60 }
 0x3ad   : > { %3978 = vmatmul.mubr.msk.f32.gmra.mrb[22].mxu0 %vm622_vm1, %v992_v39 }
 0x3ae   : > { %4315 = vmatpush3.bf16.msra.mxu1 %v4312_v60  ;;  %v4613_v60 = vunpack.i.l.bf16 %v4612_v18 }
 0x3af   : > { %4318 = vmatprep.subr.msk.bf16.mxu1 %vm5357_vm2, %v5488_v61 }
 0x434   : > { %v5494_v0 = vpop.f32.mrb[8].mxu0 }
 0x435   : > { %6641 = vst [vmem:[#allocation20_spill] sm:$0xff] %v5494_v0  ;;  %v5496_v1 = vpop.f32.mrb[9].mxu0 }
 0x43c   : > { %v5498_v2 = vpop.f32.mrb[10].mxu0 }
 0x43d   : > { %6642 = vst [vmem:[#allocation21_spill] sm:$0xff] %v5498_v2  ;;  %v5500_v3 = vpop.f32.mrb[11].mxu0 }
 0x468   : > { %v5502_v4 = vpop.f32.mrb[12].mxu0 }
 0x469   : > { %6643 = vst [vmem:[#allocation22_spill] sm:$0xff] %v5502_v4  ;;  %v5504_v5 = vpop.f32.mrb[13].mxu0 }
 0x470   : > { %v5506_v6 = vpop.f32.mrb[14].mxu0 }
 0x471   : > { %6644 = vst [vmem:[#allocation23_spill] sm:$0xff] %v5506_v6  ;;  %v5508_v7 = vpop.f32.mrb[15].mxu0 }
 0x472   : > { %6645 = vst [vmem:[#allocation24_spill] sm:$0xff] %v5508_v7 }
 0x474   : > { %v3970_v8 = vpop.f32.mrb[16].mxu0 }
 0x475   : > { %v1107_v9 = vpop.f32.mrb[17].mxu0  ;;  %v1149_v10 = vsel %vm452_vm0, %v3970_v8, -inf }
 0x476   : > { %1150 = vmax.xlane.f32.xlu1 %v1149_v10  ;;  %v1146_v11 = vsel %vm452_vm0, %v1107_v9, -inf }
 0x477   : > { %1147 = vmax.xlane.f32.xlu0 %v1146_v11 }
 0x478   : > { %v3973_v12 = vpop.f32.mrb[18].mxu0 }
 0x479   : > { %v1117_v13 = vpop.f32.mrb[19].mxu0  ;;  %v1155_v14 = vsel %vm452_vm0, %v3973_v12, -inf }
 0x47a   : > { %1156 = vmax.xlane.f32.xlu1 %v1155_v14  ;;  %v1152_v15 = vsel %vm452_vm0, %v1117_v13, -inf }
 0x47b   : > { %1153 = vmax.xlane.f32.xlu0 %v1152_v15 }
 0x47c   : > { %v3976_v16 = vpop.f32.mrb[20].mxu0 }
 0x47d   : > { %v1127_v19 = vpop.f32.mrb[21].mxu0  ;;  %v1161_v23 = vsel %vm452_vm0, %v3976_v16, -inf }
 0x47e   : > { %v1158_v29 = vsel %vm452_vm0, %v1127_v19, -inf }
 0x47f   : > { %1162 = vmax.xlane.f32.xlu0 %v1161_v23 }
 0x480   : > { %v5515_v25 = vpop.f32.mrb[22].mxu0 }
 0x481   : > { %v5517_v27 = vpop.f32.mrb[23].mxu0  ;;  %v1167_v31 = vsel %vm452_vm0, %v5515_v25, -inf }
 0x482   : > { %v1164_v33 = vsel %vm452_vm0, %v5517_v27, -inf }
 0x483   : > { %1159 = vmax.xlane.f32.xlu0 %v1158_v29 }
 0x48b   : > { %4621 = vrot.lane.b32.xlu1 %v5338_v43, %s5019_s16 }
 0x499   : > { %4616 = vrot.lane.b32.xlu0 %v5325_v38, %s5019_s16 }
 0x49d   : > { %1387 = vrot.lane.b32.xlu0 %v5297_v24, %s5020_s19 }
 0x4a1   : > { %1391 = vrot.lane.b32.xlu0 %v5307_v30, %s5020_s19 }
 0x4a5   : > { %1395 = vrot.lane.b32.xlu0 %v5319_v36, %s5020_s19 }
 0x4a9   : > { %1399 = vrot.lane.b32.xlu0 %v5331_v42, %s5020_s19 }
 0x4ad   : > { %4626 = vrot.lane.b32.xlu0 %v5301_v26, %s5021_s12 }
 0x4af   : > { %1168 = vmax.xlane.f32.xlu1 %v1167_v31 }
 0x4b1   : > { %4636 = vrot.lane.b32.xlu0 %v5325_v38, %s5021_s12 }
 0x4b3   : > { %1165 = vmax.xlane.f32.xlu1 %v1164_v33 }
 0x4b5   : > { %4646 = vrot.lane.b32.xlu0 %v5301_v26, %s5022_s15 }
 0x4c4   : > { %1389 = vrot.lane.b32.xlu1 %v5295_v22, %s5020_s19 }
 0x4c8   : > { %1393 = vrot.lane.b32.xlu1 %v5305_v28, %s5020_s19 }
 0x4cc   : > { %1397 = vrot.lane.b32.xlu1 %v5317_v34, %s5020_s19 }
 0x4d0   : > { %1401 = vrot.lane.b32.xlu1 %v5329_v40, %s5020_s19 }
 0x4d4   : > { %4631 = vrot.lane.b32.xlu1 %v5313_v32, %s5021_s12 }
 0x4d8   : > { %4641 = vrot.lane.b32.xlu1 %v5338_v43, %s5021_s12 }
 0x4dc   : > { %4651 = vrot.lane.b32.xlu1 %v5313_v32, %s5022_s15 }
 0x503   : > { %v1151_v20 = vpop.xlane.xlu1 %1150 }
 0x504   : > { %v1171_v39 = vsub.f32 %v3970_v8, %v1151_v20  ;;  %v1148_v41 = vpop.xlane.xlu0 %1147 }
 0x505   : > { %v1170_v44 = vsub.f32 %v1107_v9, %v1148_v41 }
 0x506   : > { %v1180_v45 = vmul.f32 1.442695, %v1171_v39 }
 0x507   : > { %v1178_v46 = vmul.f32 1.442695, %v1170_v44  ;;  %v1157_v47 = vpop.xlane.xlu1 %1156 }
 0x508   : > { %v1173_v49 = vsub.f32 %v3973_v12, %v1157_v47  ;;  %v1154_v50 = vpop.xlane.xlu0 %1153 }
 0x509   : > { %4701 = vpow2.f32 %v1178_v46  ;;  %v1172_v51 = vsub.f32 %v1117_v13, %v1154_v50  ;;  %v4322_v13 = vpack.c.bf16 %v4614_v59, %v4613_v60 }
 0x50a   : > { %4703 = vpow2.f32 %v1180_v45  ;;  %v1184_v52 = vmul.f32 1.442695, %v1173_v49 }
 0x50b   : > { %v1182_v53 = vmul.f32 1.442695, %v1172_v51  ;;  %v4622_v18 = vpop.permute.xlu1 %4621 }
 0x50c   : > { %v1163_v54 = vpop.xlane.xlu0 %1162  ;;  %v4624_v41 = vunpack.i.h.bf16 %v4622_v18  ;;  %v4623_v44 = vunpack.i.l.bf16 %v4622_v18 }
 0x50d   : > { %4705 = vpow2.f32 %v1182_v53  ;;  %v1175_v57 = vsub.f32 %v3976_v16, %v1163_v54 }
 0x50e   : > { %4707 = vpow2.f32 %v1184_v52  ;;  %v4334_v46 = vpack.c.bf16 %v4624_v41, %v4623_v44 }
 0x50f   : > { %v1188_v10 = vmul.f32 1.442695, %v1175_v57 }
 0x510   : > { %v1160_v58 = vpop.xlane.xlu0 %1159 }
 0x511   : > { %v1174_v8 = vsub.f32 %v1127_v19, %v1160_v58 }
 0x513   : > { %v5552_v9 = vpop.eup %4701  ;;  %v1186_v11 = vmul.f32 1.442695, %v1174_v8 }
 0x514   : > { %v5554_v14 = vpop.eup %4703  ;;  %3996 = vmatprep.mubr.msk.f32.mxu1 %vm452_vm0, %v5552_v9  ;;  %v4617_v12 = vpop.permute.xlu0 %4616 }
 0x515   : > { %4709 = vpow2.f32 %v1186_v11  ;;  %3997 = vmatmul.mubr.msk.f32.vlgmr.msra.gmra.mrb[8].mxu1 %vm452_vm0, %v5554_v14  ;;  %v4619_v23 = vunpack.i.h.bf16 %v4617_v12  ;;  %v4618_v29 = vunpack.i.l.bf16 %v4617_v12 }
 0x516   : > { %4711 = vpow2.f32 %v1188_v10  ;;  %4321 = vmatpush3.bf16.xpose.msk.msra.mxu1 %vm5357_vm2, %v5488_v61 }
 0x517   : > { %v5563_v15 = vpop.eup %4705  ;;  %4324 = vmatprep.subr.msk.bf16.mxu1 %vm5357_vm2, %v4322_v13  ;;  %v4328_v33 = vpack.c.bf16 %v4619_v23, %v4618_v29 }
 0x518   : > { %v5567_v16 = vpop.eup %4707  ;;  %3999 = vmatprep.mubr.msk.f32.mxu1 %vm452_vm0, %v5563_v15  ;;  %v1388_v19 = vpop.permute.xlu0 %1387 }
 0x519   : > { %4000 = vmatmul.mubr.msk.f32.gmra.mrb[10].mxu1 %vm452_vm0, %v5567_v16 }
 0x51c   : > { %v1392_v31 = vpop.permute.xlu0 %1391 }
 0x51e   : > { %4327 = vmatpush3.bf16.xpose.msk.msra.mxu1 %vm5357_vm2, %v4322_v13 }
 0x51f   : > { %v5575_v61 = vpop.eup %4709  ;;  %4330 = vmatprep.subr.msk.bf16.mxu1 %vm5357_vm2, %v4328_v33 }
 0x520   : > { %v5579_v20 = vpop.eup %4711  ;;  %4002 = vmatprep.mubr.msk.f32.mxu1 %vm452_vm0, %v5575_v61  ;;  %v1396_v39 = vpop.permute.xlu0 %1395 }
 0x521   : > { %4003 = vmatmul.mubr.msk.f32.gmra.mrb[12].mxu1 %vm452_vm0, %v5579_v20 }
 0x524   : > { %v1400_v45 = vpop.permute.xlu0 %1399 }
 0x526   : > { %4333 = vmatpush3.bf16.xpose.msk.msra.mxu1 %vm5357_vm2, %v4328_v33 }
 0x527   : > { %4336 = vmatprep.subr.msk.bf16.mxu1 %vm5357_vm2, %v4334_v46 }
 0x528   : > { %v4627_v47 = vpop.permute.xlu0 %4626 }
 0x529   : > { %v4629_v49 = vunpack.i.h.bf16 %v4627_v47  ;;  %v4628_v50 = vunpack.i.l.bf16 %v4627_v47 }
 0x52b   : > { %v4340_v51 = vpack.c.bf16 %v4629_v49, %v4628_v50 }
 0x52d   : > { %4341 = vmatprep.subr.bf16.mxu0 %v4340_v51 }
 0x52e   : > { %4339 = vmatpush3.bf16.xpose.msk.msra.mxu1 %vm5357_vm2, %v4334_v46  ;;  %4343 = vmatpush3.bf16.msra.mxu0 %v4340_v51 }
 0x53c   : > { %v1169_v52 = vpop.xlane.xlu1 %1168 }
 0x53d   : > { %v1177_v53 = vsub.f32 %v5515_v25, %v1169_v52  ;;  %v4637_v25 = vpop.permute.xlu0 %4636 }
 0x53e   : > { %v4639_v23 = vunpack.i.h.bf16 %v4637_v25  ;;  %v4638_v29 = vunpack.i.l.bf16 %v4637_v25 }
 0x53f   : > { %v1192_v58 = vmul.f32 1.442695, %v1177_v53 }
 0x540   : > { %v1166_v54 = vpop.xlane.xlu1 %1165  ;;  %v4348_v46 = vpack.c.bf16 %v4639_v23, %v4638_v29 }
 0x541   : > { %v1176_v57 = vsub.f32 %v5517_v27, %v1166_v54  ;;  %v4647_v50 = vpop.permute.xlu0 %4646 }
 0x542   : > { %v4648_v51 = vunpack.i.l.bf16 %v4647_v50 }
 0x543   : > { %v1190_v59 = vmul.f32 1.442695, %v1176_v57 }
 0x544   : > { %v1390_v60 = vpop.permute.xlu1 %1389 }
 0x545   : > { %4713 = vpow2.f32 %v1190_v59 }
 0x546   : > { %4715 = vpow2.f32 %v1192_v58 }
 0x548   : > { %v1394_v8 = vpop.permute.xlu1 %1393 }
 0x54c   : > { %v1398_v10 = vpop.permute.xlu1 %1397 }
 0x54f   : > { %v5593_v11 = vpop.eup %4713 }
 0x550   : > { %v5595_v12 = vpop.eup %4715  ;;  %4005 = vmatprep.mubr.msk.f32.mxu1 %vm452_vm0, %v5593_v11  ;;  %v1402_v13 = vpop.permute.xlu1 %1401 }
 0x551   : > { %4006 = vmatmul.mubr.msk.f32.gmra.mrb[14].mxu1 %vm452_vm0, %v5595_v12 }
 0x552   : > { %4024 = vmatprep.mubr.msk.f32.mxu1 %vm622_vm1, %v1388_v19  ;;  %v4649_v19 = vunpack.i.h.bf16 %v4647_v50 }
 0x554   : > { %v4632_v27 = vpop.permute.xlu1 %4631 }
 0x555   : > { %v4634_v33 = vunpack.i.h.bf16 %v4632_v27  ;;  %v4633_v18 = vunpack.i.l.bf16 %v4632_v27  ;;  %4025 = vmatmul.mubr.msk.f32.vlgmr.msra.gmra.mrb[16].mxu1 %vm622_vm1, %v1390_v60 }
 0x556   : > { %4027 = vmatprep.mubr.msk.f32.mxu1 %vm622_vm1, %v1392_v31  ;;  %v5608_v31 = vpack.c.bf16 %v4649_v19, %v4648_v51 }
 0x557   : > { %v4344_v41 = vpack.c.bf16 %v4634_v33, %v4633_v18 }
 0x558   : > { %v4642_v44 = vpop.permute.xlu1 %4641 }
 0x559   : > { %v4644_v47 = vunpack.i.h.bf16 %v4642_v44  ;;  %v4643_v49 = vunpack.i.l.bf16 %v4642_v44  ;;  %4028 = vmatmul.mubr.msk.f32.gmra.mrb[18].mxu1 %vm622_vm1, %v1394_v8  ;;  %4345 = vmatprep.subr.bf16.mxu0 %v4344_v41 }
 0x55a   : > { %4030 = vmatprep.mubr.msk.f32.mxu1 %vm622_vm1, %v1396_v39  ;;  %4347 = vmatpush3.bf16.msra.mxu0 %v4344_v41 }
 0x55b   : > { %4349 = vmatprep.subr.bf16.mxu0 %v4348_v46  ;;  %v4352_v52 = vpack.c.bf16 %v4644_v47, %v4643_v49 }
 0x55d   : > { %4031 = vmatmul.mubr.msk.f32.gmra.mrb[20].mxu1 %vm622_vm1, %v1398_v10 }
 0x55e   : > { %4033 = vmatprep.mubr.msk.f32.mxu1 %vm622_vm1, %v1400_v45  ;;  %4351 = vmatpush3.bf16.msra.mxu0 %v4348_v46 }
 0x55f   : > { %4353 = vmatprep.subr.bf16.mxu0 %v4352_v52 }
 0x561   : > { %4034 = vmatmul.mubr.msk.f32.gmra.mrb[22].mxu1 %vm622_vm1, %v1402_v13 }
 0x562   : > { %4355 = vmatpush3.bf16.msra.mxu0 %v4352_v52 }
 0x563   : > { %4358 = vmatprep.subr.msk.bf16.mxu0 %vm5357_vm2, %v5608_v31 }
 0x5e8   : > { %v5614_v39 = vpop.f32.mrb[8].mxu1 }
 0x5e9   : > { %v5616_v53 = vpop.f32.mrb[9].mxu1 }
 0x5ec   : > { %v5618_v54 = vpop.f32.mrb[10].mxu1 }
 0x5ed   : > { %v5620_v57 = vpop.f32.mrb[11].mxu1 }
 0x5f4   : > { %v5622_v45 = vpop.f32.mrb[12].mxu1 }
 0x5f5   : > { %v5624_v58 = vpop.f32.mrb[13].mxu1 }
 0x624   : > { %v5626_v59 = vpop.f32.mrb[14].mxu1 }
 0x625   : > { %v5628_v60 = vpop.f32.mrb[15].mxu1 }
 0x628   : > { %v4026_v8 = vpop.f32.mrb[16].mxu1 }
 0x629   : > { %v1517_v10 = vpop.f32.mrb[17].mxu1  ;;  %v1559_v13 = vsel %vm452_vm0, %v4026_v8, -inf }
 0x62a   : > { %1560 = vmax.xlane.f32.xlu1 %v1559_v13  ;;  %v1556_v25 = vsel %vm452_vm0, %v1517_v10, -inf }
 0x62b   : > { %1557 = vmax.xlane.f32.xlu0 %v1556_v25 }
 0x62c   : > { %v4029_v27 = vpop.f32.mrb[18].mxu1 }
 0x62d   : > { %v1527_v23 = vpop.f32.mrb[19].mxu1  ;;  %v1565_v29 = vsel %vm452_vm0, %v4029_v27, -inf }
 0x62e   : > { %1566 = vmax.xlane.f32.xlu1 %v1565_v29  ;;  %v1562_v33 = vsel %vm452_vm0, %v1527_v23, -inf }
 0x62f   : > { %1563 = vmax.xlane.f32.xlu0 %v1562_v33 }
 0x630   : > { %v4032_v18 = vpop.f32.mrb[20].mxu1 }
 0x631   : > { %v1537_v41 = vpop.f32.mrb[21].mxu1  ;;  %v1571_v44 = vsel %vm452_vm0, %v4032_v18, -inf }
 0x632   : > { %v1568_v49 = vsel %vm452_vm0, %v1537_v41, -inf }
 0x633   : > { %1572 = vmax.xlane.f32.xlu0 %v1571_v44 }
 0x634   : > { %v5635_v46 = vpop.f32.mrb[22].mxu1 }
 0x635   : > { %v5637_v47 = vpop.f32.mrb[23].mxu1  ;;  %v1577_v50 = vsel %vm452_vm0, %v5635_v46, -inf }
 0x636   : > { %v1574_v19 = vsel %vm452_vm0, %v5637_v47, -inf }
 0x637   : > { %1569 = vmax.xlane.f32.xlu0 %v1568_v49 }
 0x63f   : > { %4661 = vrot.lane.b32.xlu1 %v5338_v43, %s5022_s15 }
 0x64d   : > { %4656 = vrot.lane.b32.xlu0 %v5325_v38, %s5022_s15 }
 0x651   : > { %1797 = vrot.lane.b32.xlu0 %v5297_v24, %s5023_s11 }
 0x655   : > { %1801 = vrot.lane.b32.xlu0 %v5307_v30, %s5023_s11 }
 0x659   : > { %1805 = vrot.lane.b32.xlu0 %v5319_v36, %s5023_s11 }
 0x65d   : > { %1809 = vrot.lane.b32.xlu0 %v5331_v42, %s5023_s11 }
 0x661   : > { %4666 = vrot.lane.b32.xlu0 %v5301_v26, %s5024_s23  ;;  %v4652_v26 = vpop.permute.xlu1 %4651 }
 0x662   : > { %v4654_v0 = vunpack.i.h.bf16 %v4652_v26 }
 0x663   : > { %1578 = vmax.xlane.f32.xlu1 %v1577_v50 }
 0x667   : > { %1575 = vmax.xlane.f32.xlu1 %v1574_v19 }
 0x678   : > { %1799 = vrot.lane.b32.xlu1 %v5295_v22, %s5023_s11 }
 0x67c   : > { %1803 = vrot.lane.b32.xlu1 %v5305_v28, %s5023_s11 }
 0x680   : > { %1807 = vrot.lane.b32.xlu1 %v5317_v34, %s5023_s11 }
 0x684   : > { %1811 = vrot.lane.b32.xlu1 %v5329_v40, %s5023_s11  ;;  %v4653_v40 = vunpack.i.l.bf16 %v4652_v26 }
 0x688   : > { %4671 = vrot.lane.b32.xlu1 %v5313_v32, %s5024_s23 }
 0x6b7   : > { %v1561_v51 = vpop.xlane.xlu1 %1560 }
 0x6b8   : > { %v1581_v52 = vsub.f32 %v4026_v8, %v1561_v51  ;;  %v1558_v13 = vpop.xlane.xlu0 %1557 }
 0x6b9   : > { %v1580_v25 = vsub.f32 %v1517_v10, %v1558_v13 }
 0x6ba   : > { %v1590_v29 = vmul.f32 1.442695, %v1581_v52 }
 0x6bb   : > { %v1588_v33 = vmul.f32 1.442695, %v1580_v25  ;;  %v1567_v44 = vpop.xlane.xlu1 %1566 }
 0x6bc   : > { %v1583_v49 = vsub.f32 %v4029_v27, %v1567_v44  ;;  %v1564_v50 = vpop.xlane.xlu0 %1563 }
 0x6bd   : > { %4717 = vpow2.f32 %v1588_v33  ;;  %v1582_v19 = vsub.f32 %v1527_v23, %v1564_v50  ;;  %v4362_v23 = vpack.c.bf16 %v4654_v0, %v4653_v40 }
 0x6be   : > { %4719 = vpow2.f32 %v1590_v29  ;;  %v1594_v7 = vmul.f32 1.442695, %v1583_v49 }
 0x6bf   : > { %v1592_v6 = vmul.f32 1.442695, %v1582_v19 }
 0x6c0   : > { %v1573_v4 = vpop.xlane.xlu0 %1572 }
 0x6c1   : > { %4721 = vpow2.f32 %v1592_v6  ;;  %v1585_v2 = vsub.f32 %v4032_v18, %v1573_v4 }
 0x6c2   : > { %4723 = vpow2.f32 %v1594_v7 }
 0x6c3   : > { %v1598_v51 = vmul.f32 1.442695, %v1585_v2 }
 0x6c4   : > { %v1570_v32 = vpop.xlane.xlu0 %1569 }
 0x6c5   : > { %v1584_v8 = vsub.f32 %v1537_v41, %v1570_v32  ;;  %v4662_v41 = vpop.permute.xlu1 %4661 }
 0x6c6   : > { %v4664_v29 = vunpack.i.h.bf16 %v4662_v41  ;;  %v4663_v33 = vunpack.i.l.bf16 %v4662_v41 }
 0x6c7   : > { %v5660_v10 = vpop.eup %4717  ;;  %v1596_v52 = vmul.f32 1.442695, %v1584_v8 }
 0x6c8   : > { %v5662_v13 = vpop.eup %4719  ;;  %4052 = vmatprep.mubr.msk.f32.mxu0 %vm452_vm0, %v5660_v10  ;;  %v4657_v27 = vpop.permute.xlu0 %4656  ;;  %v4374_v49 = vpack.c.bf16 %v4664_v29, %v4663_v33 }
 0x6c9   : > { %4725 = vpow2.f32 %v1596_v52  ;;  %4053 = vmatmul.mubr.msk.f32.vlgmr.msra.gmra.mrb[24].mxu0 %vm452_vm0, %v5662_v13  ;;  %v4659_v40 = vunpack.i.h.bf16 %v4657_v27  ;;  %v4658_v0 = vunpack.i.l.bf16 %v4657_v27 }
 0x6ca   : > { %4727 = vpow2.f32 %v1598_v51  ;;  %4361 = vmatpush3.bf16.xpose.msk.msra.mxu0 %vm5357_vm2, %v5608_v31 }
 0x6cb   : > { %v5671_v2 = vpop.eup %4721  ;;  %4364 = vmatprep.subr.msk.bf16.mxu0 %vm5357_vm2, %v4362_v23  ;;  %v4368_v18 = vpack.c.bf16 %v4659_v40, %v4658_v0 }
 0x6cc   : > { %v5675_v4 = vpop.eup %4723  ;;  %v1798_v6 = vpop.permute.xlu0 %1797  ;;  %4055 = vmatprep.mubr.msk.f32.mxu0 %vm452_vm0, %v5671_v2 }
 0x6cd   : > { %4056 = vmatmul.mubr.msk.f32.gmra.mrb[26].mxu0 %vm452_vm0, %v5675_v4 }
 0x6d0   : > { %v1802_v7 = vpop.permute.xlu0 %1801 }
 0x6d2   : > { %4367 = vmatpush3.bf16.xpose.msk.msra.mxu0 %vm5357_vm2, %v4362_v23 }
 0x6d3   : > { %v5683_v31 = vpop.eup %4725  ;;  %4370 = vmatprep.subr.msk.bf16.mxu0 %vm5357_vm2, %v4368_v18 }
 0x6d4   : > { %v5687_v26 = vpop.eup %4727  ;;  %v1806_v25 = vpop.permute.xlu0 %1805  ;;  %4058 = vmatprep.mubr.msk.f32.mxu0 %vm452_vm0, %v5683_v31 }
 0x6d5   : > { %4059 = vmatmul.mubr.msk.f32.gmra.mrb[28].mxu0 %vm452_vm0, %v5687_v26 }
 0x6d8   : > { %v1810_v44 = vpop.permute.xlu0 %1809 }
 0x6da   : > { %4373 = vmatpush3.bf16.xpose.msk.msra.mxu0 %vm5357_vm2, %v4368_v18 }
 0x6db   : > { %4376 = vmatprep.subr.msk.bf16.mxu0 %vm5357_vm2, %v4374_v49 }
 0x6dc   : > { %v4667_v50 = vpop.permute.xlu0 %4666 }
 0x6dd   : > { %v4669_v19 = vunpack.i.h.bf16 %v4667_v50  ;;  %v4668_v32 = vunpack.i.l.bf16 %v4667_v50 }
 0x6df   : > { %v4380_v8 = vpack.c.bf16 %v4669_v19, %v4668_v32 }
 0x6e1   : > { %4381 = vmatprep.subr.bf16.mxu1 %v4380_v8 }
 0x6e2   : > { %4379 = vmatpush3.bf16.xpose.msk.msra.mxu0 %vm5357_vm2, %v4374_v49  ;;  %4383 = vmatpush3.bf16.msra.mxu1 %v4380_v8 }
 0x6f0   : > { %v1579_v51 = vpop.xlane.xlu1 %1578 }
 0x6f1   : > { %v1587_v52 = vsub.f32 %v5635_v46, %v1579_v51 }
 0x6f3   : > { %v1602_v40 = vmul.f32 1.442695, %v1587_v52 }
 0x6f4   : > { %v1576_v27 = vpop.xlane.xlu1 %1575 }
 0x6f5   : > { %v1586_v23 = vsub.f32 %v5637_v47, %v1576_v27 }
 0x6f7   : > { %v1600_v0 = vmul.f32 1.442695, %v1586_v23 }
 0x6f8   : > { %v1800_v18 = vpop.permute.xlu1 %1799 }
 0x6f9   : > { %4729 = vpow2.f32 %v1600_v0 }
 0x6fa   : > { %4731 = vpow2.f32 %v1602_v40 }
 0x6fc   : > { %v1804_v41 = vpop.permute.xlu1 %1803 }
 0x700   : > { %v1808_v29 = vpop.permute.xlu1 %1807 }
 0x703   : > { %v5701_v33 = vpop.eup %4729 }
 0x704   : > { %v5703_v50 = vpop.eup %4731  ;;  %v1812_v48 = vpop.permute.xlu1 %1811  ;;  %4061 = vmatprep.mubr.msk.f32.mxu0 %vm452_vm0, %v5701_v33 }
 0x705   : > { %4062 = vmatmul.mubr.msk.f32.gmra.mrb[30].mxu0 %vm452_vm0, %v5703_v50 }
 0x706   : > { %4080 = vmatprep.mubr.msk.f32.mxu0 %vm622_vm1, %v1798_v6 }
 0x708   : > { %v4672_v46 = vpop.permute.xlu1 %4671 }
 0x709   : > { %v4674_v47 = vunpack.i.h.bf16 %v4672_v46  ;;  %v4673_v49 = vunpack.i.l.bf16 %v4672_v46  ;;  %4081 = vmatmul.mubr.msk.f32.vlgmr.msra.gmra.mrb[32].mxu0 %vm622_vm1, %v1800_v18 }
 0x70a   : > { %4083 = vmatprep.mubr.msk.f32.mxu0 %vm622_vm1, %v1802_v7 }
 0x70b   : > { %v4384_v19 = vpack.c.bf16 %v4674_v47, %v4673_v49 }
 0x70d   : > { %4084 = vmatmul.mubr.msk.f32.gmra.mrb[34].mxu0 %vm622_vm1, %v1804_v41  ;;  %4385 = vmatprep.subr.bf16.mxu1 %v4384_v19 }
 0x70e   : > { %4086 = vmatprep.mubr.msk.f32.mxu0 %vm622_vm1, %v1806_v25  ;;  %4387 = vmatpush3.bf16.msra.mxu1 %v4384_v19 }
 0x711   : > { %4087 = vmatmul.mubr.msk.f32.gmra.mrb[36].mxu0 %vm622_vm1, %v1808_v29 }
 0x712   : > { %4089 = vmatprep.mubr.msk.f32.mxu0 %vm622_vm1, %v1810_v44 }
 0x715   : > { %4090 = vmatmul.mubr.msk.f32.gmra.mrb[38].mxu0 %vm622_vm1, %v1812_v48 }
 0x79c   : > { %v5717_v6 = vpop.f32.mrb[24].mxu0 }
 0x79d   : > { %v5719_v32 = vpop.f32.mrb[25].mxu0 }
 0x7a0   : > { %v5721_v8 = vpop.f32.mrb[26].mxu0 }
 0x7a1   : > { %v5723_v7 = vpop.f32.mrb[27].mxu0 }
 0x7a8   : > { %v5725_v51 = vpop.f32.mrb[28].mxu0 }
 0x7a9   : > { %v5727_v52 = vpop.f32.mrb[29].mxu0 }
 0x7d8   : > { %v5729_v25 = vpop.f32.mrb[30].mxu0 }
 0x7d9   : > { %v5731_v27 = vpop.f32.mrb[31].mxu0 }
 0x7dc   : > { %v5733_v23 = vpop.f32.mrb[32].mxu0 }
 0x7dd   : > { %v5735_v44 = vpop.f32.mrb[33].mxu0  ;;  %v1969_v40 = vsel %vm452_vm0, %v5733_v23, -inf }
 0x7de   : > { %1970 = vmax.xlane.f32.xlu1 %v1969_v40  ;;  %v1966_v0 = vsel %vm452_vm0, %v5735_v44, -inf }
 0x7df   : > { %1967 = vmax.xlane.f32.xlu0 %v1966_v0 }
 0x7e0   : > { %v5741_v18 = vpop.f32.mrb[34].mxu0 }
 0x7e1   : > { %v5743_v41 = vpop.f32.mrb[35].mxu0  ;;  %v1975_v29 = vsel %vm452_vm0, %v5741_v18, -inf }
 0x7e2   : > { %v1972_v47 = vsel %vm452_vm0, %v5743_v41, -inf }
 0x7e3   : > { %1976 = vmax.xlane.f32.xlu0 %v1975_v29 }
 0x7e4   : > { %v5747_v48 = vpop.f32.mrb[36].mxu0 }
 0x7e5   : > { %v5749_v46 = vpop.f32.mrb[37].mxu0  ;;  %v1981_v29 = vsel %vm452_vm0, %v5747_v48, -inf }
 0x7e6   : > { %v1978_v49 = vsel %vm452_vm0, %v5749_v46, -inf }
 0x7e7   : > { %1973 = vmax.xlane.f32.xlu0 %v1972_v47  ;;  %1979 = vmax.xlane.f32.xlu1 %v1978_v49  ;;  %v1194_v47 = vsel %vm452_vm0, %v5552_v9, 0.0  ;;  %v1604_v49 = vsel %vm452_vm0, %v5660_v10, 0.0  ;;  %v1610_v9 = vsel %vm452_vm0, %v5671_v2, 0.0  ;;  %v1206_v10 = vsel %vm452_vm0, %v5575_v61, 0.0 }
 0x7e8   : > { %v5755_v19 = vpop.f32.mrb[38].mxu0  ;;  %v1212_v2 = vsel %vm452_vm0, %v5593_v11, 0.0  ;;  %v1215_v61 = vsel %vm452_vm0, %v5595_v12, 0.0 }
 0x7e9   : > { %v5757_v40 = vpop.f32.mrb[39].mxu0  ;;  %v1987_v0 = vsel %vm452_vm0, %v5755_v19, -inf }
 0x7ea   : > { %v1984_v42 = vsel %vm452_vm0, %v5757_v40, -inf }
 0x7eb   : > { %1982 = vmax.xlane.f32.xlu0 %v1981_v29  ;;  %1988 = vmax.xlane.f32.xlu1 %v1987_v0  ;;  %v1197_v0 = vsel %vm452_vm0, %v5554_v14, 0.0  ;;  %v1613_v14 = vsel %vm452_vm0, %v5675_v4, 0.0  ;;  %v1622_v4 = vsel %vm452_vm0, %v5701_v33, 0.0 }
 0x7ef   : > { %1985 = vmax.xlane.f32.xlu1 %v1984_v42  ;;  %v1607_v42 = vsel %vm452_vm0, %v5662_v13, 0.0  ;;  %v1616_v13 = vsel %vm452_vm0, %v5683_v31, 0.0  ;;  %v808_v31 = vsel %vm452_vm0, %v5430_v55, 0.0 }
 0x800   : > { %4681 = vrot.lane.b32.xlu1 %v5338_v43, %s5024_s23  ;;  %v1200_v43 = vsel %vm452_vm0, %v5563_v15, 0.0  ;;  %v1209_v15 = vsel %vm452_vm0, %v5579_v20, 0.0  ;;  %v1625_v20 = vsel %vm452_vm0, %v5703_v50, 0.0 }
 0x801   : > { %4676 = vrot.lane.b32.xlu0 %v5325_v38, %s5024_s23  ;;  %v1203_v38 = vsel %vm452_vm0, %v5567_v16, 0.0  ;;  %v1619_v16 = vsel %vm452_vm0, %v5687_v26, 0.0  ;;  %s6679_s23 = sld [smem:[#allocation35_spill]] }
 0x820   : > { %1195 = vadd.xlane.f32.xlu0 %v1194_v47 }
 0x824   : > { %1605 = vadd.xlane.f32.xlu0 %v1604_v49  ;;  %1198 = vadd.xlane.f32.xlu1 %v1197_v0 }
 0x828   : > { %1608 = vadd.xlane.f32.xlu0 %v1607_v42  ;;  %1201 = vadd.xlane.f32.xlu1 %v1200_v43 }
 0x82c   : > { %1204 = vadd.xlane.f32.xlu0 %v1203_v38  ;;  %1611 = vadd.xlane.f32.xlu1 %v1610_v9 }
 0x830   : > { %1614 = vadd.xlane.f32.xlu0 %v1613_v14  ;;  %1207 = vadd.xlane.f32.xlu1 %v1206_v10 }
 0x834   : > { %1210 = vadd.xlane.f32.xlu0 %v1209_v15  ;;  %1617 = vadd.xlane.f32.xlu1 %v1616_v13 }
 0x838   : > { %1620 = vadd.xlane.f32.xlu0 %v1619_v16  ;;  %1213 = vadd.xlane.f32.xlu1 %v1212_v2 }
 0x83c   : > { %1216 = vadd.xlane.f32.xlu0 %v1215_v61  ;;  %1623 = vadd.xlane.f32.xlu1 %v1622_v4 }
 0x840   : > { %1626 = vadd.xlane.f32.xlu0 %v1625_v20  ;;  %809 = vadd.xlane.f32.xlu1 %v808_v31 }
 0x86b   : > { %v1971_v26 = vpop.xlane.xlu1 %1970 }
 0x86c   : > { %v1991_v11 = vsub.f32 %v5733_v23, %v1971_v26  ;;  %v1968_v29 = vpop.xlane.xlu0 %1967 }
 0x86d   : > { %v1990_v47 = vsub.f32 %v5735_v44, %v1968_v29 }
 0x86e   : > { %v2000_v12 = vmul.f32 1.442695, %v1991_v11 }
 0x86f   : > { %v1998_v49 = vmul.f32 1.442695, %v1990_v47 }
 0x870   : > { %4733 = vpow2.f32 %v2000_v12  ;;  %v1977_v33 = vpop.xlane.xlu0 %1976 }
 0x871   : > { %4735 = vpow2.f32 %v1998_v49  ;;  %v1993_v0 = vsub.f32 %v5741_v18, %v1977_v33 }
 0x873   : > { %v2004_v42 = vmul.f32 1.442695, %v1993_v0 }
 0x874   : > { %v1974_v50 = vpop.xlane.xlu0 %1973  ;;  %v1980_v43 = vpop.xlane.xlu1 %1979 }
 0x875   : > { %4737 = vpow2.f32 %v2004_v42  ;;  %v1992_v55 = vsub.f32 %v5743_v41, %v1974_v50  ;;  %v1994_v38 = vsub.f32 %v5749_v46, %v1980_v43 }
 0x877   : > { %v2002_v9 = vmul.f32 1.442695, %v1992_v55  ;;  %v2006_v23 = vmul.f32 1.442695, %v1994_v38 }
 0x878   : > { %v1983_v14 = vpop.xlane.xlu0 %1982  ;;  %v1989_v10 = vpop.xlane.xlu1 %1988 }
 0x879   : > { %4739 = vpow2.f32 %v2002_v9  ;;  %v1995_v44 = vsub.f32 %v5747_v48, %v1983_v14  ;;  %v1997_v15 = vsub.f32 %v5755_v19, %v1989_v10  ;;  %v811_v14 = vsel %vm452_vm0, %v5432_v56, 0.0 }
 0x87a   : > { %v4734_v13 = vpop.eup %4733  ;;  %4741 = vpow2.f32 %v2006_v23  ;;  %v814_v23 = vsel %vm452_vm0, %v5443_v62, 0.0  ;;  %v820_v10 = vsel %vm452_vm0, %v5465_v35, 0.0  ;;  %v817_v62 = vsel %vm452_vm0, %v5445_v63, 0.0 }
 0x87b   : > { %v4736_v16 = vpop.eup %4735  ;;  %v2008_v18 = vmul.f32 1.442695, %v1995_v44  ;;  %v2012_v2 = vmul.f32 1.442695, %v1997_v15  ;;  %v2017_v61 = vsel %vm452_vm0, %v4734_v13, 0.0  ;;  %v823_v56 = vsel %vm452_vm0, %v5467_v17, 0.0 }
 0x87c   : > { %4108 = vmatprep.mubr.msk.f32.mxu1 %vm452_vm0, %v4736_v16  ;;  %2018 = vadd.xlane.f32.xlu0 %v2017_v61  ;;  %v4677_v41 = vpop.permute.xlu0 %4676  ;;  %v1986_v46 = vpop.xlane.xlu1 %1985  ;;  %v2014_v4 = vsel %vm452_vm0, %v4736_v16, 0.0  ;;  %v826_v35 = vsel %vm452_vm0, %v5473_v37, 0.0 }
 0x87d   : > { %4743 = vpow2.f32 %v2008_v18  ;;  %v4679_v20 = vunpack.i.h.bf16 %v4677_v41  ;;  %v4678_v31 = vunpack.i.l.bf16 %v4677_v41  ;;  %2015 = vadd.xlane.f32.xlu1 %v2014_v4  ;;  %v1996_v26 = vsub.f32 %v5757_v40, %v1986_v46 }
 0x87e   : > { %4745 = vpow2.f32 %v2012_v2 }
 0x87f   : > { %v4738_v48 = vpop.eup %4737  ;;  %v4388_v19 = vpack.c.bf16 %v4679_v20, %v4678_v31  ;;  %v2010_v33 = vmul.f32 1.442695, %v1996_v26 }
 0x880   : > { %v4682_v11 = vpop.permute.xlu1 %4681  ;;  %v2023_v29 = vsel %vm452_vm0, %v4738_v48, 0.0 }
 0x881   : > { %v4684_v47 = vunpack.i.h.bf16 %v4682_v11  ;;  %v4683_v12 = vunpack.i.l.bf16 %v4682_v11  ;;  %2024 = vadd.xlane.f32.xlu0 %v2023_v29  ;;  %4389 = vmatprep.subr.bf16.mxu1 %v4388_v19  ;;  %4747 = vpow2.f32 %v2010_v33 }
 0x882   : > { %4391 = vmatpush3.bf16.msra.mxu1 %v4388_v19 }
 0x883   : > { %v4740_v49 = vpop.eup %4739  ;;  %v4392_v0 = vpack.c.bf16 %v4684_v47, %v4683_v12 }
 0x884   : > { %v2020_v42 = vsel %vm452_vm0, %v4740_v49, 0.0  ;;  %v4742_v50 = vpop.eup %4741 }
 0x885   : > { %2021 = vadd.xlane.f32.xlu1 %v2020_v42  ;;  %4393 = vmatprep.subr.bf16.mxu1 %v4392_v0  ;;  %v2026_v55 = vsel %vm452_vm0, %v4742_v50, 0.0 }
 0x886   : > { %4395 = vmatpush3.bf16.msra.mxu1 %v4392_v0 }
 0x887   : > { %v4744_v43 = vpop.eup %4743 }
 0x888   : > { %v2029_v40 = vsel %vm452_vm0, %v4744_v43, 0.0  ;;  %v4746_v38 = vpop.eup %4745 }
 0x889   : > { %2030 = vadd.xlane.f32.xlu0 %v2029_v40  ;;  %2027 = vadd.xlane.f32.xlu1 %v2026_v55  ;;  %v2035_v9 = vsel %vm452_vm0, %v4746_v38, 0.0 }
 0x88a   : > { %4109 = vmatmul.mubr.msk.f32.vlgmr.msra.gmra.mrb[24].mxu1 %vm452_vm0, %v4734_v13  ;;  %v829_v13 = vsel %vm452_vm0, %v5475_v21, 0.0 }
 0x88b   : > { %4111 = vmatprep.mubr.msk.f32.mxu1 %vm452_vm0, %v4740_v49  ;;  %v4748_v44 = vpop.eup %4747 }
 0x88c   : > { %v2032_v15 = vsel %vm452_vm0, %v4748_v44, 0.0 }
 0x88d   : > { %2036 = vadd.xlane.f32.xlu0 %v2035_v9  ;;  %815 = vadd.xlane.f32.xlu1 %v814_v23 }
 0x88e   : > { %4112 = vmatmul.mubr.msk.f32.gmra.mrb[26].mxu1 %vm452_vm0, %v4738_v48 }
 0x88f   : > { %4114 = vmatprep.mubr.msk.f32.mxu1 %vm452_vm0, %v4742_v50 }
 0x891   : > { %812 = vadd.xlane.f32.xlu0 %v811_v14  ;;  %821 = vadd.xlane.f32.xlu1 %v820_v10 }
 0x892   : > { %4115 = vmatmul.mubr.msk.f32.gmra.mrb[28].mxu1 %vm452_vm0, %v4744_v43 }
 0x893   : > { %4117 = vmatprep.mubr.msk.f32.mxu1 %vm452_vm0, %v4748_v44 }
 0x895   : > { %818 = vadd.xlane.f32.xlu0 %v817_v62  ;;  %2033 = vadd.xlane.f32.xlu1 %v2032_v15 }
 0x896   : > { %4118 = vmatmul.mubr.msk.f32.gmra.mrb[30].mxu1 %vm452_vm0, %v4746_v38 }
 0x899   : > { %824 = vadd.xlane.f32.xlu0 %v823_v56  ;;  %827 = vadd.xlane.f32.xlu1 %v826_v35 }
 0x89d   : > { %830 = vadd.xlane.f32.xlu0 %v829_v13  ;;  %v2911_v13 = vld [vmem:[#allocation5] sm:$0xff] }
 0x8ad   : > { %v1196_v16 = vpop.xlane.xlu0 %1195 }
 0x8ae   : > { %4749 = vrcp.f32 %v1196_v16  ;;  %v2912_v16 = vld [vmem:[#allocation5 + $0x8] sm:$0xff] }
 0x8b1   : > { %v1606_v63 = vpop.xlane.xlu0 %1605  ;;  %v1199_v18 = vpop.xlane.xlu1 %1198 }
 0x8b2   : > { %4751 = vrcp.f32 %v1606_v63  ;;  %v2913_v63 = vld [vmem:[#allocation5 + $0x10] sm:$0xff] }
 0x8b3   : > { %4753 = vrcp.f32 %v1199_v18  ;;  %v4396_v18 = vpack.c.bf16 %v2912_v16, %v2911_v13 }
 0x8b5   : > { %v1609_v2 = vpop.xlane.xlu0 %1608  ;;  %v1202_v61 = vpop.xlane.xlu1 %1201  ;;  %4397 = vmatprep.subr.bf16.mxu1 %v4396_v18 }
 0x8b6   : > { %4755 = vrcp.f32 %v1609_v2  ;;  %4399 = vmatpush3.bf16.msra.mxu1 %v4396_v18 }
 0x8b7   : > { %4757 = vrcp.f32 %v1202_v61  ;;  %v2916_v61 = vld [vmem:[#allocation5 + $0x28] sm:$0xff] }
 0x8b8   : > { %v4750_v17 = vpop.eup %4749 }
 0x8b9   : > { %v1205_v41 = vpop.xlane.xlu0 %1204  ;;  %v1612_v46 = vpop.xlane.xlu1 %1611  ;;  %v1379_v37 = vmul.f32 %v4750_v17, %v5616_v53 }
 0x8ba   : > { %4759 = vrcp.f32 %v1205_v41 }
 0x8bb   : > { %4761 = vrcp.f32 %v1612_v46  ;;  %2215 = vrot.lane.b32.xlu1 %v1379_v37, %s5019_s16 }
 0x8bc   : > { %v4752_v21 = vpop.eup %4751 }
 0x8bd   : > { %v4754_v4 = vpop.eup %4753  ;;  %v1615_v20 = vpop.xlane.xlu0 %1614  ;;  %v1789_v48 = vmul.f32 %v4752_v21, %v5719_v32 }
 0x8be   : > { %v1208_v31 = vpop.xlane.xlu1 %1207  ;;  %4763 = vrcp.f32 %v1615_v20  ;;  %v1380_v19 = vmul.f32 %v4754_v4, %v5614_v39 }
 0x8bf   : > { %4765 = vrcp.f32 %v1208_v31  ;;  %2247 = vrot.lane.b32.xlu1 %v1789_v48, %s5014_s20 }
 0x8c0   : > { %v4756_v26 = vpop.eup %4755  ;;  %2217 = vrot.lane.b32.xlu0 %v1380_v19, %s5019_s16 }
 0x8c1   : > { %v4758_v53 = vpop.eup %4757  ;;  %v1211_v11 = vpop.xlane.xlu0 %1210  ;;  %v1790_v47 = vmul.f32 %v4756_v26, %v5717_v6  ;;  %v2917_v26 = vld [vmem:[#allocation5 + $0x30] sm:$0xff] }
 0x8c2   : > { %v1618_v29 = vpop.xlane.xlu1 %1617  ;;  %4767 = vrcp.f32 %v1211_v11  ;;  %v1381_v12 = vmul.f32 %v4758_v53, %v5620_v57  ;;  %v2918_v53 = vld [vmem:[#allocation5 + $0x38] sm:$0xff] }
 0x8c3   : > { %4769 = vrcp.f32 %v1618_v29  ;;  %2249 = vrot.lane.b32.xlu1 %v1790_v47, %s5014_s20  ;;  %v4408_v29 = vpack.c.bf16 %v2918_v53, %v2917_v26 }
 0x8c4   : > { %v4760_v32 = vpop.eup %4759  ;;  %2219 = vrot.lane.b32.xlu0 %v1381_v12, %s5019_s16 }
 0x8c5   : > { %v4762_v39 = vpop.eup %4761  ;;  %v1621_v49 = vpop.xlane.xlu0 %1620  ;;  %v1382_v0 = vmul.f32 %v4760_v32, %v5618_v54 }
 0x8c6   : > { %v1214_v33 = vpop.xlane.xlu1 %1213  ;;  %4771 = vrcp.f32 %v1621_v49  ;;  %v1791_v42 = vmul.f32 %v4762_v39, %v5723_v7 }
 0x8c7   : > { %4773 = vrcp.f32 %v1214_v33  ;;  %2221 = vrot.lane.b32.xlu1 %v1382_v0, %s5019_s16 }
 0x8c8   : > { %v4764_v6 = vpop.eup %4763  ;;  %2251 = vrot.lane.b32.xlu0 %v1791_v42, %s5014_s20 }
 0x8c9   : > { %v4766_v57 = vpop.eup %4765  ;;  %v1217_v50 = vpop.xlane.xlu0 %1216  ;;  %v1792_v40 = vmul.f32 %v4764_v6, %v5721_v8 }
 0x8ca   : > { %v1624_v43 = vpop.xlane.xlu1 %1623  ;;  %4775 = vrcp.f32 %v1217_v50  ;;  %v1383_v55 = vmul.f32 %v4766_v57, %v5624_v58 }
 0x8cb   : > { %4777 = vrcp.f32 %v1624_v43  ;;  %2253 = vrot.lane.b32.xlu1 %v1792_v40, %s5014_s20  ;;  %v3063_v40 = vld [vmem:[#allocation7] sm:$0xff] }
 0x8cc   : > { %v4768_v54 = vpop.eup %4767  ;;  %2223 = vrot.lane.b32.xlu0 %v1383_v55, %s5019_s16  ;;  %v3064_v55 = vld [vmem:[#allocation7 + $0x8] sm:$0xff] }
 0x8cd   : > { %v4770_v7 = vpop.eup %4769  ;;  %v1627_v38 = vpop.xlane.xlu0 %1626  ;;  %v1384_v23 = vmul.f32 %v4768_v54, %v5622_v45  ;;  %v3065_v54 = vld [vmem:[#allocation7 + $0x10] sm:$0xff] }
 0x8ce   : > { %v810_v9 = vpop.xlane.xlu1 %809  ;;  %4779 = vrcp.f32 %v1627_v38  ;;  %v1793_v14 = vmul.f32 %v4770_v7, %v5727_v52 }
 0x8cf   : > { %4781 = vrcp.f32 %v810_v9  ;;  %2225 = vrot.lane.b32.xlu1 %v1384_v23, %s5019_s16  ;;  %v2370_v9 = vlaneseq  ;;  %v4412_v23 = vpack.c.bf16 %v3064_v55, %v3063_v40 }
 0x8d0   : > { %v4772_v8 = vpop.eup %4771  ;;  %2255 = vrot.lane.b32.xlu0 %v1793_v14, %s5014_s20  ;;  %v3066_v14 = vld [vmem:[#allocation7 + $0x18] sm:$0xff] }
 0x8d1   : > { %v4774_v58 = vpop.eup %4773  ;;  %v1794_v10 = vmul.f32 %v4772_v8, %v5725_v51  ;;  %4413 = vmatprep.subr.bf16.mxu0 %v4412_v23 }
 0x8d2   : > { %v1385_v44 = vmul.f32 %v4774_v58, %v5628_v60  ;;  %4415 = vmatpush3.bf16.msra.mxu0 %v4412_v23 }
 0x8d3   : > { %2257 = vrot.lane.b32.xlu1 %v1794_v10, %s5014_s20 }
 0x8d4   : > { %v4776_v62 = vpop.eup %4775  ;;  %2227 = vrot.lane.b32.xlu0 %v1385_v44, %s5019_s16  ;;  %v4416_v44 = vpack.c.bf16 %v3066_v14, %v3065_v54 }
 0x8d5   : > { %v4778_v45 = vpop.eup %4777  ;;  %v1386_v15 = vmul.f32 %v4776_v62, %v5626_v59  ;;  %v2914_v59 = vld [vmem:[#allocation5 + $0x18] sm:$0xff]  ;;  %v3067_v62 = vld [vmem:[#allocation7 + $0x20] sm:$0xff] }
 0x8d6   : > { %v1795_v52 = vmul.f32 %v4778_v45, %v5731_v27  ;;  %v4400_v2 = vpack.c.bf16 %v2914_v59, %v2913_v63  ;;  %v2915_v27 = vld [vmem:[#allocation5 + $0x20] sm:$0xff]  ;;  %v3068_v45 = vld [vmem:[#allocation7 + $0x28] sm:$0xff]  ;;  %4417 = vmatprep.subr.bf16.mxu0 %v4416_v44 }
 0x8d7   : > { %2229 = vrot.lane.b32.xlu1 %v1386_v15, %s5019_s16  ;;  %v4404_v17 = vpack.c.bf16 %v2916_v61, %v2915_v27  ;;  %4419 = vmatpush3.bf16.msra.mxu0 %v4416_v44  ;;  %v5025_v27 = vmov 0.0   ;;  %s3667_s16 = sshll.u32 %s5109_s21, 10  ;;  %s6552_s21 = scalar_lea.sflag [#allocation4], %s421_s28 }
 0x8d8   : > { %v4780_v56 = vpop.eup %4779  ;;  %2259 = vrot.lane.b32.xlu0 %v1795_v52, %s5014_s20  ;;  %4401 = vmatprep.subr.bf16.mxu1 %v4400_v2  ;;  %v2331_v61 = vrot.slane %v5025_v27, 7  ;;  %s6543_s13 = scalar_lea.hbm %s6679_s23, %s3667_s16 }
 0x8d9   : > { %v4782_v35 = vpop.eup %4781  ;;  %v1796_v51 = vmul.f32 %v4780_v56, %v5729_v25  ;;  %4403 = vmatpush3.bf16.msra.mxu1 %v4400_v2  ;;  %v2368_v2 = vld [vmem:[#allocation2] sm:$0xff] }
 0x8da   : > { %v5873_v60 = vmul.f32 %v4782_v35, %v5496_v1  ;;  %4405 = vmatprep.subr.bf16.mxu1 %v4404_v17  ;;  %v2371_v35 = vshrl.u32 %v2370_v9, 7 }
 0x8db   : > { %2261 = vrot.lane.b32.xlu1 %v1796_v51, %s5014_s20  ;;  %v4420_v51 = vpack.c.bf16 %v3068_v45, %v3067_v62 }
 0x8dc   : > { %v2392_v59 = vsub.s32 1, %v2371_v35  ;;  %v2738_v53 = vsub.s32 7, %v2371_v35 }
 0x8dd   : > { %4407 = vmatpush3.bf16.msra.mxu1 %v4404_v17  ;;  %4421 = vmatprep.subr.bf16.mxu0 %v4420_v51  ;;  %v2469_v17 = vsub.s32 2, %v2371_v35 }
 0x8de   : > { %4409 = vmatprep.subr.bf16.mxu1 %v4408_v29  ;;  %4423 = vmatpush3.bf16.msra.mxu0 %v4420_v51 }
 0x8e1   : > { %4411 = vmatpush3.bf16.msra.mxu1 %v4408_v29 }
 0x909   : > { %v2019_v48 = vpop.xlane.xlu0 %2018 }
 0x90a   : > { %v2016_v25 = vpop.xlane.xlu1 %2015 }
 0x90e   : > { %v2025_v19 = vpop.xlane.xlu0 %2024 }
 0x912   : > { %v2022_v1 = vpop.xlane.xlu1 %2021 }
 0x916   : > { %v2028_v41 = vpop.xlane.xlu1 %2027  ;;  %v2031_v11 = vpop.xlane.xlu0 %2030 }
 0x91a   : > { %v816_v46 = vpop.xlane.xlu1 %815 }
 0x91b   : > { %4783 = vrcp.f32 %v816_v46  ;;  %v2332_v46 = vrot.slane %v5297_v24, 7 }
 0x91d   : > { %v5903_v26 = vsel %vm2349_vm3, %v2332_v46, 0.0 }
 0x91e   : > { %v822_v37 = vpop.xlane.xlu1 %821 }
 0x91f   : > { %4785 = vrcp.f32 %v822_v37  ;;  %v2372_v37 = vsub.s32 0, %v2371_v35 }
 0x920   : > { %4787 = vrcp.f32 %v2019_v48 }
 0x921   : > { %4789 = vrcp.f32 %v2016_v25  ;;  %v5890_v25 = vrot.slane %v2368_v2, %v2392_v59 }
 0x922   : > { %4791 = vrcp.f32 %v2025_v19  ;;  %v2034_v12 = vpop.xlane.xlu1 %2033  ;;  %v5900_v19 = vsel %vm2349_vm3, 0.0, %v2332_v46 }
 0x923   : > { %4793 = vrcp.f32 %v2022_v1  ;;  %v2350_v1 = vsel %vm2349_vm3, 0.0, %v2331_v61 }
 0x924   : > { %4795 = vrcp.f32 %v2031_v11  ;;  %v5905_v11 = vrot.slane %v2368_v2, %v2372_v37 }
 0x925   : > { %v4784_v21 = vpop.eup %4783  ;;  %4797 = vrcp.f32 %v2028_v41  ;;  %v2359_v41 = vsel %vm2349_vm3, %v2331_v61, 0.0 }
 0x926   : > { %v5877_v4 = vmul.f32 %v4784_v21, %v5500_v3  ;;  %v2037_v3 = vpop.xlane.xlu0 %2036  ;;  %v5895_v21 = vrot.slane %v2368_v2, %v2469_v17  ;;  %v2395_v48 = vmul.f32 %v5890_v25, %v2359_v41 }
 0x927   : > { %4799 = vrcp.f32 %v2037_v3 }
 0x928   : > { %6646 = vst [vmem:[#allocation25_spill] sm:$0xff] %v5877_v4  ;;  %4801 = vrcp.f32 %v2034_v12  ;;  %v2471_v29 = vmul.f32 %v5895_v21, %v2350_v1  ;;  %v2472_v24 = vmul.f32 %v5895_v21, %v2359_v41  ;;  %v2396_v12 = vmul.f32 %v5890_v25, %v5900_v19 }
 0x929   : > { %v4786_v20 = vpop.eup %4785  ;;  %v2473_v14 = vmul.f32 %v5895_v21, %v5900_v19 }
 0x92a   : > { %v5880_v31 = vmul.f32 %v4786_v20, %v5504_v5  ;;  %v4788_v47 = vpop.eup %4787  ;;  %v2394_v20 = vmul.f32 %v5890_v25, %v2350_v1 }
 0x92b   : > { %v4790_v5 = vpop.eup %4789  ;;  %v2507_v59 = vrot.slane %v2473_v14, 2  ;;  %v2335_v14 = vrot.slane %v5305_v28, 7 }
 0x92c   : > { %6647 = vst [vmem:[#allocation26_spill] sm:$0xff] %v5880_v31  ;;  %v4792_v0 = vpop.eup %4791  ;;  %v2427_v3 = vrot.slane %v2394_v20, 1 }
 0x92d   : > { %v4794_v6 = vpop.eup %4793 }
 0x92e   : > { %v4796_v7 = vpop.eup %4795 }
 0x92f   : > { %v4798_v8 = vpop.eup %4797 }
 0x931   : > { %v4800_v52 = vpop.eup %4799 }
 0x932   : > { %v4802_v13 = vpop.eup %4801 }
 0x95d   : > { %v4110_v32 = vpop.f32.mrb[24].mxu1 }
 0x95e   : > { %v2200_v39 = vmul.f32 %v4788_v47, %v4110_v32  ;;  %v2152_v49 = vpop.f32.mrb[25].mxu1  ;;  %v2428_v47 = vrot.slane %v2395_v48, 1  ;;  %v2397_v32 = vmul.f32 %v5890_v25, %v5903_v26 }
 0x95f   : > { %v2199_v33 = vmul.f32 %v4790_v5, %v2152_v49  ;;  %v2566_v5 = vsub.s32 4, %v2371_v35  ;;  %v2333_v49 = vrot.slane %v5295_v22, 7 }
 0x960   : > { %2281 = vrot.lane.b32.xlu1 %v2200_v39, %s5020_s19  ;;  %v2642_v39 = vsub.s32 5, %v2371_v35  ;;  %v2429_v40 = vsel %vm2426_vm4, %v2427_v3, %v2428_v47 }
 0x961   : > { %2279 = vrot.lane.b32.xlu0 %v2199_v33, %s5020_s19  ;;  %v4113_v42 = vpop.f32.mrb[26].mxu1  ;;  %v2546_v33 = vsub.s32 3, %v2371_v35  ;;  %v5921_v22 = vrot.slane %v2368_v2, %v2566_v5  ;;  %v5926_v23 = vsel %vm2349_vm3, 0.0, %v2333_v49 }
 0x962   : > { %v2202_v57 = vmul.f32 %v4792_v0, %v4113_v42  ;;  %v2162_v50 = vpop.f32.mrb[27].mxu1  ;;  %v5914_v0 = vrot.slane %v2368_v2, %v2738_v53  ;;  %v2718_v42 = vsub.s32 6, %v2371_v35  ;;  %v5923_v9 = vrot.slane %v2368_v2, %v2642_v39 }
 0x963   : > { %v2201_v43 = vmul.f32 %v4794_v6, %v2162_v50  ;;  %v2374_v6 = vmul.f32 %v5905_v11, %v2350_v1  ;;  %v2505_v50 = vrot.slane %v2472_v24, 2 }
 0x964   : > { %2285 = vrot.lane.b32.xlu1 %v2202_v57, %s5020_s19  ;;  %v2504_v57 = vrot.slane %v2471_v29, 2  ;;  %v2754_v55 = vmul.f32 %v5914_v0, %v2350_v1  ;;  %v2755_v54 = vmul.f32 %v5914_v0, %v2359_v41  ;;  %v2644_v28 = vmul.f32 %v5923_v9, %v5900_v19 }
 0x965   : > { %2283 = vrot.lane.b32.xlu0 %v2201_v43, %s5020_s19  ;;  %v4116_v38 = vpop.f32.mrb[28].mxu1  ;;  %v2334_v43 = vrot.slane %v5307_v30, 7  ;;  %v2474_v30 = vmul.f32 %v5895_v21, %v5903_v26  ;;  %v2459_v44 = vadd.f32 %v2429_v40, %v2374_v6  ;;  %v2568_v40 = vmul.f32 %v5921_v22, %v5900_v19 }
 0x966   : > { %v2204_v58 = vmul.f32 %v4796_v7, %v4116_v38  ;;  %v2172_v10 = vpop.f32.mrb[29].mxu1  ;;  %v2430_v7 = vrot.slane %v2396_v12, 1  ;;  %v2431_v38 = vrot.slane %v2397_v32, 1  ;;  %v2506_v62 = vsel %vm2503_vm5, %v2504_v57, %v2505_v50 }
 0x967   : > { %v2203_v15 = vmul.f32 %v4798_v8, %v2172_v10  ;;  %v5932_v8 = vrot.slane %v2368_v2, %v2546_v33  ;;  %v5937_v10 = vrot.slane %v2368_v2, %v2718_v42  ;;  %v5941_v45 = vsel %vm2349_vm3, 0.0, %v2334_v43 }
 0x968   : > { %2289 = vrot.lane.b32.xlu1 %v2204_v58, %s5020_s19  ;;  %v5935_v58 = vsel %vm2349_vm3, %v2333_v49, 0.0  ;;  %v2794_v35 = vrot.slane %v2755_v54, 1  ;;  %v2432_v51 = vsel %vm2426_vm4, %v2430_v7, %v2431_v38  ;;  %v2508_v2 = vrot.slane %v2474_v30, 2 }
 0x969   : > { %2287 = vrot.lane.b32.xlu0 %v2203_v15, %s5020_s19  ;;  %v4119_v56 = vpop.f32.mrb[30].mxu1  ;;  %v5944_v15 = vsel %vm2349_vm3, %v2334_v43, 0.0  ;;  %v2571_v27 = vmul.f32 %v5921_v22, %v5935_v58  ;;  %v2536_v61 = vadd.f32 %v2506_v62, %v2459_v44  ;;  %v2400_v17 = vmul.f32 %v5890_v25, %v5941_v45 }
 0x96a   : > { %v2206_v16 = vmul.f32 %v4800_v52, %v4119_v56  ;;  %v2182_v63 = vpop.f32.mrb[31].mxu1  ;;  %v5946_v52 = vld [vmem:[#allocation2 + $0x8] ss:$0 sm:$0xff]  ;;  %v2793_v56 = vrot.slane %v2754_v55, 1  ;;  %v2401_v46 = vmul.f32 %v5890_v25, %v5944_v15  ;;  %v2647_v20 = vmul.f32 %v5923_v9, %v5935_v58 }
 0x96b   : > { %v2205_v18 = vmul.f32 %v4802_v13, %v2182_v63  ;;  %v2570_v13 = vmul.f32 %v5921_v22, %v5926_v23  ;;  %v5954_v63 = vmul.f32 %v5946_v52, %v2350_v1  ;;  %v5967_v48 = vmul.f32 %v5937_v10, %v2350_v1 }
 0x96c   : > { %2293 = vrot.lane.b32.xlu1 %v2206_v16, %s5020_s19  ;;  %v2646_v16 = vmul.f32 %v5923_v9, %v5926_v23  ;;  %v5970_v53 = vmul.f32 %v5946_v52, %v2359_v41  ;;  %v2549_v29 = vmul.f32 %v5932_v8, %v5926_v23  ;;  %v5976_v24 = vmul.f32 %v5914_v0, %v5941_v45 }
 0x96d   : > { %2291 = vrot.lane.b32.xlu0 %v2205_v18, %s5020_s19  ;;  %6648 = vst [vmem:[#allocation27_spill] sm:$0xff] %v5954_v63  ;;  %v2375_v18 = vmul.f32 %v5905_v11, %v5900_v19  ;;  %v5979_v3 = vsel %vm2426_vm4, %v2793_v56, %v2794_v35  ;;  %v2509_v12 = vsel %vm2503_vm5, %v2507_v59, %v2508_v2  ;;  %v2603_v32 = vrot.slane %v2570_v13, 1  ;;  %s3421_s19 = sshll.u32 %s423_s14, 4  ;;  %s6546_s19 = int_to_ptr.vmem [resolvable:$true] %s3421_s19 }
 0x96e   : > { %6649 = vst [vmem:[#allocation28_spill] sm:$0xff] %v5970_v53  ;;  %6650 = vst [vmem:[#allocation29_spill] sm:$0xff] %v5979_v3  ;;  %v2604_v1 = vrot.slane %v2571_v27, 1  ;;  %v2679_v5 = vrot.slane %v2646_v16, 2  ;;  %v2436_v39 = vrot.slane %v2400_v17, 1  ;;  %v2437_v41 = vrot.slane %v2401_v46, 1  ;;  %p4944_p13 = scmp.lt.s32.totalorder %s6546_s19, %s4942_s26 }
 0x96f   : > { %v2460_v37 = vadd.f32 %v2432_v51, %v2375_v18  ;;  %v2477_v49 = vmul.f32 %v5895_v21, %v5941_v45  ;;  %v2478_v33 = vmul.f32 %v5895_v21, %v5944_v15  ;;  %v2680_v6 = vrot.slane %v2647_v20, 2  ;;  %s4937_s22 = scalar_lea.vmem %s6546_s19, 1024 }
 0x970   : > { %v5989_v57 = vmul.f32 %v5937_v10, %v5941_v45  ;;  %v2743_v50 = vmul.f32 %v5914_v0, %v5944_v15  ;;  %v2775_v43 = vrot.slane %v5976_v24, 1  ;;  %v2398_v55 = vmul.f32 %v5890_v25, %v5926_v23  ;;  %p4938_p12 = scmp.ne.s32.totalorder %s6546_s19, %s4937_s22  ;;  %p4945_p1 = scmp.lt.s32.totalorder %s4943_s17, %s4937_s22 }
 0x971   : > { %v2537_v42 = vadd.f32 %v2509_v12, %v2460_v37  ;;  %v2399_v54 = vmul.f32 %v5890_v25, %v5935_v58  ;;  %v6002_v7 = vmul.f32 %v5946_v52, %v5941_v45  ;;  %v2569_v38 = vmul.f32 %v5921_v22, %v5903_v26 }
 0x972   : > { %v2377_v30 = vmul.f32 %v5905_v11, %v5941_v45  ;;  %v2605_v44 = vsel %vm2426_vm4, %v2603_v32, %v2604_v1  ;;  %v2438_v62 = vsel %vm2426_vm4, %v2436_v39, %v2437_v41  ;;  %v2513_v56 = vrot.slane %v2477_v49, 2  ;;  %p4939_p8 = pnand %p4938_p12, %p6680_p7  ;;  %p4946_p6 = por %p4945_p1, %p4944_p13 }
 0x973   : > { %v2514_v35 = vrot.slane %v2478_v33, 2  ;;  %v2557_v51 = vadd.f32 %v2549_v29, %v2537_v42  ;;  %v2776_v13 = vrot.slane %v2743_v50, 1  ;;  %v6013_v16 = vmul.f32 %v5946_v52, %v5944_v15 }
 0x974   : > { %v2548_v18 = vmul.f32 %v5932_v8, %v5900_v19  ;;  %v2600_v59 = vrot.slane %v2568_v40, 1  ;;  %v2433_v2 = vrot.slane %v2398_v55, 1  ;;  %v2434_v27 = vrot.slane %v2399_v54, 1  ;;  %p4940_p11 = pneg %p4939_p8 }
 0x975   : > { %v2601_v17 = vrot.slane %v2569_v38, 1  ;;  %v2645_v46 = vmul.f32 %v5923_v9, %v5903_v26  ;;  %v6022_v37 = vsel %vm2349_vm3, 0.0, %v2335_v14  ;;  %v2462_v20 = vadd.f32 %v2438_v62, %v2377_v30  ;;  %v6046_v30 = vpop.xlane.xlu0 %812 }
 0x976   : > { %v6025_v29 = vsel %vm2349_vm3, %v2335_v14, 0.0  ;;  %v2515_v24 = vsel %vm2503_vm5, %v2513_v56, %v2514_v35  ;;  %v2475_v12 = vmul.f32 %v5895_v21, %v5926_v23  ;;  %v2476_v19 = vmul.f32 %v5895_v21, %v5935_v58  ;;  %p4947_p9 = pnand %p4946_p6, %p4940_p11 }
 0x977   : > { %v2681_v32 = vsel %vm2503_vm5, %v2679_v5, %v2680_v6  ;;  %v2851_v1 = vrot.slane %v6002_v7, 2  ;;  %v2574_v26 = vmul.f32 %v5921_v22, %v6022_v37  ;;  %v2575_v39 = vmul.f32 %v5921_v22, %v6025_v29 }
 0x978   : > { %v2633_v41 = vadd.f32 %v2605_v44, %v2557_v51  ;;  %v2556_v49 = vadd.f32 %v2548_v18, %v2536_v61  ;;  %v2676_v33 = vrot.slane %v2644_v28, 2  ;;  %v2435_v42 = vsel %vm2426_vm4, %v2433_v2, %v2434_v27 }
 0x979   : > { %v2602_v50 = vsel %vm2426_vm4, %v2600_v59, %v2601_v17  ;;  %v2677_v40 = vrot.slane %v2645_v46, 2  ;;  %v2539_v55 = vadd.f32 %v2515_v24, %v2462_v20  ;;  %v2376_v5 = vmul.f32 %v5905_v11, %v5926_v23 }
 0x97a   : > { %v2551_v6 = vmul.f32 %v5932_v8, %v6022_v37  ;;  %v2650_v54 = vmul.f32 %v5923_v9, %v6022_v37  ;;  %v2510_v38 = vrot.slane %v2475_v12, 2  ;;  %v2511_v14 = vrot.slane %v2476_v19, 2 }
 0x97b   : > { %v2609_v61 = vrot.slane %v2574_v26, 1  ;;  %v2610_v44 = vrot.slane %v2575_v39, 1  ;;  %v2651_v62 = vmul.f32 %v5923_v9, %v6025_v29  ;;  %v2461_v56 = vadd.f32 %v2435_v42, %v2376_v5  ;;  %v6065_v39 = vpop.xlane.xlu1 %827 }
 0x97c   : > { %v2777_v35 = vsel %vm2426_vm4, %v2775_v43, %v2776_v13  ;;  %v2740_v51 = vmul.f32 %v5914_v0, %v5926_v23  ;;  %v2572_v18 = vmul.f32 %v5921_v22, %v5941_v45  ;;  %v2573_v59 = vmul.f32 %v5921_v22, %v5944_v15 }
 0x97d   : > { %v2632_v28 = vadd.f32 %v2602_v50, %v2556_v49  ;;  %v2741_v2 = vmul.f32 %v5914_v0, %v5935_v58  ;;  %v2336_v27 = vrot.slane %v5319_v36, 7  ;;  %v2559_v17 = vadd.f32 %v2551_v6, %v2539_v55 }
 0x97e   : > { %v2709_v46 = vadd.f32 %v2681_v32, %v2633_v41  ;;  %v2678_v20 = vsel %vm2503_vm5, %v2676_v33, %v2677_v40  ;;  %v2685_v43 = vrot.slane %v2650_v54, 2  ;;  %v2512_v13 = vsel %vm2503_vm5, %v2510_v38, %v2511_v14  ;;  %v6071_v41 = vpop.xlane.xlu0 %818 }
 0x97f   : > { %v2611_v24 = vsel %vm2426_vm4, %v2609_v61, %v2610_v44  ;;  %v2686_v12 = vrot.slane %v2651_v62, 2  ;;  %v2538_v19 = vadd.f32 %v2512_v13, %v2461_v56  ;;  %v2550_v26 = vmul.f32 %v5932_v8, %v5941_v45  ;;  %v6089_v44 = vpop.permute.xlu1 %2215 }
 0x980   : > { %v2606_v49 = vrot.slane %v2572_v18, 1  ;;  %v2607_v42 = vrot.slane %v2573_v59, 1  ;;  %v2648_v36 = vmul.f32 %v5923_v9, %v5941_v45  ;;  %v2649_v32 = vmul.f32 %v5923_v9, %v5944_v15 }
 0x981   : > { %v2708_v33 = vadd.f32 %v2678_v20, %v2632_v28  ;;  %v6074_v50 = vsel %vm2349_vm3, 0.0, %v2336_v27  ;;  %v6077_v40 = vsel %vm2349_vm3, %v2336_v27, 0.0  ;;  %v2635_v55 = vadd.f32 %v2611_v24, %v2559_v17 }
 0x982   : > { %v2816_v5 = vmul.f32 %v5946_v52, %v5926_v23  ;;  %v2817_v6 = vmul.f32 %v5946_v52, %v5935_v58  ;;  %v2746_v45 = vmul.f32 %v5914_v0, %v6074_v50  ;;  %v2747_v15 = vmul.f32 %v5914_v0, %v6077_v40 }
 0x983   : > { %v2720_v54 = vmul.f32 %v5937_v10, %v5926_v23  ;;  %v2772_v38 = vrot.slane %v2740_v51, 1  ;;  %v2773_v14 = vrot.slane %v2741_v2, 1  ;;  %v2558_v61 = vadd.f32 %v2550_v26, %v2538_v19  ;;  %v6095_v2 = vpop.xlane.xlu0 %824 }
 0x984   : > { %v2687_v62 = vsel %vm2503_vm5, %v2685_v43, %v2686_v12  ;;  %v2608_v56 = vsel %vm2426_vm4, %v2606_v49, %v2607_v42  ;;  %v2682_v18 = vrot.slane %v2648_v36, 2  ;;  %v2683_v58 = vrot.slane %v2649_v32, 2 }
 0x985   : > { %v2729_v59 = vadd.f32 %v5989_v57, %v2709_v46  ;;  %v2852_v28 = vrot.slane %v6013_v16, 2  ;;  %v2728_v27 = vadd.f32 %v2720_v54, %v2708_v33  ;;  %v2711_v17 = vadd.f32 %v2687_v62, %v2635_v55  ;;  %v6112_v33 = vpop.permute.xlu1 %2247 }
 0x986   : > { %v2848_v20 = vrot.slane %v2816_v5, 2  ;;  %v2849_v13 = vrot.slane %v2817_v6, 2  ;;  %v2781_v23 = vrot.slane %v2746_v45, 1  ;;  %v2782_v51 = vrot.slane %v2747_v15, 1 }
 0x987   : > { %v2723_v24 = vmul.f32 %v5937_v10, %v6074_v50  ;;  %v2822_v43 = vmul.f32 %v5946_v52, %v6074_v50  ;;  %v2823_v12 = vmul.f32 %v5946_v52, %v6077_v40  ;;  %v2634_v57 = vadd.f32 %v2608_v56, %v2558_v61  ;;  %v6125_v62 = vpop.xlane.xlu0 %830 }
 0x988   : > { %v2774_v16 = vsel %vm2426_vm4, %v2772_v38, %v2773_v14  ;;  %v2684_v46 = vsel %vm2503_vm5, %v2682_v18, %v2683_v58  ;;  %v2404_v19 = vmul.f32 %v5890_v25, %v6074_v50  ;;  %v2405_v26 = vmul.f32 %v5890_v25, %v6077_v40 }
 0x989   : > { %v2805_v49 = vadd.f32 %v2777_v35, %v2729_v59  ;;  %v2853_v42 = vsel %vm2503_vm5, %v2851_v1, %v2852_v28  ;;  %v2804_v36 = vadd.f32 %v2774_v16, %v2728_v27  ;;  %v2731_v32 = vadd.f32 %v2723_v24, %v2711_v17  ;;  %v6139_v24 = vpop.permute.xlu1 %2249 }
 0x98a   : > { %v2850_v55 = vsel %vm2503_vm5, %v2848_v20, %v2849_v13  ;;  %v2783_v5 = vsel %vm2426_vm4, %v2781_v23, %v2782_v51  ;;  %v2744_v6 = vmul.f32 %v5914_v0, %v6022_v37  ;;  %v2745_v45 = vmul.f32 %v5914_v0, %v6025_v29 }
 0x98b   : > { %v2857_v15 = vrot.slane %v2822_v43, 2  ;;  %v2858_v35 = vrot.slane %v2823_v12, 2  ;;  %v2710_v54 = vadd.f32 %v2684_v46, %v2634_v57  ;;  %v2337_v7 = vrot.slane %v5317_v34, 7  ;;  %v6145_v46 = vpop.permute.xlu0 %2217 }
 0x98c   : > { %v2442_v1 = vrot.slane %v2404_v19, 1  ;;  %v2443_v38 = vrot.slane %v2405_v26, 1  ;;  %v2481_v14 = vmul.f32 %v5895_v21, %v6074_v50  ;;  %v2482_v61 = vmul.f32 %v5895_v21, %v6077_v40  ;;  %v6150_v19 = vld [vmem:[%s6598_s4] ss:$0 sm:$0xff] }
 0x98d   : > { %v2881_v56 = vadd.f32 %v2853_v42, %v2805_v49  ;;  %v2880_v18 = vadd.f32 %v2850_v55, %v2804_v36  ;;  %v2807_v58 = vadd.f32 %v2783_v5, %v2731_v32  ;;  %v2722_v59 = vmul.f32 %v5937_v10, %v6022_v37  ;;  %v6658_v36 = vld [vmem:[#allocation18_spill] sm:$0xff] }
 0x98e   : > { %v2778_v28 = vrot.slane %v2744_v6, 1  ;;  %v2779_v27 = vrot.slane %v2745_v45, 1  ;;  %v2820_v34 = vmul.f32 %v5946_v52, %v6022_v37  ;;  %v2821_v17 = vmul.f32 %v5946_v52, %v6025_v29  ;;  %v6651_v6 = vld [vmem:[#allocation19_spill] sm:$0xff] }
 0x98f   : > { %v2859_v20 = vsel %vm2503_vm5, %v2857_v15, %v2858_v35  ;;  %v2730_v13 = vadd.f32 %v2722_v59, %v2710_v54  ;;  %v6135_v23 = vsel %vm2349_vm3, 0.0, %v2337_v7  ;;  %v2379_v51 = vmul.f32 %v5905_v11, %v6074_v50 }
 0x990   : > { %v6142_v43 = vsel %vm2349_vm3, %v2337_v7, 0.0  ;;  %v2444_v12 = vsel %vm2426_vm4, %v2442_v1, %v2443_v38  ;;  %v2519_v57 = vrot.slane %v2481_v14, 2  ;;  %v2520_v16 = vrot.slane %v2482_v61, 2 }
 0x991   : > { %v2883_v26 = vadd.f32 %v2859_v20, %v2807_v58  ;;  %v2578_v49 = vmul.f32 %v5921_v22, %v6135_v23  ;;  %v2579_v42 = vmul.f32 %v5921_v22, %v6142_v43  ;;  %v2780_v32 = vsel %vm2426_vm4, %v2778_v28, %v2779_v27  ;;  %v6181_v27 = vpop.permute.xlu1 %2221 }
 0x992   : > { %v2854_v55 = vrot.slane %v2820_v34, 2  ;;  %v2855_v5 = vrot.slane %v2821_v17, 2  ;;  %v2338_v45 = vrot.slane %v6651_v6, 7  ;;  %v6160_v15 = vadd.f32 %v6150_v19, %v2881_v56  ;;  %6655 = vst [vmem:[#allocation32_spill] sm:$0xff] %v6181_v27 }
 0x993   : > { %v2806_v35 = vadd.f32 %v2780_v32, %v2730_v13  ;;  %v2464_v54 = vadd.f32 %v2444_v12, %v2379_v51  ;;  %v6164_v7 = vmul.f32 %v5923_v9, %v6135_v23  ;;  %v6167_v1 = vadd.f32 %v6150_v19, %v2880_v18  ;;  %v6192_v13 = vpop.permute.xlu0 %2219 }
 0x994   : > { %6652 = vst [vmem:[#allocation19_spill] sm:$0xff] %v6160_v15  ;;  %v2521_v38 = vsel %vm2503_vm5, %v2519_v57, %v2520_v16  ;;  %v2402_v14 = vmul.f32 %v5890_v25, %v6022_v37  ;;  %v2403_v61 = vmul.f32 %v5890_v25, %v6025_v29  ;;  %v6175_v56 = vadd.f32 %v6150_v19, %v2883_v26 }
 0x995   : > { %6653 = vst [vmem:[#allocation30_spill] sm:$0xff] %v6167_v1  ;;  %v2615_v58 = vrot.slane %v2578_v49, 1  ;;  %v2616_v59 = vrot.slane %v2579_v42, 1  ;;  %v6179_v28 = vmul.f32 %v5923_v9, %v6142_v43  ;;  %v2856_v18 = vsel %vm2503_vm5, %v2854_v55, %v2855_v5  ;;  %6656 = vst [vmem:[#allocation33_spill] sm:$0xff] %v6192_v13 }
 0x996   : > { %6654 = vst [vmem:[#allocation31_spill] sm:$0xff] %v6175_v56  ;;  %v6185_v34 = vsel %vm2349_vm3, 0.0, %v2338_v45  ;;  %v6188_v17 = vsel %vm2349_vm3, %v2338_v45, 0.0  ;;  %v2553_v20 = vmul.f32 %v5932_v8, %v6135_v23  ;;  %v6194_v51 = vadd.f32 %v2856_v18, %v2806_v35 }
 0x997   : > { %v2541_v12 = vadd.f32 %v2521_v38, %v2464_v54  ;;  %v2691_v57 = vrot.slane %v6164_v7, 2  ;;  %v6199_v16 = vmul.f32 %v5937_v10, %v6185_v34  ;;  %v2439_v26 = vrot.slane %v2402_v14, 1 }
 0x998   : > { %v2440_v49 = vrot.slane %v2403_v61, 1  ;;  %v2479_v42 = vmul.f32 %v5895_v21, %v6022_v37  ;;  %v2480_v32 = vmul.f32 %v5895_v21, %v6025_v29  ;;  %v2617_v55 = vsel %vm2426_vm4, %v2615_v58, %v2616_v59  ;;  %v6233_v59 = vpop.permute.xlu1 %2253 }
 0x999   : > { %v2692_v5 = vrot.slane %v6179_v28, 2  ;;  %v2408_v6 = vmul.f32 %v5890_v25, %v6185_v34  ;;  %v2409_v45 = vmul.f32 %v5890_v25, %v6188_v17  ;;  %v6213_v35 = vmul.f32 %v5914_v0, %v6185_v34  ;;  %6657 = vst [vmem:[#allocation34_spill] sm:$0xff] %v6233_v59 }
 0x99a   : > { %v6217_v54 = vmul.f32 %v5914_v0, %v6188_v17  ;;  %v2406_v29 = vmul.f32 %v5890_v25, %v6135_v23  ;;  %v2407_v7 = vmul.f32 %v5890_v25, %v6142_v43  ;;  %v2561_v38 = vadd.f32 %v2553_v20, %v2541_v12  ;;  %v6237_v20 = vpop.permute.xlu0 %2251 }
 0x99b   : > { %v6225_v14 = vmul.f32 %v5946_v52, %v6185_v34  ;;  %v6229_v61 = vmul.f32 %v5946_v52, %v6188_v17  ;;  %v2378_v58 = vmul.f32 %v5905_v11, %v6022_v37  ;;  %v2441_v28 = vsel %vm2426_vm4, %v2439_v26, %v2440_v49  ;;  %6659 = vst [vmem:[#allocation18_spill] sm:$0xff] %v6237_v20 }
 0x99c   : > { %v2516_v18 = vrot.slane %v2479_v42, 2  ;;  %v2517_v47 = vrot.slane %v2480_v32, 2  ;;  %v2339_v25 = vrot.slane %v6658_v36, 7  ;;  %v2448_v12 = vrot.slane %v2408_v6, 1  ;;  %v6264_v15 = vpop.permute.xlu1 %2225 }
 0x99d   : > { %v2449_v56 = vrot.slane %v2409_v45, 1  ;;  %v2485_v31 = vmul.f32 %v5895_v21, %v6185_v34  ;;  %v2486_v63 = vmul.f32 %v5895_v21, %v6188_v17  ;;  %v2445_v53 = vrot.slane %v2406_v29, 1 }
 0x99e   : > { %v2446_v37 = vrot.slane %v2407_v7, 1  ;;  %v2483_v3 = vmul.f32 %v5895_v21, %v6135_v23  ;;  %v2484_v26 = vmul.f32 %v5895_v21, %v6142_v43  ;;  %v2463_v49 = vadd.f32 %v2441_v28, %v2378_v58  ;;  %v6270_v4 = vpop.permute.xlu0 %2223 }
 0x99f   : > { %v2552_v36 = vmul.f32 %v5932_v8, %v6074_v50  ;;  %v2576_v42 = vmul.f32 %v5921_v22, %v6074_v50  ;;  %v2577_v32 = vmul.f32 %v5921_v22, %v6077_v40  ;;  %v2518_v6 = vsel %vm2503_vm5, %v2516_v18, %v2517_v47 }
 0x9a0   : > { %v2652_v45 = vmul.f32 %v5923_v9, %v6074_v50  ;;  %v6257_v29 = vsel %vm2349_vm3, 0.0, %v2339_v25  ;;  %v2381_v21 = vmul.f32 %v5905_v11, %v6185_v34  ;;  %v2450_v7 = vsel %vm2426_vm4, %v2448_v12, %v2449_v56 }
 0x9a1   : > { %v2525_v58 = vrot.slane %v2485_v31, 2  ;;  %v2526_v28 = vrot.slane %v2486_v63, 2  ;;  %v2380_v20 = vmul.f32 %v5905_v11, %v6135_v23  ;;  %v6267_v47 = vsel %vm2349_vm3, %v2339_v25, 0.0 }
 0x9a2   : > { %v2447_v50 = vsel %vm2426_vm4, %v2445_v53, %v2446_v37  ;;  %v2522_v18 = vrot.slane %v2483_v3, 2  ;;  %v2523_v59 = vrot.slane %v2484_v26, 2  ;;  %v2540_v13 = vadd.f32 %v2518_v6, %v2463_v49  ;;  %v6294_v6 = vpop.permute.xlu0 %2255 }
 0x9a3   : > { %v2612_v1 = vrot.slane %v2576_v42, 1  ;;  %v2613_v27 = vrot.slane %v2577_v32, 1  ;;  %v2653_v31 = vmul.f32 %v5923_v9, %v6077_v40  ;;  %v2693_v63 = vsel %vm2503_vm5, %v2691_v57, %v2692_v5 }
 0x9a4   : > { %v2787_v11 = vrot.slane %v6213_v35, 1  ;;  %v2466_v56 = vadd.f32 %v2450_v7, %v2381_v21  ;;  %v2582_v25 = vmul.f32 %v5921_v22, %v6257_v29  ;;  %v2637_v12 = vadd.f32 %v2617_v55, %v2561_v38  ;;  %v6290_v38 = vpop.permute.xlu1 %2257 }
 0x9a5   : > { %v2527_v53 = vsel %vm2503_vm5, %v2525_v58, %v2526_v28  ;;  %v2583_v3 = vmul.f32 %v5921_v22, %v6267_v47  ;;  %v2465_v37 = vadd.f32 %v2447_v50, %v2380_v20  ;;  %v2688_v26 = vrot.slane %v2652_v45, 2 }
 0x9a6   : > { %v2524_v49 = vsel %vm2503_vm5, %v2522_v18, %v2523_v59  ;;  %v2580_v40 = vmul.f32 %v5921_v22, %v6185_v34  ;;  %v2581_v57 = vmul.f32 %v5921_v22, %v6188_v17  ;;  %v2560_v5 = vadd.f32 %v2552_v36, %v2540_v13 }
 0x9a7   : > { %v2614_v35 = vsel %vm2426_vm4, %v2612_v1, %v2613_v27  ;;  %v2689_v42 = vrot.slane %v2653_v31, 2  ;;  %v2555_v55 = vmul.f32 %v5932_v8, %v6257_v29  ;;  %4803 = vrcp.f32 %v6046_v30 }
 0x9a8   : > { %v2543_v20 = vadd.f32 %v2527_v53, %v2466_v56  ;;  %v2621_v32 = vrot.slane %v2582_v25, 1  ;;  %v2658_v59 = vmul.f32 %v5923_v9, %v6257_v29  ;;  %v2622_v45 = vrot.slane %v2583_v3, 1 }
 0x9a9   : > { %v2659_v22 = vmul.f32 %v5923_v9, %v6267_v47  ;;  %v2542_v1 = vadd.f32 %v2524_v49, %v2465_v37  ;;  %v2554_v27 = vmul.f32 %v5932_v8, %v6185_v34  ;;  %v2618_v13 = vrot.slane %v2580_v40, 1 }
 0x9aa   : > { %v2619_v36 = vrot.slane %v2581_v57, 1  ;;  %v2656_v30 = vmul.f32 %v5923_v9, %v6185_v34  ;;  %v2657_v21 = vmul.f32 %v5923_v9, %v6188_v17  ;;  %v2788_v7 = vrot.slane %v6217_v54, 1  ;;  %v6312_v17 = vpop.permute.xlu1 %2229 }
 0x9ab   : > { %v2636_v58 = vadd.f32 %v2614_v35, %v2560_v5  ;;  %v2748_v28 = vmul.f32 %v5914_v0, %v6135_v23  ;;  %v2749_v50 = vmul.f32 %v5914_v0, %v6142_v43  ;;  %4805 = vrcp.f32 %v6071_v41  ;;  %v6319_v41 = vpop.permute.xlu0 %2227 }
 0x9ac   : > { %v2713_v8 = vadd.f32 %v2693_v63, %v2637_v12  ;;  %v2690_v18 = vsel %vm2503_vm5, %v2688_v26, %v2689_v42  ;;  %v2563_v31 = vadd.f32 %v2555_v55, %v2543_v20  ;;  %v2623_v34 = vsel %vm2426_vm4, %v2621_v32, %v2622_v45 }
 0x9ad   : > { %v2697_v56 = vrot.slane %v2658_v59, 2  ;;  %v2698_v25 = vrot.slane %v2659_v22, 2  ;;  %v2562_v9 = vadd.f32 %v2554_v27, %v2542_v1  ;;  %v6316_v54 = vadd.f32 %v6150_v19, %v6194_v51  ;;  %v6660_v27 = vld [vmem:[#allocation20_spill] sm:$0xff] }
 0x9ae   : > { %v2620_v53 = vsel %vm2426_vm4, %v2618_v13, %v2619_v36  ;;  %v2694_v3 = vrot.slane %v2656_v30, 2  ;;  %v2695_v37 = vrot.slane %v2657_v21, 2  ;;  %v2712_v63 = vadd.f32 %v2690_v18, %v2636_v58  ;;  %v6661_v18 = vld [vmem:[#allocation21_spill] sm:$0xff] }
 0x9af   : > { %v2724_v12 = vmul.f32 %v5937_v10, %v6135_v23  ;;  %v2784_v26 = vrot.slane %v2748_v28, 1  ;;  %v2785_v49 = vrot.slane %v2749_v50, 1  ;;  %4807 = vrcp.f32 %v6095_v2 }
 0x9b0   : > { %v2863_v40 = vrot.slane %v6225_v14, 2  ;;  %v2864_v57 = vrot.slane %v6229_v61, 2  ;;  %v2639_v51 = vadd.f32 %v2623_v34, %v2563_v31  ;;  %v2733_v5 = vadd.f32 %v6199_v16, %v2713_v8 }
 0x9b1   : > { %v2789_v35 = vsel %vm2426_vm4, %v2787_v11, %v2788_v7  ;;  %v2699_v42 = vsel %vm2503_vm5, %v2697_v56, %v2698_v25  ;;  %v2638_v55 = vadd.f32 %v2620_v53, %v2562_v9  ;;  %v4804_v20 = vpop.eup %4803  ;;  %v2824_v32 = vmul.f32 %v5946_v52, %v6135_v23  ;;  %v6342_v23 = vpop.permute.xlu1 %2261  ;;  %v6662_v53 = vld [vmem:[#allocation32_spill] sm:$0xff] }
 0x9b2   : > { %v2696_v59 = vsel %vm2503_vm5, %v2694_v3, %v2695_v37  ;;  %v2752_v2 = vmul.f32 %v5914_v0, %v6257_v29  ;;  %v2753_v14 = vmul.f32 %v5914_v0, %v6267_v47  ;;  %v2732_v61 = vadd.f32 %v2724_v12, %v2712_v63  ;;  %v6664_v12 = vld [vmem:[#allocation33_spill] sm:$0xff] }
 0x9b3   : > { %v2786_v16 = vsel %vm2426_vm4, %v2784_v26, %v2785_v49  ;;  %v2825_v11 = vmul.f32 %v5946_v52, %v6142_v43  ;;  %v2726_v45 = vmul.f32 %v5937_v10, %v6257_v29  ;;  %4809 = vrcp.f32 %v6125_v62  ;;  %v6350_v43 = vpop.permute.xlu0 %2259  ;;  %v6665_v26 = vld [vmem:[#allocation25_spill] sm:$0xff] }
 0x9b4   : > { %v2715_v22 = vadd.f32 %v2699_v42, %v2639_v51  ;;  %v2828_v1 = vmul.f32 %v5946_v52, %v6257_v29  ;;  %v2829_v0 = vmul.f32 %v5946_v52, %v6267_v47  ;;  %4811 = vrcp.f32 %v6065_v39  ;;  %v6666_v51 = vld [vmem:[#allocation34_spill] sm:$0xff] }
 0x9b5   : > { %v970_v13 = vmul.f32 %v4804_v20, %v6660_v27  ;;  %v2714_v36 = vadd.f32 %v2696_v59, %v2638_v55  ;;  %v4806_v10 = vpop.eup %4805  ;;  %v2790_v62 = vrot.slane %v2752_v2, 1  ;;  %v2791_v30 = vrot.slane %v2753_v14, 1  ;;  %v6669_v2 = vld [vmem:[#allocation22_spill] sm:$0xff] }
 0x9b6   : > { %v2809_v29 = vadd.f32 %v2789_v35, %v2733_v5  ;;  %v2860_v7 = vrot.slane %v2824_v32, 2  ;;  %v2861_v58 = vrot.slane %v2825_v11, 2  ;;  %v2304_v52 = vsel %vm2303_vm6, %v5873_v60, %v6089_v44  ;;  %v6667_v35 = vld [vmem:[#allocation19_spill] sm:$0xff]  ;;  %v6668_v32 = vld [vmem:[#allocation18_spill] sm:$0xff] }
 0x9b7   : > { %v2305_v21 = vsel %vm2303_vm6, %v970_v13, %v6145_v46  ;;  %v2808_v28 = vadd.f32 %v2786_v16, %v2732_v61  ;;  %v2735_v50 = vadd.f32 %v5967_v48, %v2715_v22  ;;  %v2313_v8 = vsel %vm2312_vm7, %v2304_v52, %v6112_v33  ;;  %v6663_v48 = vld [vmem:[#allocation30_spill] sm:$0xff]  ;;  %v6670_v22 = vld [vmem:[#allocation29_spill] sm:$0xff] }
 0x9b8   : > { %v2314_v39 = vsel %vm2312_vm7, %v2305_v21, %v6139_v24  ;;  %v972_v31 = vmul.f32 %v4806_v10, %v6661_v18  ;;  %v2734_v56 = vadd.f32 %v2726_v45, %v2714_v36  ;;  %v2792_v60 = vsel %vm2426_vm4, %v2790_v62, %v2791_v30  ;;  %v6671_v10 = vld [vmem:[#allocation28_spill] sm:$0xff]  ;;  %v6673_v30 = vld [vmem:[#allocation27_spill] sm:$0xff] }
 0x9b9   : > { %v4808_v25 = vpop.eup %4807  ;;  %v2866_v44 = vrot.slane %v2828_v1, 2  ;;  %v2867_v24 = vrot.slane %v2829_v0, 2  ;;  %v2865_v33 = vsel %vm2503_vm5, %v2863_v40, %v2864_v57  ;;  %v2862_v63 = vsel %vm2503_vm5, %v2860_v7, %v2861_v58  ;;  %v6675_v58 = vld [vmem:[#allocation26_spill] sm:$0xff] }
 0x9ba   : > { %v2307_v3 = vsel %vm2303_vm6, %v972_v31, %v6662_v53  ;;  %v2306_v49 = vsel %vm2303_vm6, %v6665_v26, %v6664_v12  ;;  %v2884_v20 = vadd.f32 %v2862_v63, %v2808_v28  ;;  %v974_v14 = vmul.f32 %v4808_v25, %v6669_v2  ;;  %v3070_v12 = vld [vmem:[#allocation7 + $0x38] sm:$0xff] }
 0x9bb   : > { %v2316_v5 = vsel %vm2312_vm7, %v2307_v3, %v6666_v51  ;;  %v2315_v59 = vsel %vm2312_vm7, %v2306_v49, %v6668_v32  ;;  %v2810_v61 = vadd.f32 %v2792_v60, %v2734_v56  ;;  %v2885_v45 = vadd.f32 %v2865_v33, %v2809_v29  ;;  %v4846_v32 = vld [vmem:[%s5250_s24 + $0x8] sm:$0xff] }
 0x9bc   : > { %v2811_v1 = vadd.f32 %v6670_v22, %v2735_v50  ;;  %v2868_v0 = vsel %vm2503_vm5, %v2866_v44, %v2867_v24  ;;  %v2309_v13 = vsel %vm2303_vm6, %v974_v14, %v6264_v15  ;;  %v6672_v62 = vrot.slane %v6671_v10, 2  ;;  %v6677_v50 = vld [vmem:[#allocation23_spill] sm:$0xff]  ;;  %v4850_v10 = vld [vmem:[%s5250_s24 + $0x28] sm:$0xff] }
 0x9bd   : > { %v4810_v16 = vpop.eup %4809  ;;  %v6674_v21 = vrot.slane %v6673_v30, 2  ;;  %v2308_v29 = vsel %vm2303_vm6, %v6675_v58, %v6270_v4  ;;  %v2318_v52 = vsel %vm2312_vm7, %v2309_v13, %v6290_v38  ;;  %v2899_v15 = vadd.f32 %v6150_v19, %v2884_v20  ;;  %v6678_v4 = vld [vmem:[#allocation24_spill] sm:$0xff]  ;;  %v4851_v58 = vld [vmem:[%s5250_s24 + $0x30] sm:$0xff] }
 0x9be   : > { %v4812_v27 = vpop.eup %4811  ;;  %v2900_v38 = vadd.f32 %v6150_v19, %v2885_v45 }
 0x9bf   : > { %v2871_v7 = vsel %vm2503_vm5, %v6674_v21, %v6672_v62 }
 0x9c0   : > { %v2887_v25 = vadd.f32 %v2871_v7, %v2811_v1 }
 0x9d2   : > { %v2282_v47 = vpop.permute.xlu1 %2281 }
 0x9d3   : > { %v2323_v46 = vsel %vm2321_vm8, %v2314_v39, %v2282_v47  ;;  %v2280_v34 = vpop.permute.xlu0 %2279  ;;  %v6676_v39 = vld [vmem:[#allocation31_spill] sm:$0xff] }
 0x9d4   : > { %v2322_v9 = vsel %vm2321_vm8, %v2313_v8, %v2280_v34  ;;  %v2904_v42 = vadd.f32 %v6667_v35, %v2323_v46  ;;  %v976_v8 = vmul.f32 %v4810_v16, %v6677_v50  ;;  %v2886_v46 = vadd.f32 %v2868_v0, %v2810_v61  ;;  %v3266_v50 = vld [vmem:[%s6603_s9 + $0x18] sm:$0xff] }
 0x9d5   : > { %v2903_v37 = vadd.f32 %v6663_v48, %v2322_v9  ;;  %v975_v34 = vmul.f32 %v4812_v27, %v6678_v4  ;;  %v4849_v27 = vld [vmem:[%s5250_s24 + $0x20] sm:$0xff]  ;;  %v3269_v4 = vld [vmem:[%s6603_s9 + $0x30] sm:$0xff] }
 0x9d6   : > { %v2286_v55 = vpop.permute.xlu1 %2285 }
 0x9d7   : > { %v2325_v40 = vsel %vm2321_vm8, %v2316_v5, %v2286_v55  ;;  %4136 = vmatprep.mubr.msk.f32.mxu1 %vm452_vm0, %v2903_v37  ;;  %v2284_v57 = vpop.permute.xlu0 %2283  ;;  %v2310_v60 = vsel %vm2303_vm6, %v975_v34, %v6319_v41  ;;  %v2901_v37 = vadd.f32 %v6150_v19, %v2886_v46  ;;  %v3270_v34 = vld [vmem:[%s6603_s9 + $0x38] sm:$0xff] }
 0x9d8   : > { %v2324_v11 = vsel %vm2321_vm8, %v2315_v59, %v2284_v57  ;;  %4137 = vmatmul.mubr.msk.f32.vlgmr.msra.gmra.mrb[32].mxu1 %vm452_vm0, %v2904_v42  ;;  %v2906_v47 = vadd.f32 %v6676_v39, %v2325_v40  ;;  %v2319_v3 = vsel %vm2312_vm7, %v2310_v60, %v6350_v43  ;;  %v3069_v43 = vld [vmem:[#allocation7 + $0x30] sm:$0xff]  ;;  %v4847_v57 = vld [vmem:[%s5250_s24 + $0x10] sm:$0xff]  ;;  %v3274_v60 = vld [vmem:[%s6603_s9 + $0x58] sm:$0xff] }
 0x9d9   : > { %v2905_v36 = vadd.f32 %v6316_v54, %v2324_v11  ;;  %v2317_v54 = vsel %vm2312_vm7, %v2308_v29, %v6294_v6  ;;  %v2311_v6 = vsel %vm2303_vm6, %v976_v8, %v6312_v17  ;;  %v2902_v17 = vadd.f32 %v6150_v19, %v2887_v25  ;;  %v3634_v19 = vld [vmem:[%s6600_s6] ss:$0 sm:$0xff]  ;;  %v4848_v11 = vld [vmem:[%s5250_s24 + $0x18] sm:$0xff]  ;;  %v3272_v25 = vld [vmem:[%s6603_s9 + $0x48] sm:$0xff] }
 0x9da   : > { %v2290_v28 = vpop.permute.xlu1 %2289  ;;  %v2320_v44 = vsel %vm2312_vm7, %v2311_v6, %v6342_v23  ;;  %v4424_v26 = vpack.c.bf16 %v3070_v12, %v3069_v43  ;;  %v4845_v42 = vld [vmem:[%s5250_s24] sm:$0xff] }
 0x9db   : > { %v2327_v18 = vsel %vm2321_vm8, %v2318_v52, %v2290_v28  ;;  %4139 = vmatprep.mubr.msk.f32.mxu1 %vm452_vm0, %v2905_v36  ;;  %v2288_v31 = vpop.permute.xlu0 %2287  ;;  %v4852_v52 = vld [vmem:[%s5250_s24 + $0x38] sm:$0xff]  ;;  %v3264_v28 = vld [vmem:[%s6603_s9 + $0x8] sm:$0xff] }
 0x9dc   : > { %v2326_v56 = vsel %vm2321_vm8, %v2317_v54, %v2288_v31  ;;  %4140 = vmatmul.mubr.msk.f32.gmra.mrb[34].mxu1 %vm452_vm0, %v2906_v47  ;;  %v2908_v24 = vadd.f32 %v2900_v38, %v2327_v18  ;;  %4425 = vmatprep.subr.bf16.mxu0 %v4424_v26  ;;  %v3263_v47 = vld [vmem:[%s6603_s9] sm:$0xff]  ;;  %v3265_v54 = vld [vmem:[%s6603_s9 + $0x10] sm:$0xff]  ;;  %v3268_v31 = vld [vmem:[%s6603_s9 + $0x28] sm:$0xff] }
 0x9dd   : > { %v2907_v9 = vadd.f32 %v2899_v15, %v2326_v56  ;;  %4427 = vmatpush3.bf16.msra.mxu0 %v4424_v26  ;;  %v4428_v15 = vpack.c.bf16 %v3264_v28, %v3263_v47  ;;  %v4432_v8 = vpack.c.bf16 %v3266_v50, %v3265_v54  ;;  %v3267_v18 = vld [vmem:[%s6603_s9 + $0x20] sm:$0xff]  ;;  %v4440_v56 = vpack.c.bf16 %v3270_v34, %v3269_v4 }
 0x9de   : > { %v2294_v53 = vpop.permute.xlu1 %2293  ;;  %v4436_v46 = vpack.c.bf16 %v3268_v31, %v3267_v18  ;;  %v3271_v38 = vld [vmem:[%s6603_s9 + $0x40] sm:$0xff] }
 0x9df   : > { %v2329_v48 = vsel %vm2321_vm8, %v2320_v44, %v2294_v53  ;;  %4142 = vmatprep.mubr.msk.f32.mxu1 %vm452_vm0, %v2907_v9  ;;  %v2292_v33 = vpop.permute.xlu0 %2291  ;;  %4429 = vmatprep.subr.bf16.mxu1 %v4428_v15  ;;  %v4444_v6 = vpack.c.bf16 %v3272_v25, %v3271_v38  ;;  %v3273_v9 = vld [vmem:[%s6603_s9 + $0x50] sm:$0xff]  ;;  %v3276_v53 = vld [vmem:[%s6603_s9 + $0x68] sm:$0xff] }
 0x9e0   : > { %v2328_v63 = vsel %vm2321_vm8, %v2319_v3, %v2292_v33  ;;  %4143 = vmatmul.mubr.msk.f32.gmra.mrb[36].mxu1 %vm452_vm0, %v2908_v24  ;;  %v2910_v23 = vadd.f32 %v2902_v17, %v2329_v48  ;;  %v4448_v44 = vpack.c.bf16 %v3274_v60, %v3273_v9  ;;  %v3275_v24 = vld [vmem:[%s6603_s9 + $0x60] sm:$0xff]  ;;  %v3277_v48 = vld [vmem:[%s6603_s9 + $0x70] sm:$0xff] }
 0x9e1   : > { %v2909_v41 = vadd.f32 %v2901_v37, %v2328_v63  ;;  %4431 = vmatpush3.bf16.msra.mxu1 %v4428_v15  ;;  %v4452_v3 = vpack.c.bf16 %v3276_v53, %v3275_v24  ;;  %v3278_v37 = vld [vmem:[%s6603_s9 + $0x78] sm:$0xff]  ;;  %v3643_v17 = vld [vmem:[%s6602_s8] ss:$0 sm:$0xff] }
 0x9e2   : > { %4433 = vmatprep.subr.bf16.mxu1 %v4432_v8  ;;  %v4456_v33 = vpack.c.bf16 %v3278_v37, %v3277_v48 }
 0x9e3   : > { %4145 = vmatprep.mubr.msk.f32.mxu1 %vm452_vm0, %v2909_v41 }
 0x9e4   : > { %4146 = vmatmul.mubr.msk.f32.gmra.mrb[38].mxu1 %vm452_vm0, %v2910_v23 }
 0x9e5   : > { %4435 = vmatpush3.bf16.msra.mxu1 %v4432_v8 }
 0x9e6   : > { %4437 = vmatprep.subr.bf16.mxu1 %v4436_v46 }
 0x9e9   : > { %4439 = vmatpush3.bf16.msra.mxu1 %v4436_v46 }
 0x9ea   : > { %4441 = vmatprep.subr.bf16.mxu1 %v4440_v56 }
 0x9ed   : > { %4443 = vmatpush3.bf16.msra.mxu1 %v4440_v56 }
 0x9ee   : > { %4445 = vmatprep.subr.bf16.mxu1 %v4444_v6 }
 0x9f1   : > { %4447 = vmatpush3.bf16.msra.mxu1 %v4444_v6 }
 0x9f2   : > { %4449 = vmatprep.subr.bf16.mxu1 %v4448_v44 }
 0x9f5   : > { %4451 = vmatpush3.bf16.msra.mxu1 %v4448_v44 }
 0x9f6   : > { %4453 = vmatprep.subr.bf16.mxu1 %v4452_v3 }
 0x9f9   : > { %4455 = vmatpush3.bf16.msra.mxu1 %v4452_v3 }
 0x9fa   : > { %4457 = vmatprep.subr.bf16.mxu1 %v4456_v33 }
 0x9fd   : > { %4459 = vmatpush3.bf16.msra.mxu1 %v4456_v33 }
 0xaab   : > { %v4138_v49 = vpop.f32.mrb[32].mxu1 }
 0xaac   : > { %v3022_v51 = vadd.f32 %v4138_v49, %v3634_v19  ;;  %v3016_v5 = vpop.f32.mrb[33].mxu1 }
 0xaad   : > { %v3017_v35 = vadd.f32 %v3634_v19, %v3016_v5 }
 0xaae   : > { %v6433_v59 = vadd.f32 %v4846_v32, %v3022_v51 }
 0xaaf   : > { %v6430_v55 = vadd.f32 %v4845_v42, %v3017_v35  ;;  %v4141_v20 = vpop.f32.mrb[34].mxu1 }
 0xab0   : > { %v3032_v2 = vadd.f32 %v4141_v20, %v3634_v19  ;;  %v3026_v14 = vpop.f32.mrb[35].mxu1 }
 0xab1   : > { %v3027_v40 = vadd.f32 %v3634_v19, %v3026_v14  ;;  %4164 = vmatprep.mubr.msk.f32.mxu0 %vm452_vm0, %v6430_v55 }
 0xab2   : > { %4165 = vmatmul.mubr.msk.f32.vlgmr.msra.gmra.mrb[40].mxu0 %vm452_vm0, %v6433_v59  ;;  %v6443_v45 = vadd.f32 %v4848_v11, %v3032_v2 }
 0xab3   : > { %v6440_v61 = vadd.f32 %v4847_v57, %v3027_v40  ;;  %v4144_v16 = vpop.f32.mrb[36].mxu1 }
 0xab4   : > { %v3042_v22 = vadd.f32 %v4144_v16, %v3634_v19  ;;  %v3036_v1 = vpop.f32.mrb[37].mxu1 }
 0xab5   : > { %v3037_v0 = vadd.f32 %v3634_v19, %v3036_v1  ;;  %4167 = vmatprep.mubr.msk.f32.mxu0 %vm452_vm0, %v6440_v61 }
 0xab6   : > { %4168 = vmatmul.mubr.msk.f32.gmra.mrb[42].mxu0 %vm452_vm0, %v6443_v45  ;;  %v6453_v62 = vadd.f32 %v4850_v10, %v3042_v22 }
 0xab7   : > { %v6450_v13 = vadd.f32 %v4849_v27, %v3037_v0  ;;  %v4147_v36 = vpop.f32.mrb[38].mxu1 }
 0xab8   : > { %v3052_v30 = vadd.f32 %v4147_v36, %v3634_v19  ;;  %v3046_v21 = vpop.f32.mrb[39].mxu1 }
 0xab9   : > { %v3047_v7 = vadd.f32 %v3634_v19, %v3046_v21  ;;  %4170 = vmatprep.mubr.msk.f32.mxu0 %vm452_vm0, %v6450_v13 }
 0xaba   : > { %4171 = vmatmul.mubr.msk.f32.gmra.mrb[44].mxu0 %vm452_vm0, %v6453_v62  ;;  %v6463_v39 = vadd.f32 %v4852_v52, %v3052_v30 }
 0xabb   : > { %v6460_v29 = vadd.f32 %v4851_v58, %v3047_v7 }
 0xabd   : > { %4173 = vmatprep.mubr.msk.f32.mxu0 %vm452_vm0, %v6460_v29 }
 0xabe   : > { %4174 = vmatmul.mubr.msk.f32.gmra.mrb[46].mxu0 %vm452_vm0, %v6463_v39 }
 0xb85   : > { %v4166_v63 = vpop.f32.mrb[40].mxu0 }
 0xb86   : > { %v3174_v41 = vadd.f32 %v4166_v63, %v3643_v17  ;;  %v3168_v23 = vpop.f32.mrb[41].mxu0  ;;  %v3660_v63 = vld [vmem:[%s6604_s10] ss:$0 sm:$0xff] }
 0xb87   : > { %v3169_v43 = vadd.f32 %v3643_v17, %v3168_v23 }
 0xb88   : > { %v3653_v12 = vmul.f32 -1.442695, %v3174_v41 }
 0xb89   : > { %v3652_v26 = vmul.f32 -1.442695, %v3169_v43  ;;  %v4169_v19 = vpop.f32.mrb[42].mxu0 }
 0xb8a   : > { %4813 = vpow2.f32 %v3653_v12  ;;  %v3184_v49 = vadd.f32 %v4169_v19, %v3643_v17  ;;  %v3178_v51 = vpop.f32.mrb[43].mxu0 }
 0xb8b   : > { %4815 = vpow2.f32 %v3652_v26  ;;  %v3179_v5 = vadd.f32 %v3643_v17, %v3178_v51 }
 0xb8c   : > { %v3655_v35 = vmul.f32 -1.442695, %v3184_v49 }
 0xb8d   : > { %v3654_v42 = vmul.f32 -1.442695, %v3179_v5  ;;  %v4172_v20 = vpop.f32.mrb[44].mxu0 }
 0xb8e   : > { %4817 = vpow2.f32 %v3655_v35  ;;  %v3194_v32 = vadd.f32 %v4172_v20, %v3643_v17  ;;  %v3188_v2 = vpop.f32.mrb[45].mxu0 }
 0xb8f   : > { %4819 = vpow2.f32 %v3654_v42  ;;  %v3189_v14 = vadd.f32 %v3643_v17, %v3188_v2 }
 0xb90   : > { %v3657_v40 = vmul.f32 -1.442695, %v3194_v32 }
 0xb91   : > { %v3656_v57 = vmul.f32 -1.442695, %v3189_v14  ;;  %v4175_v16 = vpop.f32.mrb[46].mxu0 }
 0xb92   : > { %4821 = vpow2.f32 %v3657_v40  ;;  %v3204_v11 = vadd.f32 %v4175_v16, %v3643_v17  ;;  %v3198_v22 = vpop.f32.mrb[47].mxu0 }
 0xb93   : > { %4823 = vpow2.f32 %v3656_v57  ;;  %v3199_v1 = vadd.f32 %v3643_v17, %v3198_v22 }
 0xb94   : > { %v4814_v0 = vpop.eup %4813  ;;  %v3659_v27 = vmul.f32 -1.442695, %v3204_v11 }
 0xb95   : > { %v4816_v36 = vpop.eup %4815  ;;  %v3232_v10 = vadd.f32 1.0, %v4814_v0  ;;  %v3658_v30 = vmul.f32 -1.442695, %v3199_v1 }
 0xb96   : > { %v3231_v21 = vadd.f32 1.0, %v4816_v36  ;;  %4825 = vpow2.f32 %v3659_v27 }
 0xb97   : > { %4827 = vrcp.f32 %v3232_v10 }
 0xb98   : > { %v4818_v7 = vpop.eup %4817  ;;  %4829 = vrcp.f32 %v3231_v21 }
 0xb99   : > { %v4820_v58 = vpop.eup %4819  ;;  %v3234_v52 = vadd.f32 1.0, %v4818_v7  ;;  %4831 = vpow2.f32 %v3658_v30 }
 0xb9a   : > { %v3233_v47 = vadd.f32 1.0, %v4820_v58 }
 0xb9b   : > { %4833 = vrcp.f32 %v3234_v52 }
 0xb9c   : > { %v4822_v28 = vpop.eup %4821  ;;  %4835 = vrcp.f32 %v3233_v47 }
 0xb9d   : > { %v4824_v15 = vpop.eup %4823  ;;  %v3236_v54 = vadd.f32 1.0, %v4822_v28 }
 0xb9e   : > { %v3235_v50 = vadd.f32 1.0, %v4824_v15 }
 0xb9f   : > { %4837 = vrcp.f32 %v3236_v54 }
 0xba0   : > { %v4826_v8 = vpop.eup %4825  ;;  %4839 = vrcp.f32 %v3235_v50 }
 0xba1   : > { %v4828_v18 = vpop.eup %4827  ;;  %v3238_v31 = vadd.f32 1.0, %v4826_v8 }
 0xba2   : > { %v4830_v46 = vpop.eup %4829  ;;  %v3256_v38 = vmul.f32 %v4828_v18, %v3174_v41 }
 0xba3   : > { %v4832_v4 = vpop.eup %4831  ;;  %v3255_v34 = vmul.f32 %v4830_v46, %v3169_v43  ;;  %4841 = vrcp.f32 %v3238_v31 }
 0xba4   : > { %v3237_v56 = vadd.f32 1.0, %v4832_v4 }
 0xba5   : > { %v4834_v25 = vpop.eup %4833  ;;  %4208 = vmatprep.mubr.f32.mxu1 %v3255_v34 }
 0xba6   : > { %v4836_v6 = vpop.eup %4835  ;;  %4843 = vrcp.f32 %v3237_v56  ;;  %4209 = vmatmul.mubr.f32.vlgmr.msra.gmra.mrb[40].mxu1 %v3256_v38  ;;  %v3258_v60 = vmul.f32 %v4834_v25, %v3184_v49 }
 0xba7   : > { %v3257_v9 = vmul.f32 %v4836_v6, %v3179_v5 }
 0xba9   : > { %v4838_v44 = vpop.eup %4837  ;;  %4211 = vmatprep.mubr.f32.mxu1 %v3257_v9 }
 0xbaa   : > { %v4840_v24 = vpop.eup %4839  ;;  %4212 = vmatmul.mubr.f32.gmra.mrb[42].mxu1 %v3258_v60  ;;  %v3260_v3 = vmul.f32 %v4838_v44, %v3194_v32 }
 0xbab   : > { %v3259_v53 = vmul.f32 %v4840_v24, %v3189_v14 }
 0xbad   : > { %4214 = vmatprep.mubr.f32.mxu1 %v3259_v53  ;;  %v4842_v48 = vpop.eup %4841 }
 0xbae   : > { %4215 = vmatmul.mubr.f32.gmra.mrb[44].mxu1 %v3260_v3  ;;  %v3262_v17 = vmul.f32 %v4842_v48, %v3204_v11 }
 0xbb0   : > { %v4844_v37 = vpop.eup %4843 }
 0xbb1   : > { %v3261_v33 = vmul.f32 %v4844_v37, %v3199_v1 }
 0xbb3   : > { %4217 = vmatprep.mubr.f32.mxu1 %v3261_v33 }
 0xbb4   : > { %4218 = vmatmul.mubr.f32.gmra.mrb[46].mxu1 %v3262_v17 }
 0xc79   : > { %v4210_v41 = vpop.f32.mrb[40].mxu1 }
 0xc7a   : > { %v3358_v23 = vadd.f32 %v4210_v41, %v3660_v63  ;;  %v3352_v43 = vpop.f32.mrb[41].mxu1 }
 0xc7b   : > { %v3353_v12 = vadd.f32 %v3660_v63, %v3352_v43 }
 0xc7c   : > { %v3392_v26 = vadd.f32 %v3358_v23, %v6433_v59 }
 0xc7d   : > { %v3391_v19 = vadd.f32 %v3353_v12, %v6430_v55  ;;  %v4213_v49 = vpop.f32.mrb[42].mxu1 }
 0xc7e   : > { %3400 = vst.msk [vmem:[%s423_s14 + $0x8] sm:$0xff] %vm452_vm0, %v3392_v26  ;;  %v3368_v51 = vadd.f32 %v4213_v49, %v3660_v63  ;;  %v3362_v5 = vpop.f32.mrb[43].mxu1 }
 0xc7f   : > { %3399 = vst.msk [vmem:[%s423_s14] sm:$0xff] %vm452_vm0, %v3391_v19  ;;  %v3363_v35 = vadd.f32 %v3660_v63, %v3362_v5 }
 0xc80   : > { %v3394_v42 = vadd.f32 %v3368_v51, %v6443_v45 }
 0xc81   : > { %v3393_v20 = vadd.f32 %v3363_v35, %v6440_v61  ;;  %v4216_v32 = vpop.f32.mrb[44].mxu1 }
 0xc82   : > { %3402 = vst.msk [vmem:[%s423_s14 + $0x18] sm:$0xff] %vm452_vm0, %v3394_v42  ;;  %v3378_v59 = vadd.f32 %v4216_v32, %v3660_v63  ;;  %v3372_v2 = vpop.f32.mrb[45].mxu1 }
 0xc83   : > { %3401 = vst.msk [vmem:[%s423_s14 + $0x10] sm:$0xff] %vm452_vm0, %v3393_v20  ;;  %v3373_v55 = vadd.f32 %v3660_v63, %v3372_v2 }
 0xc84   : > { %v3396_v14 = vadd.f32 %v3378_v59, %v6453_v62 }
 0xc85   : > { %v3395_v40 = vadd.f32 %v3373_v55, %v6450_v13 }
 0xc86   : > { %3404 = vst.msk [vmem:[%s423_s14 + $0x28] sm:$0xff] %vm452_vm0, %v3396_v14 }
 0xc87   : > { %3403 = vst.msk [vmem:[%s423_s14 + $0x20] sm:$0xff] %vm452_vm0, %v3395_v40  ;;  %v4219_v45 = vpop.f32.mrb[46].mxu1 }
 0xc88   : > { %v3388_v61 = vadd.f32 %v4219_v45, %v3660_v63  ;;  %v3382_v57 = vpop.f32.mrb[47].mxu1 }
 0xc89   : > { %v3383_v16 = vadd.f32 %v3660_v63, %v3382_v57 }
 0xc8a   : > { %v3398_v11 = vadd.f32 %v3388_v61, %v6463_v39 }
 0xc8b   : > { %v3397_v13 = vadd.f32 %v3383_v16, %v6460_v29 }
 0xc8c   : > { %3406 = vst.msk [vmem:[%s423_s14 + $0x38] sm:$0xff] %vm452_vm0, %v3398_v11 }
 0xc8d   : > { %3405 = vst.msk [vmem:[%s423_s14 + $0x30] sm:$0xff] %vm452_vm0, %v3397_v13 }
 0xc8e   : > { %4950 = shalt.err (!%p4947_p9)
}
 0xc8f   : > { %s4951_s20 = scalar_lea.hbm %s6543_s13, 1024  ;;  %s4955_s24 = scalar_lea.hbm %s6679_s23, 2048 }
 0xc90   : > { %p4952_p2 = scmp.ne.s32.totalorder %s6543_s13, %s4951_s20  ;;  %p4956_p5 = scmp.lt.u32.totalorder %s6543_s13, %s6679_s23 }
 0xc91   : > { %p4957_p10 = scmp.lt.u32.totalorder %s4955_s24, %s4951_s20  ;;  %p4959_p12 = scmp.lt.u32.totalorder %s4951_s20, %s6543_s13 }
 0xc92   : > { %p4953_p0 = pnand %p4952_p2, %p6680_p7 }
 0xc93   : > { %p4958_p4 = por %p4957_p10, %p4956_p5 }
 0xc94   : > { %p4954_p3 = pneg %p4953_p0 }
 0xc95   : > { %p4960_p8 = por %p4959_p12, %p4958_p4 }
 0xc97   : > { %p4961_p11 = pnand %p4960_p8, %p4954_p3 }
 0xc99   : > { %4964 = shalt.err (!%p4961_p11)
}
 0xc9a   : > { %s5027_s16 = smov 128  }
 0xc9b   : > { %4472 = dma.vmem_to_hbm [thread:$0]  (%p6680_p7), %s6546_s19, 1024, %s6543_s13, %s6552_s21, %s5027_s16, %s5027_s16, %s5022_s15  }
 0xc9c PF: > { %s6681_s12 = sld [smem:[#allocation14_spill]]  ;;  %s6682_s11 = sld [smem:[#allocation12_spill]] }
 0xc9d   : > { %s6683_s22 = sld [smem:[#allocation17_spill]] }
 0xca2   : > { %p4494_p13 = scmp.ge.s32.totalorder %s6681_s12, 2  ;;  %s3436_s29 = sand.u32 1, %s6682_s11  }
 0xca3   : > { %p6684_p1 = scmp.ne.s32.totalorder %s6683_s22, 0  ;;  %s3437_s26 = scalar_lea.sflag [#allocation4], %s3436_s29 }
 0xca5   : > { %p4485_p6 = pnand %p4494_p13, %p6684_p1 }
 0xca7   : > { %4990 = dma.done.wait (!%p4485_p6), %s3437_s26, 1024  }
 0xca8   : > { %4992 = vsyncadd (!%p4485_p6), %s3437_s26, 4294966272  ;;  %s6685_s20 = sld [smem:[#allocation15_spill]]  ;;  %s6686_s28 = sld [smem:[#allocation13_spill]] }
 0xca9   : > { %s6687_s19 = sld [smem:[#allocation16_spill]]  ;;  %s6688_s17 = smov %s4999_s18 }
 0xcae   : > { %p23_p9 = scmp.ge.s32.totalorder %s6685_s20, 4   ;;  %s6689_s18 = smov %s6686_s28 }
 0xcb0   :  { %25 = sbr.rel (!%p23_p9) target bundleno = 7 (0x7), region = 112 }
 0xcb7   :  { %3442 = vsyncpa [#allocation3], 1 }
 0xcb8   :  { %3444 = vsyncpa [#allocation3 + $0x1], 1 }
 0xcb9   :  { %3445 = vsyncpa [#allocation6], 1 }
 0xcba   :  { %3446 = vsyncpa [#allocation4], 1 }
 0xcbb   :  { %3448 = vsyncpa [#allocation4 + $0x1], 1 }

</bundles_post_ra>
